<compile_context>
chip_gen: v7x
topology: tpu7x:2x2x1
jax: 0.10.0
libtpu: 0.0.40
codegen_flags: <defaults>
</compile_context>

<pallas_src>
import functools

import jax
import jax.numpy as jnp
from jax.experimental import pallas as pl
from jax.experimental.pallas import tpu as pltpu


# Left padding of the W axis inside the activation scratch.  16 keeps the
# activation store aligned to the bf16 (16, 128) sublane tile.
PADL = 16


def conv_block_kernel(
    x_ref,      # (H, W, Cin)          f32   raw input (batch dim squeezed)
    gmat_ref,   # (Cin, Cin)           f32   group-averaging matrix
    gamma_ref,  # (1, Cin)             f32
    beta_ref,   # (1, Cin)             f32
    w_ref,      # (9, Cin, Cout)       bf16  conv taps, tap-major, (Cin, Cout)
    b_ref,      # (1, Cout)            f32
    o_ref,      # (HW, Cout)           f32   output (batch dim squeezed)
    a_ref,      # (H+2, W+PADL+2, Cin) bf16  zero-padded activation scratch
    *,
    H: int, W: int, C: int, Cout: int, eps: float,
):
    HW = H * W
    x = x_ref[...].reshape(HW, C)                          # (HW, C) f32

    # ---- GroupNorm --------------------------------------------------------
    s = jnp.sum(x, axis=0, keepdims=True)                  # (1, C)
    sq = jnp.sum(x * x, axis=0, keepdims=True)             # (1, C)
    mean = jnp.dot(s, gmat_ref[...], preferred_element_type=jnp.float32)   # per-channel group mean
    ex2 = jnp.dot(sq, gmat_ref[...], preferred_element_type=jnp.float32)   # per-channel group E[x^2]
    var = jnp.maximum(ex2 - mean * mean, 0.0)              # clamp single-pass variance
    scale = gamma_ref[...] * jax.lax.rsqrt(var + eps)      # (1, C)
    shift = beta_ref[...] - mean * scale                   # (1, C)
    xn = x * scale + shift                                 # (HW, C)

    # ---- SiLU (+ Dropout p = 0 -> identity) -------------------------------
    act = xn * (1.0 / (1.0 + jnp.exp(-xn)))
    # TODO(synk): training-mode dropout (drop_prob > 0) would use
    # pltpu.prng_seed + pltpu.stateful_bernoulli; with drop_prob = 0.0
    # (module default / eval) it is the identity.

    # ---- write activation into the zero-padded scratch ---------------------
    # Re-zero the whole scratch every step: it persists across grid steps and
    # the batch axis is "parallel" (megacore may split it), so a
    # program_id==0-only init would be unsafe.  Cost is trivial.
    a_ref[...] = jnp.zeros_like(a_ref)
    a_ref[1:H + 1, PADL:PADL + W, :] = act.reshape(H, W, C).astype(a_ref.dtype)

    # ---- 3x3 conv: nine accumulating bf16 matmuls, f32 accumulation --------
    acc = jnp.broadcast_to(b_ref[...], (HW, Cout))         # bias folded into init
    for kh in range(3):
        for kw in range(3):
            c0 = PADL - 1 + kw
            lhs = a_ref[kh:kh + H, c0:c0 + W, :].reshape(HW, C)   # bf16
            acc = acc + jnp.dot(lhs, w_ref[kh * 3 + kw],
                                preferred_element_type=jnp.float32)
    o_ref[...] = acc.astype(o_ref.dtype)


def conv_block(x_nchw, params, *, num_groups: int = 32, eps: float = 1e-5,
               drop_prob: float = 0.0):
    """x_nchw: (B, Cin, H, W) float32. Returns (B, Cout, H, W) float32."""
    del drop_prob  # p = 0.0 (module default) -> dropout is the identity
    B, C, H, W = x_nchw.shape
    Cout = params["w"].shape[0]
    assert C % num_groups == 0
    # W % 8 == 0 keeps the in-kernel (H, W, C) <-> (H*W, C) reshapes
    # layout-preserving (W rows map cleanly onto sublane tiles).
    assert W % 8 == 0, "this kernel assumes W % 8 == 0"

    # NCHW -> NHWC once in the wrapper (channels -> lanes inside the kernel).
    x_nhwc = jnp.transpose(x_nchw, (0, 2, 3, 1)).astype(jnp.float32)

    # Dense, lane-dense group-averaging matrix:
    # gmat[i, j] = 1/(H*W*cs) if group(i) == group(j) else 0.
    cs = C // num_groups
    gid = jnp.arange(C) // cs
    gmat = (gid[:, None] == gid[None, :]).astype(jnp.float32) / float(H * W * cs)

    gamma = params["gamma"].reshape(1, C).astype(jnp.float32)
    beta = params["beta"].reshape(1, C).astype(jnp.float32)
    # PyTorch Conv2d weight is (Cout, Cin, kh, kw); per-tap right-multiplication
    # needs (kh, kw, Cin, Cout), flattened tap-major, cast to bf16 once.
    w_taps = jnp.transpose(params["w"], (2, 3, 1, 0)).reshape(9, C, Cout)
    w_taps = w_taps.astype(jnp.bfloat16)
    bias = params["b"].reshape(1, Cout).astype(jnp.float32)

    kern = functools.partial(conv_block_kernel, H=H, W=W, C=C, Cout=Cout, eps=eps)
    const2 = lambda b: (0, 0)

    out_seq = pl.pallas_call(
        kern,
        out_shape=jax.ShapeDtypeStruct((B, H * W, Cout), jnp.float32),
        grid_spec=pltpu.PrefetchScalarGridSpec(
            num_scalar_prefetch=0,
            grid=(B,),
            in_specs=[
                pl.BlockSpec((None, H, W, C), lambda b: (b, 0, 0, 0)),   # x
                pl.BlockSpec((C, C), const2),                            # gmat
                pl.BlockSpec((1, C), const2),                            # gamma
                pl.BlockSpec((1, C), const2),                            # beta
                pl.BlockSpec((9, C, Cout), lambda b: (0, 0, 0)),         # conv taps
                pl.BlockSpec((1, Cout), const2),                         # conv bias
            ],
            out_specs=pl.BlockSpec((None, H * W, Cout), lambda b: (b, 0, 0)),
            scratch_shapes=[pltpu.VMEM((H + 2, W + PADL + 2, C), jnp.bfloat16)],
        ),
        compiler_params=pltpu.CompilerParams(
            dimension_semantics=("parallel",),
        ),
    )(x_nhwc, gmat, gamma, beta, w_taps, bias)

    # (B, HW, Cout) -> NCHW
    return jnp.transpose(out_seq.reshape(B, H, W, Cout), (0, 3, 1, 2))


def conv_block_reference(x, params, *, num_groups: int, eps: float = 1e-5):
    """Pure-JAX f32 reference matching the PyTorch forward exactly."""
    B, C, H, W = x.shape
    G = num_groups
    xg = x.reshape(B, G, C // G, H, W)
    mean = jnp.mean(xg, axis=(2, 3, 4), keepdims=True)
    var = jnp.mean((xg - mean) ** 2, axis=(2, 3, 4), keepdims=True)
    xn = ((xg - mean) / jnp.sqrt(var + eps)).reshape(B, C, H, W)
    xn = xn * params["gamma"][None, :, None, None] + params["beta"][None, :, None, None]
    a = xn * jax.nn.sigmoid(xn)          # SiLU; dropout(p=0) is identity
    out = jax.lax.conv_general_dilated(
        a, params["w"], window_strides=(1, 1), padding=((1, 1), (1, 1)),
        dimension_numbers=("NCHW", "OIHW", "NCHW"))
    return out + params["b"][None, :, None, None]


if __name__ == "__main__":
    B, Cin, Cout, H, W = 4, 128, 128, 16, 16     # Cin divisible by num_groups=32
    NUM_GROUPS = 32

    key = jax.random.PRNGKey(0)
    keys = jax.random.split(key, 5)
    x = jax.random.normal(keys[0], (B, Cin, H, W), dtype=jnp.float32)
    params = {
        "gamma": 1.0 + 0.1 * jax.random.normal(keys[1], (Cin,), dtype=jnp.float32),
        "beta": 0.1 * jax.random.normal(keys[2], (Cin,), dtype=jnp.float32),
        "w": 0.05 * jax.random.normal(keys[3], (Cout, Cin, 3, 3), dtype=jnp.float32),
        "b": 0.1 * jax.random.normal(keys[4], (Cout,), dtype=jnp.float32),
    }

    out = jax.block_until_ready(conv_block(x, params, num_groups=NUM_GROUPS))
    ref = jax.block_until_ready(conv_block_reference(x, params, num_groups=NUM_GROUPS))

    assert out.shape == ref.shape == (B, Cout, H, W)
    # bf16 conv operands with f32 accumulation -> a few 1e-3 of absolute error
    # against the pure-f32 reference is expected.
    err = float(jnp.max(jnp.abs(out - ref)))
    assert err < 3e-2, f"max abs err {err}"
    print("KERNEL_OK")
</pallas_src>

<mosaic_0001>
module attributes {stable_mosaic.version = 11 : i64} {
  func.func @conv_block_kernel(%arg0: i32, %arg1: memref<1x16x16x128xf32, #tpu.memory_space<vmem>>, %arg2: memref<128x128xf32, #tpu.memory_space<vmem>>, %arg3: memref<1x128xf32, #tpu.memory_space<vmem>>, %arg4: memref<1x128xf32, #tpu.memory_space<vmem>>, %arg5: memref<9x128x128xbf16, #tpu.memory_space<vmem>>, %arg6: memref<1x128xf32, #tpu.memory_space<vmem>>, %arg7: memref<1x256x128xf32, #tpu.memory_space<vmem>>, %arg8: memref<18x34x128xbf16, #tpu.memory_space<vmem>>) attributes {dimension_semantics = [#tpu.dimension_semantics<parallel>], iteration_bounds = array<i64: 4>, scalar_prefetch = 0 : i64, scratch_operands = 1 : i64, tpu.core_type = #tpu.core_type<tc>, window_params = [{transform_indices = @transform_0, window_bounds = array<i64: 1, 16, 16, 128>}, {pipeline_mode = #tpu.pipeline_mode<synchronous>, transform_indices = @transform_1, window_bounds = array<i64: 128, 128>}, {pipeline_mode = #tpu.pipeline_mode<synchronous>, transform_indices = @transform_2, window_bounds = array<i64: 1, 128>}, {pipeline_mode = #tpu.pipeline_mode<synchronous>, transform_indices = @transform_3, window_bounds = array<i64: 1, 128>}, {pipeline_mode = #tpu.pipeline_mode<synchronous>, transform_indices = @transform_4, window_bounds = array<i64: 9, 128, 128>}, {pipeline_mode = #tpu.pipeline_mode<synchronous>, transform_indices = @transform_5, window_bounds = array<i64: 1, 128>}, {transform_indices = @transform_6, window_bounds = array<i64: 1, 256, 128>}]} {
    %c0 = arith.constant 0 : index
    %c0_0 = arith.constant 0 : index
    %c0_1 = arith.constant 0 : index
    %c0_2 = arith.constant 0 : index
    %0 = vector.load %arg1[%c0, %c0_0, %c0_1, %c0_2] : memref<1x16x16x128xf32, #tpu.memory_space<vmem>>, vector<1x16x16x128xf32>
    %1 = vector.shape_cast %0 : vector<1x16x16x128xf32> to vector<16x16x128xf32>
    %2 = vector.shape_cast %1 : vector<16x16x128xf32> to vector<256x128xf32>
    %cst = arith.constant dense<0.000000e+00> : vector<128xf32>
    %3 = vector.multi_reduction <add>, %2, %cst [0] : vector<256x128xf32> to vector<128xf32>
    %4 = vector.shape_cast %3 : vector<128xf32> to vector<1x128xf32>
    %5 = arith.mulf %2, %2 : vector<256x128xf32>
    %cst_3 = arith.constant dense<0.000000e+00> : vector<128xf32>
    %6 = vector.multi_reduction <add>, %5, %cst_3 [0] : vector<256x128xf32> to vector<128xf32>
    %7 = vector.shape_cast %6 : vector<128xf32> to vector<1x128xf32>
    %c0_4 = arith.constant 0 : index
    %c0_5 = arith.constant 0 : index
    %8 = vector.load %arg2[%c0_4, %c0_5] : memref<128x128xf32, #tpu.memory_space<vmem>>, vector<128x128xf32>
    %cst_6 = arith.constant dense<0.000000e+00> : vector<1x128xf32>
    %9 = tpu.matmul %4, %8, %cst_6 {dimension_numbers = #tpu.dot_dimension_numbers<[1], [0], [0], [1], [0, 0, 1, 1], [], []>} : vector<1x128xf32>, vector<128x128xf32>, vector<1x128xf32> -> vector<1x128xf32>
    %c0_7 = arith.constant 0 : index
    %c0_8 = arith.constant 0 : index
    %10 = vector.load %arg2[%c0_7, %c0_8] : memref<128x128xf32, #tpu.memory_space<vmem>>, vector<128x128xf32>
    %cst_9 = arith.constant dense<0.000000e+00> : vector<1x128xf32>
    %11 = tpu.matmul %7, %10, %cst_9 {dimension_numbers = #tpu.dot_dimension_numbers<[1], [0], [0], [1], [0, 0, 1, 1], [], []>} : vector<1x128xf32>, vector<128x128xf32>, vector<1x128xf32> -> vector<1x128xf32>
    %12 = arith.mulf %9, %9 : vector<1x128xf32>
    %13 = arith.subf %11, %12 : vector<1x128xf32>
    %cst_10 = arith.constant 0.000000e+00 : f32
    %14 = vector.broadcast %cst_10 : f32 to vector<1x128xf32>
    %15 = arith.maximumf %13, %14 : vector<1x128xf32>
    %c0_11 = arith.constant 0 : index
    %c0_12 = arith.constant 0 : index
    %16 = vector.load %arg3[%c0_11, %c0_12] : memref<1x128xf32, #tpu.memory_space<vmem>>, vector<1x128xf32>
    %cst_13 = arith.constant 9.99999974E-6 : f32
    %17 = vector.broadcast %cst_13 : f32 to vector<1x128xf32>
    %18 = arith.addf %15, %17 : vector<1x128xf32>
    %19 = math.rsqrt %18 : vector<1x128xf32>
    %20 = arith.mulf %16, %19 : vector<1x128xf32>
    %c0_14 = arith.constant 0 : index
    %c0_15 = arith.constant 0 : index
    %21 = vector.load %arg4[%c0_14, %c0_15] : memref<1x128xf32, #tpu.memory_space<vmem>>, vector<1x128xf32>
    %22 = arith.mulf %9, %20 : vector<1x128xf32>
    %23 = arith.subf %21, %22 : vector<1x128xf32>
    %24 = vector.broadcast %20 : vector<1x128xf32> to vector<256x128xf32>
    %25 = arith.mulf %2, %24 : vector<256x128xf32>
    %26 = vector.broadcast %23 : vector<1x128xf32> to vector<256x128xf32>
    %27 = arith.addf %25, %26 : vector<256x128xf32>
    %cst_16 = arith.constant 0.000000e+00 : f32
    %28 = vector.broadcast %cst_16 : f32 to vector<256x128xf32>
    %29 = arith.subf %28, %27 : vector<256x128xf32>
    %30 = math.exp %29 : vector<256x128xf32>
    %cst_17 = arith.constant 1.000000e+00 : f32
    %31 = vector.broadcast %cst_17 : f32 to vector<256x128xf32>
    %32 = arith.addf %31, %30 : vector<256x128xf32>
    %cst_18 = arith.constant 1.000000e+00 : f32
    %33 = vector.broadcast %cst_18 : f32 to vector<256x128xf32>
    %34 = arith.divf %33, %32 : vector<256x128xf32>
    %35 = arith.mulf %27, %34 : vector<256x128xf32>
    %cst_19 = arith.constant 0.000000e+00 : bf16
    %36 = vector.broadcast %cst_19 : bf16 to vector<18x34x128xbf16>
    %c0_20 = arith.constant 0 : index
    %c0_21 = arith.constant 0 : index
    %c0_22 = arith.constant 0 : index
    %37 = vector.load %arg8[%c0_20, %c0_21, %c0_22] : memref<18x34x128xbf16, #tpu.memory_space<vmem>>, vector<18x34x128xbf16>
    tpu.vector_store %arg8[%c0_20, %c0_21, %c0_22], %36 {strides = array<i32>} : memref<18x34x128xbf16, #tpu.memory_space<vmem>>, vector<18x34x128xbf16>,
    %38 = vector.shape_cast %35 : vector<256x128xf32> to vector<16x16x128xf32>
    %39 = arith.truncf %38 : vector<16x16x128xf32> to vector<16x16x128xbf16>
    %c1 = arith.constant 1 : index
    %c16 = arith.constant 16 : index
    %c0_23 = arith.constant 0 : index
    %40 = vector.load %arg8[%c1, %c16, %c0_23] : memref<18x34x128xbf16, #tpu.memory_space<vmem>>, vector<16x16x128xbf16>
    tpu.vector_store %arg8[%c1, %c16, %c0_23], %39 {strides = array<i32>} : memref<18x34x128xbf16, #tpu.memory_space<vmem>>, vector<16x16x128xbf16>,
    %c0_24 = arith.constant 0 : index
    %c0_25 = arith.constant 0 : index
    %41 = vector.load %arg6[%c0_24, %c0_25] : memref<1x128xf32, #tpu.memory_space<vmem>>, vector<1x128xf32>
    %42 = vector.shape_cast %41 : vector<1x128xf32> to vector<1x128xf32>
    %43 = vector.broadcast %42 : vector<1x128xf32> to vector<256x128xf32>
    %c0_26 = arith.constant 0 : index
    %c15 = arith.constant 15 : index
    %c0_27 = arith.constant 0 : index
    %44 = vector.load %arg8[%c0_26, %c15, %c0_27] : memref<18x34x128xbf16, #tpu.memory_space<vmem>>, vector<16x16x128xbf16>
    %45 = vector.shape_cast %44 : vector<16x16x128xbf16> to vector<256x128xbf16>
    %c0_28 = arith.constant 0 : index
    %c0_29 = arith.constant 0 : index
    %c0_30 = arith.constant 0 : index
    %46 = vector.load %arg5[%c0_28, %c0_29, %c0_30] : memref<9x128x128xbf16, #tpu.memory_space<vmem>>, vector<1x128x128xbf16>
    %47 = vector.shape_cast %46 : vector<1x128x128xbf16> to vector<128x128xbf16>
    %cst_31 = arith.constant dense<0.000000e+00> : vector<256x128xf32>
    %48 = tpu.matmul %45, %47, %cst_31 {dimension_numbers = #tpu.dot_dimension_numbers<[1], [0], [0], [1], [0, 0, 1, 1], [], []>} : vector<256x128xbf16>, vector<128x128xbf16>, vector<256x128xf32> -> vector<256x128xf32>
    %49 = arith.addf %43, %48 : vector<256x128xf32>
    %c0_32 = arith.constant 0 : index
    %c16_33 = arith.constant 16 : index
    %c0_34 = arith.constant 0 : index
    %50 = vector.load %arg8[%c0_32, %c16_33, %c0_34] : memref<18x34x128xbf16, #tpu.memory_space<vmem>>, vector<16x16x128xbf16>
    %51 = vector.shape_cast %50 : vector<16x16x128xbf16> to vector<256x128xbf16>
    %c1_35 = arith.constant 1 : index
    %c0_36 = arith.constant 0 : index
    %c0_37 = arith.constant 0 : index
    %52 = vector.load %arg5[%c1_35, %c0_36, %c0_37] : memref<9x128x128xbf16, #tpu.memory_space<vmem>>, vector<1x128x128xbf16>
    %53 = vector.shape_cast %52 : vector<1x128x128xbf16> to vector<128x128xbf16>
    %cst_38 = arith.constant dense<0.000000e+00> : vector<256x128xf32>
    %54 = tpu.matmul %51, %53, %cst_38 {dimension_numbers = #tpu.dot_dimension_numbers<[1], [0], [0], [1], [0, 0, 1, 1], [], []>} : vector<256x128xbf16>, vector<128x128xbf16>, vector<256x128xf32> -> vector<256x128xf32>
    %55 = arith.addf %49, %54 : vector<256x128xf32>
    %c0_39 = arith.constant 0 : index
    %c17 = arith.constant 17 : index
    %c0_40 = arith.constant 0 : index
    %56 = vector.load %arg8[%c0_39, %c17, %c0_40] : memref<18x34x128xbf16, #tpu.memory_space<vmem>>, vector<16x16x128xbf16>
    %57 = vector.shape_cast %56 : vector<16x16x128xbf16> to vector<256x128xbf16>
    %c2 = arith.constant 2 : index
    %c0_41 = arith.constant 0 : index
    %c0_42 = arith.constant 0 : index
    %58 = vector.load %arg5[%c2, %c0_41, %c0_42] : memref<9x128x128xbf16, #tpu.memory_space<vmem>>, vector<1x128x128xbf16>
    %59 = vector.shape_cast %58 : vector<1x128x128xbf16> to vector<128x128xbf16>
    %cst_43 = arith.constant dense<0.000000e+00> : vector<256x128xf32>
    %60 = tpu.matmul %57, %59, %cst_43 {dimension_numbers = #tpu.dot_dimension_numbers<[1], [0], [0], [1], [0, 0, 1, 1], [], []>} : vector<256x128xbf16>, vector<128x128xbf16>, vector<256x128xf32> -> vector<256x128xf32>
    %61 = arith.addf %55, %60 : vector<256x128xf32>
    %c1_44 = arith.constant 1 : index
    %c15_45 = arith.constant 15 : index
    %c0_46 = arith.constant 0 : index
    %62 = vector.load %arg8[%c1_44, %c15_45, %c0_46] : memref<18x34x128xbf16, #tpu.memory_space<vmem>>, vector<16x16x128xbf16>
    %63 = vector.shape_cast %62 : vector<16x16x128xbf16> to vector<256x128xbf16>
    %c3 = arith.constant 3 : index
    %c0_47 = arith.constant 0 : index
    %c0_48 = arith.constant 0 : index
    %64 = vector.load %arg5[%c3, %c0_47, %c0_48] : memref<9x128x128xbf16, #tpu.memory_space<vmem>>, vector<1x128x128xbf16>
    %65 = vector.shape_cast %64 : vector<1x128x128xbf16> to vector<128x128xbf16>
    %cst_49 = arith.constant dense<0.000000e+00> : vector<256x128xf32>
    %66 = tpu.matmul %63, %65, %cst_49 {dimension_numbers = #tpu.dot_dimension_numbers<[1], [0], [0], [1], [0, 0, 1, 1], [], []>} : vector<256x128xbf16>, vector<128x128xbf16>, vector<256x128xf32> -> vector<256x128xf32>
    %67 = arith.addf %61, %66 : vector<256x128xf32>
    %c1_50 = arith.constant 1 : index
    %c16_51 = arith.constant 16 : index
    %c0_52 = arith.constant 0 : index
    %68 = vector.load %arg8[%c1_50, %c16_51, %c0_52] : memref<18x34x128xbf16, #tpu.memory_space<vmem>>, vector<16x16x128xbf16>
    %69 = vector.shape_cast %68 : vector<16x16x128xbf16> to vector<256x128xbf16>
    %c4 = arith.constant 4 : index
    %c0_53 = arith.constant 0 : index
    %c0_54 = arith.constant 0 : index
    %70 = vector.load %arg5[%c4, %c0_53, %c0_54] : memref<9x128x128xbf16, #tpu.memory_space<vmem>>, vector<1x128x128xbf16>
    %71 = vector.shape_cast %70 : vector<1x128x128xbf16> to vector<128x128xbf16>
    %cst_55 = arith.constant dense<0.000000e+00> : vector<256x128xf32>
    %72 = tpu.matmul %69, %71, %cst_55 {dimension_numbers = #tpu.dot_dimension_numbers<[1], [0], [0], [1], [0, 0, 1, 1], [], []>} : vector<256x128xbf16>, vector<128x128xbf16>, vector<256x128xf32> -> vector<256x128xf32>
    %73 = arith.addf %67, %72 : vector<256x128xf32>
    %c1_56 = arith.constant 1 : index
    %c17_57 = arith.constant 17 : index
    %c0_58 = arith.constant 0 : index
    %74 = vector.load %arg8[%c1_56, %c17_57, %c0_58] : memref<18x34x128xbf16, #tpu.memory_space<vmem>>, vector<16x16x128xbf16>
    %75 = vector.shape_cast %74 : vector<16x16x128xbf16> to vector<256x128xbf16>
    %c5 = arith.constant 5 : index
    %c0_59 = arith.constant 0 : index
    %c0_60 = arith.constant 0 : index
    %76 = vector.load %arg5[%c5, %c0_59, %c0_60] : memref<9x128x128xbf16, #tpu.memory_space<vmem>>, vector<1x128x128xbf16>
    %77 = vector.shape_cast %76 : vector<1x128x128xbf16> to vector<128x128xbf16>
    %cst_61 = arith.constant dense<0.000000e+00> : vector<256x128xf32>
    %78 = tpu.matmul %75, %77, %cst_61 {dimension_numbers = #tpu.dot_dimension_numbers<[1], [0], [0], [1], [0, 0, 1, 1], [], []>} : vector<256x128xbf16>, vector<128x128xbf16>, vector<256x128xf32> -> vector<256x128xf32>
    %79 = arith.addf %73, %78 : vector<256x128xf32>
    %c2_62 = arith.constant 2 : index
    %c15_63 = arith.constant 15 : index
    %c0_64 = arith.constant 0 : index
    %80 = vector.load %arg8[%c2_62, %c15_63, %c0_64] : memref<18x34x128xbf16, #tpu.memory_space<vmem>>, vector<16x16x128xbf16>
    %81 = vector.shape_cast %80 : vector<16x16x128xbf16> to vector<256x128xbf16>
    %c6 = arith.constant 6 : index
    %c0_65 = arith.constant 0 : index
    %c0_66 = arith.constant 0 : index
    %82 = vector.load %arg5[%c6, %c0_65, %c0_66] : memref<9x128x128xbf16, #tpu.memory_space<vmem>>, vector<1x128x128xbf16>
    %83 = vector.shape_cast %82 : vector<1x128x128xbf16> to vector<128x128xbf16>
    %cst_67 = arith.constant dense<0.000000e+00> : vector<256x128xf32>
    %84 = tpu.matmul %81, %83, %cst_67 {dimension_numbers = #tpu.dot_dimension_numbers<[1], [0], [0], [1], [0, 0, 1, 1], [], []>} : vector<256x128xbf16>, vector<128x128xbf16>, vector<256x128xf32> -> vector<256x128xf32>
    %85 = arith.addf %79, %84 : vector<256x128xf32>
    %c2_68 = arith.constant 2 : index
    %c16_69 = arith.constant 16 : index
    %c0_70 = arith.constant 0 : index
    %86 = vector.load %arg8[%c2_68, %c16_69, %c0_70] : memref<18x34x128xbf16, #tpu.memory_space<vmem>>, vector<16x16x128xbf16>
    %87 = vector.shape_cast %86 : vector<16x16x128xbf16> to vector<256x128xbf16>
    %c7 = arith.constant 7 : index
    %c0_71 = arith.constant 0 : index
    %c0_72 = arith.constant 0 : index
    %88 = vector.load %arg5[%c7, %c0_71, %c0_72] : memref<9x128x128xbf16, #tpu.memory_space<vmem>>, vector<1x128x128xbf16>
    %89 = vector.shape_cast %88 : vector<1x128x128xbf16> to vector<128x128xbf16>
    %cst_73 = arith.constant dense<0.000000e+00> : vector<256x128xf32>
    %90 = tpu.matmul %87, %89, %cst_73 {dimension_numbers = #tpu.dot_dimension_numbers<[1], [0], [0], [1], [0, 0, 1, 1], [], []>} : vector<256x128xbf16>, vector<128x128xbf16>, vector<256x128xf32> -> vector<256x128xf32>
    %91 = arith.addf %85, %90 : vector<256x128xf32>
    %c2_74 = arith.constant 2 : index
    %c17_75 = arith.constant 17 : index
    %c0_76 = arith.constant 0 : index
    %92 = vector.load %arg8[%c2_74, %c17_75, %c0_76] : memref<18x34x128xbf16, #tpu.memory_space<vmem>>, vector<16x16x128xbf16>
    %93 = vector.shape_cast %92 : vector<16x16x128xbf16> to vector<256x128xbf16>
    %c8 = arith.constant 8 : index
    %c0_77 = arith.constant 0 : index
    %c0_78 = arith.constant 0 : index
    %94 = vector.load %arg5[%c8, %c0_77, %c0_78] : memref<9x128x128xbf16, #tpu.memory_space<vmem>>, vector<1x128x128xbf16>
    %95 = vector.shape_cast %94 : vector<1x128x128xbf16> to vector<128x128xbf16>
    %cst_79 = arith.constant dense<0.000000e+00> : vector<256x128xf32>
    %96 = tpu.matmul %93, %95, %cst_79 {dimension_numbers = #tpu.dot_dimension_numbers<[1], [0], [0], [1], [0, 0, 1, 1], [], []>} : vector<256x128xbf16>, vector<128x128xbf16>, vector<256x128xf32> -> vector<256x128xf32>
    %97 = arith.addf %91, %96 : vector<256x128xf32>
    %c0_80 = arith.constant 0 : index
    %c0_81 = arith.constant 0 : index
    %c0_82 = arith.constant 0 : index
    %98 = vector.load %arg7[%c0_80, %c0_81, %c0_82] : memref<1x256x128xf32, #tpu.memory_space<vmem>>, vector<1x256x128xf32>
    %99 = vector.shape_cast %98 : vector<1x256x128xf32> to vector<256x128xf32>
    %100 = vector.shape_cast %97 : vector<256x128xf32> to vector<1x256x128xf32>
    tpu.vector_store %arg7[%c0_80, %c0_81, %c0_82], %100 {strides = array<i32>} : memref<1x256x128xf32, #tpu.memory_space<vmem>>, vector<1x256x128xf32>,
    return
  }
  func.func @transform_0(%arg0: i32) -> (i32, i32, i32, i32) {
    %c0_i32 = arith.constant 0 : i32
    %c0_i32_0 = arith.constant 0 : i32
    %c0_i32_1 = arith.constant 0 : i32
    %c0_i32_2 = arith.constant 0 : i32
    return %arg0, %c0_i32, %c0_i32_0, %c0_i32_1 : i32, i32, i32, i32
  }
  func.func @transform_1(%arg0: i32) -> (i32, i32) {
    %c0_i32 = arith.constant 0 : i32
    %c0_i32_0 = arith.constant 0 : i32
    %c0_i32_1 = arith.constant 0 : i32
    return %c0_i32, %c0_i32_0 : i32, i32
  }
  func.func @transform_2(%arg0: i32) -> (i32, i32) {
    %c0_i32 = arith.constant 0 : i32
    %c0_i32_0 = arith.constant 0 : i32
    %c0_i32_1 = arith.constant 0 : i32
    return %c0_i32, %c0_i32_0 : i32, i32
  }
  func.func @transform_3(%arg0: i32) -> (i32, i32) {
    %c0_i32 = arith.constant 0 : i32
    %c0_i32_0 = arith.constant 0 : i32
    %c0_i32_1 = arith.constant 0 : i32
    return %c0_i32, %c0_i32_0 : i32, i32
  }
  func.func @transform_4(%arg0: i32) -> (i32, i32, i32) {
    %c0_i32 = arith.constant 0 : i32
    %c0_i32_0 = arith.constant 0 : i32
    %c0_i32_1 = arith.constant 0 : i32
    %c0_i32_2 = arith.constant 0 : i32
    return %c0_i32, %c0_i32_0, %c0_i32_1 : i32, i32, i32
  }
  func.func @transform_5(%arg0: i32) -> (i32, i32) {
    %c0_i32 = arith.constant 0 : i32
    %c0_i32_0 = arith.constant 0 : i32
    %c0_i32_1 = arith.constant 0 : i32
    return %c0_i32, %c0_i32_0 : i32, i32
  }
  func.func @transform_6(%arg0: i32) -> (i32, i32, i32) {
    %c0_i32 = arith.constant 0 : i32
    %c0_i32_0 = arith.constant 0 : i32
    %c0_i32_1 = arith.constant 0 : i32
    return %arg0, %c0_i32, %c0_i32_0 : i32, i32, i32
  }
}

</mosaic_0001>

<bundles_post_ra>
// kernel: tpu_custom_call.1
= control target key start
LH: loop header
LB: loop body
LE: loop exit
PB: predicated region body
PF: predicated region fallthrough
CT: control target
= control target key end

     0   :  { %11 = vsyncpa [#allocation4], 0  ;;  %s11130_s0 = inlined_call_operand.hbm [shape: f32[4,16,16,128], index: 0, kind: input, shape index: {}]   ;;  %s11131_s1 = inlined_call_operand.hbm [shape: f32[128,128], index: 1, kind: input, shape index: {}]   ;;  %s11132_s2 = inlined_call_operand.vmem [shape: f32[1,128], index: 2, kind: input, shape index: {}]   ;;  %s11133_s3 = inlined_call_operand.vmem [shape: f32[1,128], index: 3, kind: input, shape index: {}]   ;;  %s11134_s4 = inlined_call_operand.hbm [shape: bf16[9,128,128], index: 4, kind: input, shape index: {}]   ;;  %s11135_s5 = inlined_call_operand.vmem [shape: f32[1,128], index: 5, kind: input, shape index: {}]   ;;  %s11136_s6 = inlined_call_operand.hbm [shape: f32[4,256,128], index: 6, kind: output, shape index: {}]  }
   0x1   :  { %13 = vsyncpa [#allocation4 + $0x1], 0 }
   0x2   :  { %14 = vsyncpa [#allocation7], 0 }
   0x3   :  { %15 = vsyncpa [#allocation5], 0 }
   0x4   :  { %17 = vsyncpa [#allocation5 + $0x1], 0  ;;  %s8845_s21 = smov 0   ;;  %s8847_s22 = smov 0  }
   0x5   :  { %s8849_s23 = smov 0   ;;  %s8851_s24 = smov 0  }
   0x6 LB: > { %s8866_s25 = sadd.s32 4294967295, %s8794_s24   ;;  %s6796_s26 = sadd.s32 4294967294, %s8794_s24   ;;  %s8794_s24 = sphi %s8851_s24, %s11382_s24   ;;  %s8790_s23 = sphi %s8849_s23, %s11381_s23   ;;  %s8786_s22 = sphi %s8847_s22, %s11380_s22   ;;  %s8782_s21 = sphi %s8845_s21, %s11379_s21  }
   0x7   : > { %p43_p0 = scmp.ne.s32.totalorder %s8786_s22, %s8782_s21  ;;  %p11137_p1 = scmp.eq.s32.totalorder %s8866_s25, 0 }
   0x8   : > { %p178_p3 = scmp.eq.s32.totalorder %s6796_s26, 3  ;;  %p6797_p5 = scmp.ge.s32.totalorder %s8794_s24, 1 }
   0x9   : > { %p8875_p4 = por %p11137_p1, %p43_p0  ;;  %p185_p7 = scmp.lt.s32.totalorder %s8794_s24, 5 }
   0xa   : > { %p8880_p6 = por %p178_p3, %p43_p0  ;;  %s8796_s30 = smov [#allocation6]  }
   0xb   : > { %s11190_s27 = scalar_select %p8875_p4, 1, 0 }
   0xc   : > { %s11191_s28 = scalar_select %p8880_p6, 1, 0 }
   0xd   : > { %p8885_p8 = pnand %p6797_p5, %p185_p7  ;;  %s197_s7 = sshll.u32 %s8796_s30, 4  ;;  %s198_s7 = int_to_ptr.vmem [resolvable:$true] %s197_s7 }
   0xe   : > { %s8797_s9 = smov [#allocation8]   ;;  %s8638_s13 = scalar_lea.hbm %s11131_s1, 2048 }
   0xf   : > { %s11192_s29 = scalar_select %p8885_p8, 1, 0 }
  0x10   : > { %p8293_p9 = pneg %p8885_p8  ;;  %s216_s10 = sshll.u32 %s8797_s9, 4  ;;  %s8897_s10 = int_to_ptr.vmem [resolvable:$true] %s216_s10 }
  0x11   : > { %p8639_p11 = scmp.ne.s32.totalorder %s11131_s1, %s8638_s13  ;;  %p8645_p3 = scmp.lt.u32.totalorder %s8638_s13, %s11131_s1 }
  0x12   : > { %p8893_p10 = pnand %p8293_p9, %p11137_p1 }
  0x14   : > { %p8640_p12 = pneg %p8893_p10 }
  0x16   : > { %p8641_p13 = pnand %p8640_p12, %p8639_p11 }
  0x18   : > { %p8642_p0 = pneg %p8641_p13 }
  0x1a   : > { %p8647_p5 = pnand %p8645_p3, %p8642_p0 }
  0x1c   : > { %8650 = shalt.err (!%p8647_p5)
}
  0x1d   : > { %s8651_s18 = scalar_lea.vmem %s198_s7, 2048  ;;  %p8659_p2 = scmp.lt.s32.totalorder %s198_s7, %s198_s7 }
  0x1e   : > { %p8652_p7 = scmp.ne.s32.totalorder %s198_s7, %s8651_s18  ;;  %p8660_p6 = scmp.lt.s32.totalorder %s8651_s18, %s8651_s18 }
  0x20   : > { %p8654_p9 = pnand %p8652_p7, %p8640_p12  ;;  %p8661_p4 = por %p8660_p6, %p8659_p2 }
  0x22   : > { %p8655_p1 = pneg %p8654_p9 }
  0x24   : > { %p8662_p8 = pnand %p8661_p4, %p8655_p1 }
  0x26   : > { %8665 = shalt.err (!%p8662_p8)
}
  0x27   : > { %s8798_s19 = smov 128   ;;  %s8799_s20 = smov 8  }
  0x28   : > { %8296 = dma.hbm_to_vmem [thread:$0]  (!%p8893_p10), %s11131_s1, 2048, %s198_s7, [#allocation7], %s8798_s19, %s8798_s19, %s8799_s20  }
  0x29   : > { %s8666_s12 = scalar_lea.hbm %s11134_s4, 9216 }
  0x2a   : > { %p8667_p1 = scmp.ne.s32.totalorder %s11134_s4, %s8666_s12  ;;  %p8673_p6 = scmp.lt.u32.totalorder %s8666_s12, %s11134_s4 }
  0x2c   : > { %p8669_p2 = pnand %p8667_p1, %p8640_p12 }
  0x2e   : > { %p8670_p4 = pneg %p8669_p2 }
  0x30   : > { %p8675_p8 = pnand %p8673_p6, %p8670_p4 }
  0x32   : > { %8678 = shalt.err (!%p8675_p8)
}
  0x33   : > { %s8679_s7 = scalar_lea.vmem %s8897_s10, 9216  ;;  %p8687_p3 = scmp.lt.s32.totalorder %s8897_s10, %s8897_s10 }
  0x34   : > { %p8680_p11 = scmp.ne.s32.totalorder %s8897_s10, %s8679_s7  ;;  %p8688_p5 = scmp.lt.s32.totalorder %s8679_s7, %s8679_s7 }
  0x36   : > { %p8682_p13 = pnand %p8680_p11, %p8640_p12  ;;  %p8689_p7 = por %p8688_p5, %p8687_p3 }
  0x38   : > { %p8683_p0 = pneg %p8682_p13 }
  0x3a   : > { %p8690_p9 = pnand %p8689_p7, %p8683_p0 }
  0x3c   : > { %8693 = shalt.err (!%p8690_p9)
}
  0x3d   : > { %s8800_s17 = smov 64   ;;  %s8801_s18 = smov 4  }
  0x3e   : > { %8299 = dma.hbm_to_vmem [thread:$0]  (!%p8893_p10), %s11134_s4, 9216, %s8897_s10, [#allocation7], %s8800_s17, %s8800_s17, %s8801_s18  }
  0x3f   : > { %s8950_s9 = sadd.s32 1, %s8794_s24   ;;  %s30_s12 = sadd.s32 1, %s8790_s23 }
  0x40   : > { %s27_s11 = ssub.s32 %s8794_s24, %s8950_s9  ;;  %p37_p1 = scmp.ne.s32.totalorder %s8790_s23, %s8786_s22 }
  0x41   : > { %p28_p12 = scmp.eq.s32.totalorder %s27_s11, 0  ;;  %p38_p2 = scmp.eq.s32.totalorder %s8794_s24, 0 }
  0x42   : > { %p11194_p6 = scmp.eq.s32.totalorder %s8866_s25, 3  ;;  %p8310_p11 = scmp.lt.s32.totalorder %s8794_s24, 4 }
  0x43   : > { %s8959_s13 = scalar_select %p28_p12, %s8790_s23, %s30_s12  }
  0x44   : > { %p39_p4 = por %p38_p2, %p37_p1  ;;  %p8963_p8 = por %p11194_p6, %p37_p1 }
  0x45   : > { %s233_s8 = sand.u32 1, %s8790_s23   ;;  %s7111_s10 = sshll.u32 %s8794_s24, 12 }
  0x46   : > { %s6801_s15 = sshll.u32 %s233_s8, 8  ;;  %s8973_s17 = scalar_lea.hbm %s11130_s0, %s7111_s10 }
  0x47   : > { %s237_s18 = scalar_lea.vmem [#allocation3], %s6801_s15  ;;  %p8977_p10 = pnand %p8310_p11, %p39_p4 }
  0x48   : > { %s244_s26 = sshll.u32 %s237_s18, 4  ;;  %s8981_s11 = scalar_lea.sflag [#allocation4], %s233_s8  ;;  %s8975_s26 = int_to_ptr.vmem [resolvable:$true] %s244_s26 }
  0x49   : > { %s8694_s12 = scalar_lea.hbm %s8973_s17, 4096  ;;  %p8696_p0 = pneg %p8977_p10 }
  0x4a   : > { %p8695_p13 = scmp.ne.s32.totalorder %s8973_s17, %s8694_s12  ;;  %s8699_s16 = scalar_lea.hbm %s11130_s0, 16384 }
  0x4b   : > { %p8700_p7 = scmp.lt.u32.totalorder %s8973_s17, %s11130_s0  ;;  %p8701_p9 = scmp.lt.u32.totalorder %s8699_s16, %s8694_s12 }
  0x4c   : > { %p8697_p3 = pnand %p8696_p0, %p8695_p13  ;;  %p8703_p1 = scmp.lt.u32.totalorder %s8694_s12, %s8973_s17 }
  0x4d   : > { %p8702_p12 = por %p8701_p9, %p8700_p7 }
  0x4e   : > { %p8698_p5 = pneg %p8697_p3 }
  0x4f   : > { %p8704_p2 = por %p8703_p1, %p8702_p12 }
  0x51   : > { %p8705_p4 = pnand %p8704_p2, %p8698_p5 }
  0x53   : > { %8708 = shalt.err (!%p8705_p4)
}
  0x54   : > { %s8709_s8 = scalar_lea.vmem %s8975_s26, 4096  ;;  %s8802_s15 = smov [#allocation3]  }
  0x55   : > { %p8710_p6 = scmp.ne.s32.totalorder %s8975_s26, %s8709_s8  ;;  %s8714_s10 = sshll.u32 %s8802_s15, 4  ;;  %s8715_s10 = int_to_ptr.vmem [resolvable:$false] %s8714_s10 }
  0x56   : > { %s8716_s7 = scalar_lea.vmem %s8715_s10, 8192  ;;  %p8717_p3 = scmp.lt.s32.totalorder %s8975_s26, %s8715_s10 }
  0x57   : > { %p8712_p11 = pnand %p8710_p6, %p8696_p0  ;;  %p8718_p7 = scmp.lt.s32.totalorder %s8716_s7, %s8709_s8 }
  0x59   : > { %p8713_p13 = pneg %p8712_p11  ;;  %p8719_p9 = por %p8718_p7, %p8717_p3 }
  0x5b   : > { %p8720_p12 = pnand %p8719_p9, %p8713_p13 }
  0x5d   : > { %8723 = shalt.err (!%p8720_p12)
}
  0x5e   : > { %8303 = dma.hbm_to_vmem [thread:$0]  (!%p8977_p10), %s8973_s17, 4096, %s8975_s26, %s8981_s11, %s8798_s19, %s8798_s19, %s8799_s20  }
  0x5f   : > { %p11197_p0 = scmp.ne.s32.totalorder %s11192_s29, 0 }
  0x61   : > { %256 = sbr.rel (%p11197_p0) target bundleno = 1175 (0x497), region = 44 }
  0x68   : > { %s9015_s12 = sand.u32 1, %s8786_s22   ;;  %p11198_p5 = scmp.ne.s32.totalorder %s11190_s27, 0 }
  0x69   : > { %s6805_s16 = sshll.u32 %s9015_s12, 8  ;;  %s259_s18 = scalar_lea.sflag [#allocation4], %s9015_s12 }
  0x6a   : > { %s9021_s30 = scalar_lea.vmem [#allocation3], %s6805_s16 }
  0x6b   : > { %8769 = dma.done.wait (%p11198_p5), %s259_s18, 4096  }
  0x6c   : > { %8771 = vsyncadd (%p11198_p5), %s259_s18, 4294963200  ;;  %p11199_p10 = scmp.eq.s32.totalorder %s8866_s25, 0 }
  0x6e   : > { %8773 = dma.done.wait (%p11199_p10), [#allocation7], 11264   ;;  %p11200_p1 = pmov %p11199_p10 }
  0x6f   : > { %v8803_v0 = vmov 0   ;;  %v8804_v1 = vmov 0.0|0.0   ;;  %vm8805_vm0 = vmmov 0   ;;  %v8806_v2 = vmov 0.0   ;;  %v438_v3 = vld [vmem:[#allocation6] sm:$0xff]  ;;  %v439_v4 = vld [vmem:[#allocation6 + $0x8] sm:$0xff] }
  0x70   : > { %8775 = vsyncadd (%p11200_p1), [#allocation7], 4294956032  ;;  %905 = vst [vmem:[#allocation2 + $0x4] sm:$0xf] %v8803_v0  ;;  %7945 = vmatprep.subr.bf16.mxu1 %v8804_v1  ;;  %7475 = vmatprep.mubr.msk.f32.mxu1 %vm8805_vm0, %v8806_v2  ;;  %v440_v5 = vld [vmem:[#allocation6 + $0x10] sm:$0xff]  ;;  %v9106_v6 = vpack.c.bf16 %v439_v4, %v438_v3  ;;  %v441_v7 = vld [vmem:[#allocation6 + $0x18] sm:$0xff] }
  0x71   : > { %906 = vst [vmem:[#allocation2 + $0x8] sm:$0xf] %v8803_v0  ;;  %907 = vst [vmem:[#allocation2 + $0xc] sm:$0xf] %v8803_v0  ;;  %v9109_v8 = vpack.c.bf16 %v441_v7, %v440_v5  ;;  %v442_v9 = vld [vmem:[#allocation6 + $0x20] sm:$0xff]  ;;  %v443_v10 = vld [vmem:[#allocation6 + $0x28] sm:$0xff] }
  0x72   : > { %908 = vst [vmem:[#allocation2 + $0x10] sm:$0x1] %v8803_v0  ;;  %910 = vst [vmem:[#allocation2 + $0x18] sm:$0xf] %v8803_v0  ;;  %7947 = vmatpush3.bf16.msra.mxu1 %v9106_v6  ;;  %v9113_v11 = vld [vmem:[%s9021_s30] sm:$0xff]  ;;  %v9116_v12 = vld [vmem:[%s9021_s30 + $0x8] sm:$0xff]  ;;  %v9128_v17 = vpack.c.bf16 %v443_v10, %v442_v9 }
  0x73   : > { %911 = vst [vmem:[#allocation2 + $0x1c] sm:$0xf] %v8803_v0  ;;  %912 = vst [vmem:[#allocation2 + $0x20] sm:$0xf] %v8803_v0  ;;  %7948 = vmatprep.subr.bf16.mxu1 %v8804_v1  ;;  %v9119_v13 = vld [vmem:[%s9021_s30 + $0x10] sm:$0xff]  ;;  %v332_v14 = vadd.f32 %v9116_v12, %v9113_v11  ;;  %v369_v15 = vmul.f32 %v9113_v11, %v9113_v11  ;;  %v370_v16 = vmul.f32 %v9116_v12, %v9116_v12  ;;  %v9131_v18 = vld [vmem:[%s9021_s30 + $0x18] sm:$0xff] }
  0x74   : > { %913 = vst [vmem:[#allocation2 + $0x24] sm:$0x1] %v8803_v0  ;;  %915 = vst [vmem:[#allocation2 + $0x2c] sm:$0xf] %v8803_v0  ;;  %v371_v19 = vmul.f32 %v9119_v13, %v9119_v13  ;;  %v444_v20 = vld [vmem:[#allocation6 + $0x30] sm:$0xff]  ;;  %v445_v21 = vld [vmem:[#allocation6 + $0x38] sm:$0xff]  ;;  %v372_v24 = vmul.f32 %v9131_v18, %v9131_v18 }
  0x75   : > { %916 = vst [vmem:[#allocation2 + $0x30] sm:$0xf] %v8803_v0  ;;  %917 = vst [vmem:[#allocation2 + $0x34] sm:$0xf] %v8803_v0  ;;  %v333_v22 = vadd.f32 %v332_v14, %v9119_v13  ;;  %v9138_v23 = vld [vmem:[%s9021_s30 + $0x20] sm:$0xff]  ;;  %v401_v25 = vadd.f32 %v370_v16, %v369_v15  ;;  %v9144_v27 = vpack.c.bf16 %v445_v21, %v444_v20  ;;  %v9147_v28 = vld [vmem:[%s9021_s30 + $0x28] sm:$0xff] }
  0x76   : > { %918 = vst [vmem:[#allocation2 + $0x38] sm:$0x1] %v8803_v0  ;;  %920 = vst [vmem:[#allocation2 + $0x40] sm:$0xf] %v8803_v0  ;;  %7950 = vmatpush3.bf16.msra.mxu1 %v9109_v8  ;;  %v373_v29 = vmul.f32 %v9138_v23, %v9138_v23  ;;  %v446_v31 = vld [vmem:[#allocation6 + $0x40] sm:$0xff]  ;;  %v447_v32 = vld [vmem:[#allocation6 + $0x48] sm:$0xff]  ;;  %v374_v35 = vmul.f32 %v9147_v28, %v9147_v28 }
  0x77   : > { %921 = vst [vmem:[#allocation2 + $0x44] sm:$0xf] %v8803_v0  ;;  %922 = vst [vmem:[#allocation2 + $0x48] sm:$0xf] %v8803_v0  ;;  %7951 = vmatprep.subr.bf16.mxu1 %v8804_v1  ;;  %v334_v26 = vadd.f32 %v333_v22, %v9131_v18  ;;  %v402_v30 = vadd.f32 %v401_v25, %v371_v19  ;;  %v9154_v34 = vld [vmem:[%s9021_s30 + $0x30] sm:$0xff]  ;;  %v9160_v39 = vpack.c.bf16 %v447_v32, %v446_v31  ;;  %v449_v40 = vld [vmem:[#allocation6 + $0x58] sm:$0xff] }
  0x78   : > { %923 = vst [vmem:[#allocation2 + $0x4c] sm:$0x1] %v8803_v0  ;;  %925 = vst [vmem:[#allocation2 + $0x54] sm:$0xf] %v8803_v0  ;;  %v448_v37 = vld [vmem:[#allocation6 + $0x50] sm:$0xff]  ;;  %v9163_v41 = vld [vmem:[%s9021_s30 + $0x38] sm:$0xff]  ;;  %v375_v43 = vmul.f32 %v9154_v34, %v9154_v34 }
  0x79   : > { %926 = vst [vmem:[#allocation2 + $0x58] sm:$0xf] %v8803_v0  ;;  %927 = vst [vmem:[#allocation2 + $0x5c] sm:$0xf] %v8803_v0  ;;  %v335_v33 = vadd.f32 %v334_v26, %v9138_v23  ;;  %v403_v36 = vadd.f32 %v402_v30, %v372_v24  ;;  %v9166_v42 = vld [vmem:[%s9021_s30 + $0x40] sm:$0xff]  ;;  %v9173_v46 = vld [vmem:[%s9021_s30 + $0x48] sm:$0xff]  ;;  %v376_v47 = vmul.f32 %v9163_v41, %v9163_v41 }
  0x7a   : > { %928 = vst [vmem:[#allocation2 + $0x60] sm:$0x1] %v8803_v0  ;;  %930 = vst [vmem:[#allocation2 + $0x68] sm:$0xf] %v8803_v0  ;;  %7953 = vmatpush3.bf16.msra.mxu1 %v9128_v17  ;;  %v450_v49 = vld [vmem:[#allocation6 + $0x60] sm:$0xff]  ;;  %v451_v50 = vld [vmem:[#allocation6 + $0x68] sm:$0xff]  ;;  %v9179_v52 = vpack.c.bf16 %v449_v40, %v448_v37  ;;  %v377_v54 = vmul.f32 %v9166_v42, %v9166_v42  ;;  %v378_v58 = vmul.f32 %v9173_v46, %v9173_v46 }
  0x7b   : > { %931 = vst [vmem:[#allocation2 + $0x6c] sm:$0xf] %v8803_v0  ;;  %932 = vst [vmem:[#allocation2 + $0x70] sm:$0xf] %v8803_v0  ;;  %7954 = vmatprep.subr.bf16.mxu1 %v8804_v1  ;;  %v336_v38 = vadd.f32 %v335_v33, %v9147_v28  ;;  %v404_v44 = vadd.f32 %v403_v36, %v373_v29  ;;  %v9182_v53 = vld [vmem:[%s9021_s30 + $0x50] sm:$0xff]  ;;  %v9189_v57 = vld [vmem:[%s9021_s30 + $0x58] sm:$0xff]  ;;  %v9195_v63 = vpack.c.bf16 %v451_v50, %v450_v49 }
  0x7c   : > { %933 = vst [vmem:[#allocation2 + $0x74] sm:$0x1] %v8803_v0  ;;  %935 = vst [vmem:[#allocation2 + $0x7c] sm:$0xf] %v8803_v0  ;;  %v452_v60 = vld [vmem:[#allocation6 + $0x70] sm:$0xff]  ;;  %v453_v61 = vld [vmem:[#allocation6 + $0x78] sm:$0xff]  ;;  %v379_v3 = vmul.f32 %v9182_v53, %v9182_v53  ;;  %v380_v9 = vmul.f32 %v9189_v57, %v9189_v57 }
  0x7d   : > { %936 = vst [vmem:[#allocation2 + $0x80] sm:$0xf] %v8803_v0  ;;  %937 = vst [vmem:[#allocation2 + $0x84] sm:$0xf] %v8803_v0  ;;  %v337_v45 = vadd.f32 %v336_v38, %v9154_v34  ;;  %v405_v48 = vadd.f32 %v404_v44, %v374_v35  ;;  %v9205_v7 = vld [vmem:[%s9021_s30 + $0x68] sm:$0xff]  ;;  %v9211_v15 = vpack.c.bf16 %v453_v61, %v452_v60  ;;  %v9214_v16 = vld [vmem:[%s9021_s30 + $0x70] sm:$0xff] }
  0x7e   : > { %938 = vst [vmem:[#allocation2 + $0x88] sm:$0x1] %v8803_v0  ;;  %940 = vst [vmem:[#allocation2 + $0x90] sm:$0xf] %v8803_v0  ;;  %7956 = vmatpush3.bf16.msra.mxu1 %v9144_v27  ;;  %v9221_v22 = vld [vmem:[%s9021_s30 + $0x78] sm:$0xff]  ;;  %v382_v24 = vmul.f32 %v9205_v7, %v9205_v7  ;;  %v9228_v29 = vld [vmem:[%s9021_s30 + $0x80] sm:$0xff]  ;;  %v383_v30 = vmul.f32 %v9214_v16, %v9214_v16 }
  0x7f   : > { %941 = vst [vmem:[#allocation2 + $0x94] sm:$0xf] %v8803_v0  ;;  %942 = vst [vmem:[#allocation2 + $0x98] sm:$0xf] %v8803_v0  ;;  %7957 = vmatprep.subr.bf16.mxu1 %v8804_v1  ;;  %v338_v51 = vadd.f32 %v337_v45, %v9163_v41  ;;  %v406_v55 = vadd.f32 %v405_v48, %v375_v43  ;;  %v9235_v33 = vld [vmem:[%s9021_s30 + $0x88] sm:$0xff]  ;;  %v384_v35 = vmul.f32 %v9221_v22, %v9221_v22  ;;  %v9241_v38 = vld [vmem:[%s9021_s30 + $0x90] sm:$0xff] }
  0x80   : > { %943 = vst [vmem:[#allocation2 + $0x9c] sm:$0x1] %v8803_v0  ;;  %945 = vst [vmem:[#allocation2 + $0xa4] sm:$0xf] %v8803_v0  ;;  %v385_v40 = vmul.f32 %v9228_v29, %v9228_v29  ;;  %v9247_v45 = vld [vmem:[%s9021_s30 + $0x98] sm:$0xff]  ;;  %v9253_v50 = vld [vmem:[%s9021_s30 + $0xa0] sm:$0xff] }
  0x81   : > { %946 = vst [vmem:[#allocation2 + $0xa8] sm:$0xf] %v8803_v0  ;;  %947 = vst [vmem:[#allocation2 + $0xac] sm:$0xf] %v8803_v0  ;;  %v339_v56 = vadd.f32 %v338_v51, %v9166_v42  ;;  %v407_v59 = vadd.f32 %v406_v55, %v376_v47  ;;  %v386_v47 = vmul.f32 %v9235_v33, %v9235_v33  ;;  %v9265_v61 = vld [vmem:[%s9021_s30 + $0xb0] sm:$0xff]  ;;  %s10998_s11 = scalar_lea.vmem [#allocation9], %s6805_s16 }
  0x82   : > { %948 = vst [vmem:[#allocation2 + $0xb0] sm:$0x1] %v8803_v0  ;;  %950 = vst [vmem:[#allocation2 + $0xb8] sm:$0xf] %v8803_v0  ;;  %7959 = vmatpush3.bf16.msra.mxu1 %v9160_v39  ;;  %v387_v51 = vmul.f32 %v9241_v38, %v9241_v38  ;;  %vm1210_vm1 = vsmask.f32 256 }
  0x83   : > { %951 = vst [vmem:[#allocation2 + $0xbc] sm:$0xf] %v8803_v0  ;;  %952 = vst [vmem:[#allocation2 + $0xc0] sm:$0xf] %v8803_v0  ;;  %7960 = vmatprep.subr.bf16.mxu1 %v8804_v1  ;;  %v340_v62 = vadd.f32 %v339_v56, %v9173_v46  ;;  %v408_v4 = vadd.f32 %v407_v59, %v377_v54  ;;  %v9259_v56 = vld [vmem:[%s9021_s30 + $0xa8] sm:$0xff]  ;;  %s7144_s8 = sshll.u32 %s8866_s25, 12 }
  0x84   : > { %953 = vst [vmem:[#allocation2 + $0xc4] sm:$0x1] %v8803_v0  ;;  %955 = vst [vmem:[#allocation2 + $0xcc] sm:$0xf] %v8803_v0  ;;  %vm1211_vm2 = vsmask.f32 4368  ;;  %s11082_s25 = scalar_lea.hbm %s11136_s6, %s7144_s8 }
  0x85   : > { %956 = vst [vmem:[#allocation2 + $0xd0] sm:$0xf] %v8803_v0  ;;  %957 = vst [vmem:[#allocation2 + $0xd4] sm:$0xf] %v8803_v0  ;;  %v341_v5 = vadd.f32 %v340_v62, %v9182_v53  ;;  %v409_v10 = vadd.f32 %v408_v4, %v378_v58  ;;  %v388_v58 = vmul.f32 %v9247_v45, %v9247_v45  ;;  %vm2288_vm4 = vsmask.f32 3328 }
  0x86   : > { %958 = vst [vmem:[#allocation2 + $0xd8] sm:$0x1] %v8803_v0  ;;  %960 = vst [vmem:[#allocation2 + $0xe0] sm:$0xf] %v8803_v0  ;;  %7962 = vmatpush3.bf16.msra.mxu1 %v9179_v52  ;;  %v389_v62 = vmul.f32 %v9253_v50, %v9253_v50  ;;  %vm2289_vm5 = vsmask.f32 7440 }
  0x87   : > { %961 = vst [vmem:[#allocation2 + $0xe4] sm:$0xf] %v8803_v0  ;;  %962 = vst [vmem:[#allocation2 + $0xe8] sm:$0xf] %v8803_v0  ;;  %7963 = vmatprep.subr.bf16.mxu1 %v8804_v1  ;;  %v342_v14 = vadd.f32 %v341_v5, %v9189_v57  ;;  %v410_v20 = vadd.f32 %v409_v10, %v379_v3  ;;  %v9271_v5 = vld [vmem:[%s9021_s30 + $0xb8] sm:$0xff]  ;;  %s6704_s15 = sshll.u32 %s10998_s11, 4  ;;  %s11084_s15 = int_to_ptr.vmem [resolvable:$true] %s6704_s15 }
  0x88   : > { %963 = vst [vmem:[#allocation2 + $0xec] sm:$0x1] %v8803_v0  ;;  %965 = vst [vmem:[#allocation2 + $0xf4] sm:$0xf] %v8803_v0  ;;  %s6691_s16 = scalar_lea.sflag [#allocation5], %s9015_s12  ;;  %s8724_s18 = scalar_lea.vmem %s11084_s15, 4096 }
  0x89   : > { %966 = vst [vmem:[#allocation2 + $0xf8] sm:$0xf] %v8803_v0  ;;  %967 = vst [vmem:[#allocation2 + $0xfc] sm:$0xf] %v8803_v0  ;;  %v411_v25 = vadd.f32 %v410_v20, %v380_v9  ;;  %v390_v9 = vmul.f32 %v9259_v56, %v9259_v56  ;;  %v391_v20 = vmul.f32 %v9265_v61, %v9265_v61  ;;  %p8725_p2 = scmp.ne.s32.totalorder %s11084_s15, %s8724_s18 }
  0x8a   : > { %968 = vst [vmem:[#allocation2 + $0x100] sm:$0x1] %v8803_v0  ;;  %970 = vst [vmem:[#allocation2 + $0x108] sm:$0xf] %v8803_v0  ;;  %7965 = vmatpush3.bf16.msra.mxu1 %v9195_v63 }
  0x8b   : > { %971 = vst [vmem:[#allocation2 + $0x10c] sm:$0xf] %v8803_v0  ;;  %972 = vst [vmem:[#allocation2 + $0x110] sm:$0xf] %v8803_v0  ;;  %7966 = vmatprep.subr.bf16.mxu1 %v8804_v1  ;;  %p8726_p4 = pnand %p8725_p2, %p8963_p8 }
  0x8c   : > { %973 = vst [vmem:[#allocation2 + $0x114] sm:$0x1] %v8803_v0  ;;  %975 = vst [vmem:[#allocation2 + $0x11c] sm:$0xf] %v8803_v0 }
  0x8d   : > { %976 = vst [vmem:[#allocation2 + $0x120] sm:$0xf] %v8803_v0  ;;  %977 = vst [vmem:[#allocation2 + $0x124] sm:$0xf] %v8803_v0  ;;  %p8727_p6 = pneg %p8726_p4 }
  0x8e   : > { %978 = vst [vmem:[#allocation2 + $0x128] sm:$0x1] %v8803_v0  ;;  %980 = vst [vmem:[#allocation2 + $0x130] sm:$0xf] %v8803_v0  ;;  %7968 = vmatpush3.bf16.msra.mxu1 %v9211_v15 }
  0x8f   : > { %981 = vst [vmem:[#allocation2 + $0x134] sm:$0xf] %v8803_v0  ;;  %982 = vst [vmem:[#allocation2 + $0x138] sm:$0xf] %v8803_v0  ;;  %7969 = vmatprep.subr.bf16.mxu1 %v8804_v1 }
  0x90   : > { %983 = vst [vmem:[#allocation2 + $0x13c] sm:$0x1] %v8803_v0  ;;  %985 = vst [vmem:[#allocation2 + $0x144] sm:$0xf] %v8803_v0 }
  0x91   : > { %986 = vst [vmem:[#allocation2 + $0x148] sm:$0xf] %v8803_v0  ;;  %987 = vst [vmem:[#allocation2 + $0x14c] sm:$0xf] %v8803_v0 }
  0x92   : > { %988 = vst [vmem:[#allocation2 + $0x150] sm:$0x1] %v8803_v0  ;;  %990 = vst [vmem:[#allocation2 + $0x158] sm:$0xf] %v8803_v0 }
  0x93   : > { %991 = vst [vmem:[#allocation2 + $0x15c] sm:$0xf] %v8803_v0  ;;  %992 = vst [vmem:[#allocation2 + $0x160] sm:$0xf] %v8803_v0 }
  0x94   : > { %993 = vst [vmem:[#allocation2 + $0x164] sm:$0x1] %v8803_v0  ;;  %v9198_v0 = vld [vmem:[%s9021_s30 + $0x60] sm:$0xff]  ;;  %vm9347_vm3 = vmor %vm1210_vm1, %vm1211_vm2 }
  0x95   : > { %v381_v19 = vmul.f32 %v9198_v0, %v9198_v0  ;;  %v343_v21 = vadd.f32 %v342_v14, %v9198_v0  ;;  %vm10141_vm6 = vmor %vm2288_vm4, %vm2289_vm5 }
  0x97   : > { %v344_v26 = vadd.f32 %v343_v21, %v9205_v7  ;;  %v412_v31 = vadd.f32 %v411_v25, %v381_v19  ;;  %v9277_v19 = vld [vmem:[%s9021_s30 + $0xc0] sm:$0xff]  ;;  %v9283_v25 = vld [vmem:[%s9021_s30 + $0xc8] sm:$0xff] }
  0x99   : > { %v345_v32 = vadd.f32 %v344_v26, %v9214_v16  ;;  %v413_v36 = vadd.f32 %v412_v31, %v382_v24  ;;  %v392_v26 = vmul.f32 %v9271_v5, %v9271_v5 }
  0x9b   : > { %v346_v37 = vadd.f32 %v345_v32, %v9221_v22  ;;  %v414_v43 = vadd.f32 %v413_v36, %v383_v30  ;;  %v9289_v32 = vld [vmem:[%s9021_s30 + $0xd0] sm:$0xff] }
  0x9d   : > { %v347_v44 = vadd.f32 %v346_v37, %v9228_v29  ;;  %v415_v48 = vadd.f32 %v414_v43, %v384_v35  ;;  %v393_v37 = vmul.f32 %v9277_v19, %v9277_v19 }
  0x9f   : > { %v348_v49 = vadd.f32 %v347_v44, %v9235_v33  ;;  %v416_v54 = vadd.f32 %v415_v48, %v385_v40  ;;  %v9295_v40 = vld [vmem:[%s9021_s30 + $0xd8] sm:$0xff] }
  0xa1   : > { %v349_v55 = vadd.f32 %v348_v49, %v9241_v38  ;;  %v417_v59 = vadd.f32 %v416_v54, %v386_v47  ;;  %v9299_v47 = vld [vmem:[%s9021_s30 + $0xe0] sm:$0xff]  ;;  %v394_v49 = vmul.f32 %v9283_v25, %v9283_v25  ;;  %v9305_v54 = vld [vmem:[%s9021_s30 + $0xe8] sm:$0xff] }
  0xa3   : > { %v350_v60 = vadd.f32 %v349_v55, %v9247_v45  ;;  %v418_v3 = vadd.f32 %v417_v59, %v387_v51 }
  0xa5   : > { %v351_v4 = vadd.f32 %v350_v60, %v9253_v50  ;;  %v419_v10 = vadd.f32 %v418_v3, %v388_v58  ;;  %v9309_v58 = vld [vmem:[%s9021_s30 + $0xf0] sm:$0xff]  ;;  %v395_v60 = vmul.f32 %v9289_v32, %v9289_v32  ;;  %v9315_v3 = vld [vmem:[%s9021_s30 + $0xf8] sm:$0xff]  ;;  %s8807_s30 = smov [#allocation9]  }
  0xa6   : > { %s8728_s27 = sshll.u32 %s8807_s30, 4  ;;  %s8729_s27 = int_to_ptr.vmem [resolvable:$false] %s8728_s27 }
  0xa7   : > { %v352_v14 = vadd.f32 %v351_v4, %v9259_v56  ;;  %v420_v21 = vadd.f32 %v419_v10, %v389_v62  ;;  %v396_v10 = vmul.f32 %v9295_v40, %v9295_v40  ;;  %s8730_s29 = scalar_lea.vmem %s8729_s27, 8192  ;;  %p8731_p11 = scmp.lt.s32.totalorder %s11084_s15, %s8729_s27 }
  0xa8   : > { %p8732_p13 = scmp.lt.s32.totalorder %s8730_s29, %s8724_s18 }
  0xa9   : > { %v353_v24 = vadd.f32 %v352_v14, %v9265_v61  ;;  %v421_v30 = vadd.f32 %v420_v21, %v390_v9 }
  0xaa   : > { %p8733_p3 = por %p8732_p13, %p8731_p11 }
  0xab   : > { %v354_v31 = vadd.f32 %v353_v24, %v9271_v5  ;;  %v422_v35 = vadd.f32 %v421_v30, %v391_v20  ;;  %v397_v24 = vmul.f32 %v9299_v47, %v9299_v47 }
  0xac   : > { %p8734_p7 = pnand %p8733_p3, %p8727_p6 }
  0xad   : > { %v355_v36 = vadd.f32 %v354_v31, %v9277_v19  ;;  %v423_v43 = vadd.f32 %v422_v35, %v392_v26  ;;  %v398_v35 = vmul.f32 %v9305_v54, %v9305_v54 }
  0xaf   : > { %v356_v44 = vadd.f32 %v355_v36, %v9283_v25  ;;  %v424_v51 = vadd.f32 %v423_v43, %v393_v37 }
  0xb1   : > { %v357_v48 = vadd.f32 %v356_v44, %v9289_v32  ;;  %v425_v62 = vadd.f32 %v424_v51, %v394_v49  ;;  %v399_v44 = vmul.f32 %v9309_v58, %v9309_v58  ;;  %v400_v51 = vmul.f32 %v9315_v3, %v9315_v3 }
  0xb3   : > { %v358_v55 = vadd.f32 %v357_v48, %v9295_v40  ;;  %v426_v14 = vadd.f32 %v425_v62, %v395_v60 }
  0xb5   : > { %v359_v59 = vadd.f32 %v358_v55, %v9299_v47  ;;  %v427_v26 = vadd.f32 %v426_v14, %v396_v10  ;;  %v8366_v10 = vld [vmem:[#allocation8 + $0x18] sm:$0xff]   ;;  %v8367_v14 = vld [vmem:[#allocation8 + $0x128] sm:$0xff]  }
  0xb7   : > { %v360_v4 = vadd.f32 %v359_v59, %v9305_v54  ;;  %v428_v36 = vadd.f32 %v427_v26, %v397_v24  ;;  %v8370_v24 = vld [vmem:[#allocation8 + $0x28] sm:$0xff]   ;;  %v8371_v26 = vld [vmem:[#allocation8 + $0x138] sm:$0xff]  }
  0xb9   : > { %v361_v9 = vadd.f32 %v360_v4, %v9309_v58  ;;  %v429_v48 = vadd.f32 %v428_v36, %v398_v35  ;;  %v8360_v4 = vld [vmem:[#allocation8] sm:$0xff]  }
  0xba   : > { %v1163_v36 = vld [vmem:[#allocation2 + $0x8] sm:$0xf] }
  0xbb   : > { %v362_v20 = vadd.f32 %v361_v9, %v9315_v3  ;;  %v430_v55 = vadd.f32 %v429_v48, %v399_v44  ;;  %v8362_v9 = vld [vmem:[#allocation8 + $0x8] sm:$0xff]   ;;  %v1219_v44 = vshrl.u32 %v1163_v36, 16 }
  0xbd   : > { %v363_v21 = vrot.slane %v362_v20, 4  ;;  %v431_v59 = vadd.f32 %v430_v55, %v400_v51  ;;  %v1221_v55 = vrot.slane %v1219_v44, 7  ;;  %v1168_v44 = vld [vmem:[#allocation2 + $0x2c] sm:$0x8] }
  0xbf   : > { %v364_v30 = vadd.f32 %v363_v21, %v362_v20  ;;  %v432_v60 = vrot.slane %v431_v59, 4  ;;  %v8368_v20 = vld [vmem:[#allocation8 + $0x20] sm:$0xff]   ;;  %v8369_v21 = vld [vmem:[#allocation8 + $0x130] sm:$0xff]  }
  0xc1   : > { %v365_v31 = vrot.slane %v364_v30, 2  ;;  %v433_v62 = vadd.f32 %v432_v60, %v431_v59  ;;  %v1222_v59 = vshll.u32 %v1163_v36, 16 }
  0xc3   : > { %v366_v37 = vadd.f32 %v365_v31, %v364_v30  ;;  %v8372_v30 = vld [vmem:[#allocation8 + $0x30] sm:$0xff]  }
  0xc5   : > { %v367_v43 = vrot.slane %v366_v37, 1 }
  0xc7   : > { %v368_v49 = vadd.f32 %v367_v43, %v366_v37  ;;  %v1164_v37 = vld [vmem:[#allocation2 + $0xc] sm:$0xf] }
  0xc8   : > { %v8374_v43 = vld [vmem:[#allocation8 + $0x140] sm:$0xff]   ;;  %v1228_v48 = vshrl.u32 %v1164_v37, 16 }
  0xc9   : > { %7476 = vmatmul.mubr.f32.vlgmr.msra.gmra.mrb[0].mxu1 %v368_v49  ;;  %v1162_v49 = vld [vmem:[#allocation2 + $0x4] sm:$0x8] }
  0xca   : > { %7971 = vmatpush3.bf16.msra.mxu1 %v9106_v6  ;;  %7510 = vmatprep.mubr.msk.f32.mxu1 %vm8805_vm0, %v8806_v2  ;;  %v434_v6 = vrot.slane %v433_v62, 2  ;;  %v1214_v51 = vshrl.u32 %v1162_v49, 16  ;;  %v1230_v60 = vrot.slane %v1228_v48, 7  ;;  %v1171_v48 = vld [vmem:[#allocation2 + $0x40] sm:$0x8] }
  0xcb   : > { %7972 = vmatprep.subr.bf16.mxu1 %v8804_v1 }
  0xcc   : > { %v435_v2 = vadd.f32 %v434_v6, %v433_v62  ;;  %v8377_v62 = vld [vmem:[#allocation8 + $0x38] sm:$0xff]   ;;  %v1231_v6 = vshll.u32 %v1164_v37, 16  ;;  %v1165_v37 = vld [vmem:[#allocation2 + $0x18] sm:$0x8] }
  0xce   : > { %7974 = vmatpush3.bf16.msra.mxu1 %v9109_v8  ;;  %v436_v8 = vrot.slane %v435_v2, 1 }
  0xcf   : > { %7975 = vmatprep.subr.bf16.mxu1 %v8804_v1 }
  0xd2   : > { %7977 = vmatpush3.bf16.msra.mxu1 %v9128_v17  ;;  %v437_v17 = vadd.f32 %v436_v8, %v435_v2  ;;  %v6842_v8 = vrot.slane %v1214_v51, 11 }
  0xd3   : > { %7978 = vmatprep.subr.bf16.mxu1 %v8804_v1 }
  0xd6   : > { %7980 = vmatpush3.bf16.msra.mxu1 %v9144_v27  ;;  %v8358_v27 = vld [vmem:[#allocation8 + $0x100] sm:$0xff]  }
  0xd7   : > { %7981 = vmatprep.subr.bf16.mxu1 %v8804_v1  ;;  %7705 = vmatprep.subr.bf16.mxu0 %v8358_v27 }
  0xd8   : > { %7706 = vmatpush3.bf16.msra.mxu0 %v8358_v27  ;;  %v1226_v27 = vrot.slane %v1221_v55, 4 }
  0xda   : > { %7983 = vmatpush3.bf16.msra.mxu1 %v9160_v39  ;;  %v8359_v39 = vld [vmem:[#allocation8 + $0x108] sm:$0xff]  }
  0xdb   : > { %7984 = vmatprep.subr.bf16.mxu1 %v8804_v1  ;;  %7707 = vmatprep.subr.bf16.mxu0 %v8359_v39 }
  0xdc   : > { %7708 = vmatpush3.bf16.msra.mxu0 %v8359_v39  ;;  %v1233_v39 = vor.u32 %v1231_v6, %v1230_v60  ;;  %v1280_v6 = vshrl.u32 %v1171_v48, 16 }
  0xde   : > { %7986 = vmatpush3.bf16.msra.mxu1 %v9179_v52  ;;  %v8361_v52 = vld [vmem:[#allocation8 + $0x110] sm:$0xff]  }
  0xdf   : > { %7987 = vmatprep.subr.bf16.mxu1 %v8804_v1  ;;  %7709 = vmatprep.subr.bf16.mxu0 %v8361_v52 }
  0xe0   : > { %7710 = vmatpush3.bf16.msra.mxu0 %v8361_v52  ;;  %v1234_v52 = vsel %vm9347_vm3, %v1226_v27, %v1233_v39 }
  0xe2   : > { %7989 = vmatpush3.bf16.msra.mxu1 %v9195_v63  ;;  %v8363_v63 = vld [vmem:[#allocation8 + $0x118] sm:$0xff]  }
  0xe3   : > { %7990 = vmatprep.subr.bf16.mxu1 %v8804_v1  ;;  %7711 = vmatprep.subr.bf16.mxu0 %v8363_v63  ;;  %v8364_v1 = vld [vmem:[#allocation8 + $0x10] sm:$0xff]  }
  0xe4   : > { %7712 = vmatpush3.bf16.msra.mxu0 %v8363_v63 }
  0xe6   : > { %7992 = vmatpush3.bf16.msra.mxu1 %v9211_v15  ;;  %v8365_v15 = vld [vmem:[#allocation8 + $0x120] sm:$0xff]  }
  0xe7   : > { %7513 = vmatprep.subr.bf16.mxu1 %v8360_v4  ;;  %7713 = vmatprep.subr.bf16.mxu0 %v8365_v15 }
  0xe8   : > { %7714 = vmatpush3.bf16.msra.mxu0 %v8365_v15 }
  0xe9   : > { %7511 = vmatmul.mubr.f32.vlgmr.msra.gmra.mrb[2].mxu1 %v437_v17  ;;  %7715 = vmatprep.subr.bf16.mxu0 %v8367_v14  ;;  %v1224_v17 = vor.u32 %v1222_v59, %v1221_v55  ;;  %v1236_v55 = vshrl.u32 %v1165_v37, 16 }
  0xea   : > { %7514 = vmatpush3.bf16.msra.mxu1 %v8360_v4 }
  0xeb   : > { %7515 = vmatprep.subr.bf16.mxu1 %v8362_v9  ;;  %v1225_v4 = vsel %vm9347_vm3, %v6842_v8, %v1224_v17 }
  0xec   : > { %7716 = vmatpush3.bf16.msra.mxu0 %v8367_v14 }
  0xed   : > { %7717 = vmatprep.subr.bf16.mxu0 %v8369_v21 }
  0xee   : > { %7516 = vmatpush3.bf16.msra.mxu1 %v8362_v9  ;;  %v6858_v9 = vcombine.low %v1225_v4, %v1234_v52 }
  0xef   : > { %7517 = vmatprep.subr.bf16.mxu1 %v8364_v1 }
  0xf0   : > { %7718 = vmatpush3.bf16.msra.mxu0 %v8369_v21  ;;  %7529 = vmatprep.mubr.bf16.mxu1 %v6858_v9  ;;  %v605_v21 = vlaneseq }
  0xf1   : > { %7719 = vmatprep.subr.bf16.mxu0 %v8371_v26 }
  0xf2   : > { %7518 = vmatpush3.bf16.msra.mxu1 %v8364_v1 }
  0xf3   : > { %7519 = vmatprep.subr.bf16.mxu1 %v8366_v10 }
  0xf4   : > { %7720 = vmatpush3.bf16.msra.mxu0 %v8371_v26  ;;  %v597_v26 = vld [vmem:[%s11132_s2] sm:$0x1] }
  0xf5   : > { %7753 = vmatprep.subr.bf16.mxu0 %v8374_v43  ;;  %v601_v43 = vld [vmem:[%s11133_s3] sm:$0x1] }
  0xf6   : > { %7520 = vmatpush3.bf16.msra.mxu1 %v8366_v10 }
  0xf7   : > { %7521 = vmatprep.subr.bf16.mxu1 %v8368_v20 }
  0xfa   : > { %7522 = vmatpush3.bf16.msra.mxu1 %v8368_v20 }
  0xfb   : > { %7523 = vmatprep.subr.bf16.mxu1 %v8370_v24 }
  0xfe   : > { %7524 = vmatpush3.bf16.msra.mxu1 %v8370_v24  ;;  %v606_v24 = vshrl.u32 %v605_v21, 7 }
  0xff   : > { %7525 = vmatprep.subr.bf16.mxu1 %v8372_v30 }
 0x102   : > { %7526 = vmatpush3.bf16.msra.mxu1 %v8372_v30  ;;  %v607_v30 = vsub.s32 0, %v606_v24 }
 0x103   : > { %7527 = vmatprep.subr.bf16.mxu1 %v8377_v62 }
 0x106   : > { %7528 = vmatpush3.bf16.msra.mxu1 %v8377_v62  ;;  %v1258_v62 = vshrl.u32 %v1168_v44, 16 }
 0x108   : > { %v9451_v44 = vrot.slane %v1258_v62, 11 }
 0x10a   : > { %11204 = vst [vmem:[#allocation14_spill] sm:$0xff] %v9451_v44 }
 0x19c   : > { %v520_v31 = vpop.f32.mrb[0].mxu1 }
 0x19d   : > { %v7477_v35 = vpop.f32.mrb[1].mxu1  ;;  %v594_v63 = vmul.f32 %v520_v31, %v520_v31 }
 0x1bc   : > { %v590_v1 = vpop.f32.mrb[2].mxu1 }
 0x1bd   : > { %v595_v15 = vsub.f32 %v590_v1, %v594_v63  ;;  %v7512_v10 = vpop.f32.mrb[3].mxu1 }
 0x1bf   : > { %v596_v14 = vmax.f32 %v595_v15, 0.0 }
 0x1c1   : > { %v598_v20 = vadd.f32 1e-05, %v596_v14 }
 0x1c3   : > { %8478 = vrsqrt.f32 %v598_v20 }
 0x1cd   : > { %v8479_v35 = vpop.eup %8478 }
 0x1ce   : > { %v600_v36 = vmul.f32 %v8479_v35, %v597_v26  ;;  %v1174_v26 = vld [vmem:[#allocation2 + $0x54] sm:$0x8] }
 0x1d0   : > { %v602_v49 = vmul.f32 %v600_v36, %v520_v31  ;;  %v9361_v51 = vrot.slane %v600_v36, %v607_v30 }
 0x1d2   : > { %v603_v59 = vsub.f32 %v601_v43, %v602_v49  ;;  %v625_v60 = vmul.f32 %v9361_v51, %v9221_v22  ;;  %v627_v8 = vmul.f32 %v9361_v51, %v9235_v33  ;;  %v628_v17 = vmul.f32 %v9361_v51, %v9241_v38 }
 0x1d3   : > { %v629_v27 = vmul.f32 %v9361_v51, %v9247_v45  ;;  %v630_v31 = vmul.f32 %v9361_v51, %v9253_v50  ;;  %v631_v4 = vmul.f32 %v9361_v51, %v9259_v56  ;;  %v632_v22 = vmul.f32 %v9361_v51, %v9265_v61 }
 0x1d4   : > { %v9373_v39 = vrot.slane %v603_v59, %v607_v30  ;;  %v633_v33 = vmul.f32 %v9361_v51, %v9271_v5  ;;  %v634_v38 = vmul.f32 %v9361_v51, %v9277_v19  ;;  %v635_v45 = vmul.f32 %v9361_v51, %v9283_v25 }
 0x1d5   : > { %v636_v50 = vmul.f32 %v9361_v51, %v9289_v32  ;;  %v637_v52 = vmul.f32 %v9361_v51, %v9295_v40  ;;  %v638_v56 = vmul.f32 %v9361_v51, %v9299_v47  ;;  %v639_v61 = vmul.f32 %v9361_v51, %v9305_v54 }
 0x1d6   : > { %v640_v5 = vmul.f32 %v9361_v51, %v9309_v58  ;;  %v641_v19 = vmul.f32 %v9361_v51, %v9315_v3  ;;  %v9398_v25 = vadd.f32 %v9373_v39, %v625_v60  ;;  %v9401_v32 = vadd.f32 %v9373_v39, %v627_v8 }
 0x1d7   : > { %v9404_v40 = vadd.f32 %v9373_v39, %v628_v17  ;;  %v9407_v47 = vadd.f32 %v9373_v39, %v629_v27  ;;  %v9410_v54 = vadd.f32 %v9373_v39, %v630_v31  ;;  %v9413_v58 = vadd.f32 %v9373_v39, %v631_v4 }
 0x1d8   : > { %v9416_v3 = vadd.f32 %v9373_v39, %v632_v22  ;;  %v9419_v9 = vadd.f32 %v9373_v39, %v633_v33  ;;  %v9422_v63 = vadd.f32 %v9373_v39, %v634_v38  ;;  %v9425_v1 = vadd.f32 %v9373_v39, %v635_v45 }
 0x1d9   : > { %v9428_v15 = vadd.f32 %v9373_v39, %v636_v50  ;;  %v9431_v10 = vadd.f32 %v9373_v39, %v637_v52  ;;  %v9434_v14 = vadd.f32 %v9373_v39, %v638_v56  ;;  %v9437_v20 = vadd.f32 %v9373_v39, %v639_v61 }
 0x1da   : > { %v9440_v21 = vadd.f32 %v9373_v39, %v640_v5  ;;  %v9443_v24 = vadd.f32 %v9373_v39, %v641_v19  ;;  %v695_v30 = vsub.f32 0.0, %v9398_v25  ;;  %v697_v35 = vsub.f32 0.0, %v9401_v32 }
 0x1db   : > { %v698_v36 = vsub.f32 0.0, %v9404_v40  ;;  %v699_v37 = vsub.f32 0.0, %v9407_v47  ;;  %v9449_v43 = vrot.slane %v1236_v55, 11  ;;  %v700_v48 = vsub.f32 0.0, %v9410_v54 }
 0x1dc   : > { %v701_v49 = vsub.f32 0.0, %v9413_v58  ;;  %v9455_v59 = vrot.slane %v1280_v6, 11  ;;  %v1302_v60 = vshrl.u32 %v1174_v26, 16  ;;  %v702_v8 = vsub.f32 0.0, %v9416_v3 }
 0x1dd   : > { %11203 = vst [vmem:[#allocation13_spill] sm:$0xff] %v9449_v43  ;;  %v703_v17 = vsub.f32 0.0, %v9419_v9  ;;  %v704_v27 = vsub.f32 0.0, %v9422_v63  ;;  %v705_v31 = vsub.f32 0.0, %v9425_v1  ;;  %v742_v4 = vmul.f32 1.442695, %v695_v30 }
 0x1de   : > { %11205 = vst [vmem:[#allocation15_spill] sm:$0xff] %v9455_v59  ;;  %v746_v55 = vmul.f32 1.442695, %v697_v35  ;;  %v748_v22 = vmul.f32 1.442695, %v698_v36  ;;  %v706_v62 = vsub.f32 0.0, %v9428_v15  ;;  %v610_v61 = vmul.f32 %v9361_v51, %v9113_v11 }
 0x1df   : > { %v707_v33 = vsub.f32 0.0, %v9431_v10  ;;  %v708_v38 = vsub.f32 0.0, %v9434_v14  ;;  %v750_v6 = vmul.f32 1.442695, %v699_v37  ;;  %v709_v45 = vsub.f32 0.0, %v9437_v20 }
 0x1e0   : > { %v710_v50 = vsub.f32 0.0, %v9440_v21  ;;  %v752_v52 = vmul.f32 1.442695, %v700_v48  ;;  %8480 = vpow2.f32 %v742_v4  ;;  %v754_v56 = vmul.f32 1.442695, %v701_v49 }
 0x1e1   : > { %8482 = vpow2.f32 %v746_v55  ;;  %v611_v5 = vmul.f32 %v9361_v51, %v9116_v12  ;;  %v711_v19 = vsub.f32 0.0, %v9443_v24  ;;  %v756_v26 = vmul.f32 1.442695, %v702_v8 }
 0x1e2   : > { %v758_v30 = vmul.f32 1.442695, %v703_v17  ;;  %8484 = vpow2.f32 %v748_v22  ;;  %v760_v35 = vmul.f32 1.442695, %v704_v27  ;;  %v9472_v36 = vadd.f32 %v9373_v39, %v610_v61 }
 0x1e3   : > { %8486 = vpow2.f32 %v750_v6  ;;  %v9475_v37 = vadd.f32 %v9373_v39, %v611_v5  ;;  %v612_v11 = vmul.f32 %v9361_v51, %v9119_v13  ;;  %v613_v12 = vmul.f32 %v9361_v51, %v9131_v18 }
 0x1e4   : > { %8488 = vpow2.f32 %v752_v52  ;;  %v614_v48 = vmul.f32 %v9361_v51, %v9138_v23  ;;  %v762_v49 = vmul.f32 1.442695, %v705_v31  ;;  %v764_v8 = vmul.f32 1.442695, %v706_v62  ;;  %v9504_v62 = vld [vmem:[#allocation8 + $0x40] sm:$0xff]  }
 0x1e5   : > { %8490 = vpow2.f32 %v754_v56  ;;  %v615_v17 = vmul.f32 %v9361_v51, %v9147_v28  ;;  %v9486_v27 = vadd.f32 %v9373_v39, %v612_v11  ;;  %v9489_v4 = vadd.f32 %v9373_v39, %v613_v12  ;;  %11207 = vst [vmem:[#allocation17_spill] sm:$0xff] %v9504_v62  ;;  %7561 = vmatprep.subr.bf16.mxu1 %v9504_v62 }
 0x1e6   : > { %8492 = vpow2.f32 %v756_v26  ;;  %v9492_v13 = vadd.f32 %v9373_v39, %v614_v48  ;;  %v766_v18 = vmul.f32 1.442695, %v707_v33  ;;  %v680_v23 = vsub.f32 0.0, %v9472_v36 }
 0x1e7   : > { %8494 = vpow2.f32 %v758_v30  ;;  %v9496_v31 = vadd.f32 %v9373_v39, %v615_v17  ;;  %v9500_v28 = vmul.f32 %v9361_v51, %v9214_v16  ;;  %v768_v55 = vmul.f32 1.442695, %v708_v38 }
 0x1e8   : > { %8496 = vpow2.f32 %v760_v35  ;;  %v9502_v22 = vrot.slane %v1302_v60, 11  ;;  %v9508_v6 = vmul.f32 %v9361_v51, %v9228_v29  ;;  %v770_v33 = vmul.f32 1.442695, %v709_v45 }
 0x1e9   : > { %8498 = vpow2.f32 %v762_v49  ;;  %v616_v52 = vmul.f32 %v9361_v51, %v9154_v34  ;;  %v772_v61 = vmul.f32 1.442695, %v710_v50  ;;  %v774_v5 = vmul.f32 1.442695, %v711_v19 }
 0x1ea   : > { %11206 = vst [vmem:[#allocation16_spill] sm:$0xff] %v9502_v22  ;;  %v8481_v56 = vpop.eup %8480  ;;  %8500 = vpow2.f32 %v764_v8  ;;  %v617_v16 = vmul.f32 %v9361_v51, %v9163_v41  ;;  %v681_v38 = vsub.f32 0.0, %v9475_v37  ;;  %v9516_v29 = vmul.f32 1.442695, %v680_v23 }
 0x1eb   : > { %v8483_v60 = vpop.eup %8482  ;;  %8502 = vpow2.f32 %v766_v18  ;;  %v9519_v45 = vadd.f32 %v9373_v39, %v616_v52  ;;  %v791_v34 = vadd.f32 1.0, %v8481_v56  ;;  %v618_v41 = vmul.f32 %v9361_v51, %v9166_v42 }
 0x1ec   : > { %v8485_v26 = vpop.eup %8484  ;;  %8504 = vpow2.f32 %v768_v55  ;;  %v9522_v50 = vadd.f32 %v9373_v39, %v617_v16  ;;  %v793_v30 = vadd.f32 1.0, %v8483_v60  ;;  %v682_v35 = vsub.f32 0.0, %v9486_v27 }
 0x1ed   : > { %v8487_v19 = vpop.eup %8486  ;;  %8506 = vpow2.f32 %v770_v33  ;;  %v619_v11 = vmul.f32 %v9361_v51, %v9173_v46  ;;  %v794_v48 = vadd.f32 1.0, %v8485_v26  ;;  %v683_v49 = vsub.f32 0.0, %v9489_v4 }
 0x1ee   : > { %v8489_v12 = vpop.eup %8488  ;;  %8508 = vpow2.f32 %v772_v61  ;;  %v9531_v8 = vadd.f32 %v9373_v39, %v618_v41  ;;  %v795_v18 = vadd.f32 1.0, %v8487_v19  ;;  %v684_v42 = vsub.f32 0.0, %v9492_v13 }
 0x1ef   : > { %v8491_v17 = vpop.eup %8490  ;;  %8510 = vpow2.f32 %v774_v5  ;;  %v9535_v23 = vadd.f32 %v9373_v39, %v619_v11  ;;  %v796_v33 = vadd.f32 1.0, %v8489_v12  ;;  %v9537_v46 = vmul.f32 1.442695, %v681_v38 }
 0x1f0   : > { %v8493_v55 = vpop.eup %8492  ;;  %8512 = vrcp.f32 %v791_v34  ;;  %v685_v52 = vsub.f32 0.0, %v9496_v31  ;;  %v797_v61 = vadd.f32 1.0, %v8491_v17  ;;  %v9540_v16 = vmul.f32 1.442695, %v682_v35 }
 0x1f1   : > { %v8495_v56 = vpop.eup %8494  ;;  %8514 = vrcp.f32 %v793_v30  ;;  %v620_v5 = vmul.f32 %v9361_v51, %v9182_v53  ;;  %v798_v26 = vadd.f32 1.0, %v8493_v55  ;;  %v9544_v41 = vmul.f32 1.442695, %v683_v49 }
 0x1f2   : > { %v8497_v60 = vpop.eup %8496  ;;  %8516 = vrcp.f32 %v794_v48  ;;  %v621_v34 = vmul.f32 %v9361_v51, %v9189_v57  ;;  %v799_v19 = vadd.f32 1.0, %v8495_v56  ;;  %v9548_v11 = vmul.f32 1.442695, %v684_v42 }
 0x1f3   : > { %v8499_v38 = vpop.eup %8498  ;;  %8518 = vrcp.f32 %v795_v18  ;;  %v9551_v30 = vadd.f32 %v9373_v39, %v620_v5  ;;  %v800_v12 = vadd.f32 1.0, %v8497_v60  ;;  %v622_v48 = vmul.f32 %v9361_v51, %v9198_v0 }
 0x1f4   : > { %v8501_v35 = vpop.eup %8500  ;;  %8520 = vrcp.f32 %v796_v33  ;;  %v9554_v53 = vadd.f32 %v9373_v39, %v621_v34  ;;  %v801_v17 = vadd.f32 1.0, %v8499_v38  ;;  %v686_v57 = vsub.f32 0.0, %v9519_v45 }
 0x1f5   : > { %v8503_v49 = vpop.eup %8502  ;;  %8522 = vrcp.f32 %v797_v61  ;;  %v623_v18 = vmul.f32 %v9361_v51, %v9205_v7  ;;  %v802_v55 = vadd.f32 1.0, %v8501_v35  ;;  %v687_v56 = vsub.f32 0.0, %v9522_v50 }
 0x1f6   : > { %v8505_v42 = vpop.eup %8504  ;;  %8524 = vrcp.f32 %v798_v26  ;;  %v9563_v33 = vadd.f32 %v9373_v39, %v622_v48  ;;  %v803_v60 = vadd.f32 1.0, %v8503_v49  ;;  %v688_v0 = vsub.f32 0.0, %v9531_v8 }
 0x1f7   : > { %v8507_v5 = vpop.eup %8506  ;;  %8526 = vrcp.f32 %v799_v19  ;;  %v9567_v61 = vadd.f32 %v9373_v39, %v623_v18  ;;  %v804_v38 = vadd.f32 1.0, %v8505_v42  ;;  %v689_v7 = vsub.f32 0.0, %v9535_v23 }
 0x1f8   : > { %11208 = vst [vmem:[#allocation18_spill] sm:$0xff] %v9563_v33  ;;  %v8509_v34 = vpop.eup %8508  ;;  %8528 = vrcp.f32 %v800_v12  ;;  %v690_v51 = vsub.f32 0.0, %v9551_v30  ;;  %v805_v35 = vadd.f32 1.0, %v8507_v5  ;;  %v9571_v48 = vmul.f32 1.442695, %v685_v52 }
 0x1f9   : > { %v8511_v26 = vpop.eup %8510  ;;  %8530 = vrcp.f32 %v801_v17  ;;  %v9573_v22 = vmul.f32 1.442695, %v686_v57  ;;  %v806_v49 = vadd.f32 1.0, %v8509_v34  ;;  %v9577_v18 = vmul.f32 1.442695, %v687_v56 }
 0x1fa   : > { %v9575_v19 = vpop.eup %8512  ;;  %8532 = vrcp.f32 %v802_v55  ;;  %v691_v42 = vsub.f32 0.0, %v9554_v53  ;;  %v807_v59 = vadd.f32 1.0, %v8511_v26  ;;  %v9580_v62 = vmul.f32 1.442695, %v688_v0  ;;  %v1177_v55 = vld [vmem:[#allocation2 + $0x68] sm:$0x8] }
 0x1fb   : > { %v8515_v12 = vpop.eup %8514  ;;  %8534 = vrcp.f32 %v803_v60  ;;  %v9584_v17 = vadd.f32 %v9373_v39, %v9500_v28  ;;  %v9586_v57 = vmul.f32 1.442695, %v689_v7  ;;  %v9588_v5 = vmul.f32 1.442695, %v690_v51  ;;  %v1180_v26 = vld [vmem:[#allocation2 + $0x7c] sm:$0x8] }
 0x1fc   : > { %v8517_v52 = vpop.eup %8516  ;;  %8536 = vrcp.f32 %v804_v38  ;;  %v9592_v56 = vadd.f32 %v9373_v39, %v9508_v6  ;;  %v692_v0 = vsub.f32 0.0, %v9563_v33  ;;  %v889_v28 = vmul.f32 %v8515_v12, %v9401_v32 }
 0x1fd   : > { %v8519_v34 = vpop.eup %8518  ;;  %8538 = vrcp.f32 %v805_v35  ;;  %v890_v60 = vmul.f32 %v8517_v52, %v9404_v40  ;;  %v9598_v7 = vmul.f32 1.442695, %v691_v42  ;;  %v693_v51 = vsub.f32 0.0, %v9567_v61 }
 0x1fe   : > { %v8521_v44 = vpop.eup %8520  ;;  %8540 = vrcp.f32 %v806_v49  ;;  %v891_v38 = vmul.f32 %v8519_v34, %v9407_v47  ;;  %v1324_v6 = vshrl.u32 %v1177_v55, 16  ;;  %v7129_v35 = vpack.c.bf16 %v889_v28, %v889_v28  ;;  %v1183_v55 = vld [vmem:[#allocation2 + $0x90] sm:$0x8]  ;;  %v1189_v28 = vld [vmem:[#allocation2 + $0xb8] sm:$0x8] }
 0x1ff   : > { %v8523_v43 = vpop.eup %8522  ;;  %8542 = vrcp.f32 %v807_v59  ;;  %v892_v39 = vmul.f32 %v8521_v44, %v9410_v54  ;;  %v1346_v32 = vshrl.u32 %v1180_v26, 16  ;;  %v9606_v12 = vmul.f32 1.442695, %v692_v0 }
 0x200   : > { %v8525_v40 = vpop.eup %8524  ;;  %v893_v52 = vmul.f32 %v8523_v43, %v9413_v58  ;;  %v7168_v33 = vpack.c.bf16 %v891_v38, %v890_v60  ;;  %8544 = vpow2.f32 %v9516_v29  ;;  %1140 = vst [vmem:[#allocation2 + $0xc0] sm:$0xf] %v7129_v35  ;;  %v9610_v58 = vmul.f32 1.442695, %v693_v51 }
 0x201   : > { %v8527_v49 = vpop.eup %8526  ;;  %v894_v47 = vmul.f32 %v8525_v40, %v9416_v3  ;;  %v7132_v42 = vpack.c.bf16 %v892_v39, %v892_v39  ;;  %8546 = vpow2.f32 %v9537_v46  ;;  %v9614_v3 = vrot.slane %v1324_v6, 11  ;;  %v1192_v39 = vld [vmem:[#allocation2 + $0xcc] sm:$0x8] }
 0x202   : > { %v8529_v59 = vpop.eup %8528  ;;  %v895_v54 = vmul.f32 %v8527_v49, %v9419_v9  ;;  %v7133_v44 = vpack.c.bf16 %v893_v52, %v893_v52  ;;  %7189 = vst [vmem:[#allocation2 + $0xd0] sm:$0xff] %v7168_v33   ;;  %8548 = vpow2.f32 %v9540_v16  ;;  %v694_v46 = vsub.f32 0.0, %v9584_v17  ;;  %v1186_v33 = vld [vmem:[#allocation2 + $0xa4] sm:$0x8] }
 0x203   : > { %v8531_v43 = vpop.eup %8530  ;;  %v896_v29 = vmul.f32 %v8529_v59, %v9422_v63  ;;  %1143 = vst [vmem:[#allocation2 + $0xe4] sm:$0xf] %v7132_v42  ;;  %8550 = vpow2.f32 %v9544_v41  ;;  %v9619_v16 = vrot.slane %v1346_v32, 11  ;;  %v696_v41 = vsub.f32 0.0, %v9592_v56 }
 0x204   : > { %v8533_v34 = vpop.eup %8532  ;;  %v897_v9 = vmul.f32 %v8531_v43, %v9425_v1  ;;  %v7173_v60 = vpack.c.bf16 %v895_v54, %v894_v47  ;;  %1144 = vst [vmem:[#allocation2 + $0xe8] sm:$0xf] %v7133_v44  ;;  %8552 = vpow2.f32 %v9548_v11  ;;  %v1368_v11 = vshrl.u32 %v1183_v55, 16 }
 0x205   : > { %v8535_v0 = vpop.eup %8534  ;;  %v898_v63 = vmul.f32 %v8533_v34, %v9428_v15  ;;  %v7136_v26 = vpack.c.bf16 %v896_v29, %v896_v29  ;;  %8554 = vpow2.f32 %v9571_v48  ;;  %v9628_v15 = vmul.f32 1.442695, %v694_v46  ;;  %v9652_v34 = vld [vmem:[#allocation2 + $0xf4] sm:$0x8] }
 0x206   : > { %v8537_v38 = vpop.eup %8536  ;;  %v899_v51 = vmul.f32 %v8535_v0, %v9431_v10  ;;  %v7137_v1 = vpack.c.bf16 %v897_v9, %v897_v9  ;;  %7190 = vst [vmem:[#allocation2 + $0xf8] sm:$0xff] %v7173_v60   ;;  %8556 = vpow2.f32 %v9573_v22  ;;  %v1390_v48 = vshrl.u32 %v1186_v33, 16  ;;  %v9654_v9 = vld [vmem:[#allocation2 + $0x108] sm:$0x8] }
 0x207   : > { %v8539_v6 = vpop.eup %8538  ;;  %v900_v35 = vmul.f32 %v8537_v38, %v9434_v14  ;;  %1147 = vst [vmem:[#allocation2 + $0x10c] sm:$0xf] %v7136_v26  ;;  %8558 = vpow2.f32 %v9577_v18  ;;  %v1412_v32 = vshrl.u32 %v1189_v28, 16  ;;  %v1434_v14 = vshrl.u32 %v1192_v39, 16  ;;  %v9638_v54 = vld [vmem:[#allocation2 + $0xc0] sm:$0xf] }
 0x208   : > { %v8541_v40 = vpop.eup %8540  ;;  %v901_v52 = vmul.f32 %v8539_v6, %v9437_v20  ;;  %1148 = vst [vmem:[#allocation2 + $0x110] sm:$0xf] %v7137_v1  ;;  %v7178_v10 = vpack.c.bf16 %v899_v51, %v898_v63  ;;  %8560 = vpow2.f32 %v9580_v62  ;;  %v9636_v20 = vmul.f32 1.442695, %v696_v41  ;;  %11209 = vst [vmem:[#allocation19_spill] sm:$0xff] %v9638_v54 }
 0x209   : > { %v8543_v22 = vpop.eup %8542  ;;  %v902_v49 = vmul.f32 %v8541_v40, %v9440_v21  ;;  %v7140_v47 = vpack.c.bf16 %v900_v35, %v900_v35  ;;  %8562 = vpow2.f32 %v9586_v57  ;;  %v9640_v62 = vld [vmem:[#allocation2 + $0xe0] sm:$0x8]  ;;  %v9643_v57 = vrot.slane %v1368_v11, 11  ;;  %v9657_v0 = vld [vmem:[#allocation2 + $0xd4] sm:$0xf] }
 0x20a   : > { %v8545_v42 = vpop.eup %8544  ;;  %v903_v18 = vmul.f32 %v8543_v22, %v9443_v24  ;;  %v7141_v59 = vpack.c.bf16 %v901_v52, %v901_v52  ;;  %7191 = vst [vmem:[#allocation2 + $0x120] sm:$0xff] %v7178_v10   ;;  %8564 = vpow2.f32 %v9588_v5  ;;  %v9645_v43 = vrot.slane %v1390_v48, 11  ;;  %v9647_v24 = vld [vmem:[#allocation2 + $0xd0] sm:$0xf]  ;;  %11211 = vst [vmem:[#allocation21_spill] sm:$0xff] %v9657_v0 }
 0x20b   : > { %v8547_v44 = vpop.eup %8546  ;;  %1151 = vst [vmem:[#allocation2 + $0x134] sm:$0xf] %v7140_v47  ;;  %v776_v21 = vadd.f32 1.0, %v8545_v42  ;;  %8566 = vpow2.f32 %v9598_v7  ;;  %11210 = vst [vmem:[#allocation20_spill] sm:$0xff] %v9647_v24  ;;  %v9650_v55 = vrot.slane %v1412_v32, 11  ;;  %v3236_v33 = vshrl.u32 %v9638_v54, 16 }
 0x20c   : > { %v8549_v29 = vpop.eup %8548  ;;  %1152 = vst [vmem:[#allocation2 + $0x138] sm:$0xf] %v7141_v59  ;;  %v7183_v5 = vpack.c.bf16 %v903_v18, %v902_v49  ;;  %v777_v46 = vadd.f32 1.0, %v8547_v44  ;;  %8568 = vpow2.f32 %v9606_v12  ;;  %v9659_v63 = vrot.slane %v1434_v14, 11  ;;  %v9673_v22 = vld [vmem:[#allocation2 + $0xe4] sm:$0xf] }
 0x20d   : > { %v8551_v60 = vpop.eup %8550  ;;  %8570 = vrcp.f32 %v776_v21  ;;  %v778_v7 = vadd.f32 1.0, %v8549_v29  ;;  %v3249_v12 = vshrl.u32 %v9647_v24, 16  ;;  %v1456_v28 = vshrl.u32 %v9640_v62, 16  ;;  %11213 = vst [vmem:[#allocation23_spill] sm:$0xff] %v9673_v22  ;;  %v1193_v49 = vld [vmem:[#allocation2 + $0xd0] sm:$0xf] }
 0x20e   : > { %v8553_v26 = vpop.eup %8552  ;;  %7192 = vst [vmem:[#allocation2 + $0x148] sm:$0xff] %v7183_v5   ;;  %8572 = vrcp.f32 %v777_v46  ;;  %v779_v41 = vadd.f32 1.0, %v8551_v60  ;;  %v3258_v48 = vshrl.u32 %v9657_v0, 16  ;;  %v9669_v10 = vmul.f32 %v9575_v19, %v9398_v25  ;;  %v1194_v59 = vld [vmem:[#allocation2 + $0xd4] sm:$0xf] }
 0x20f   : > { %v8555_v38 = vpop.eup %8554  ;;  %8574 = vrcp.f32 %v778_v7  ;;  %v780_v51 = vadd.f32 1.0, %v8553_v26  ;;  %v9671_v32 = vrot.slane %v3236_v33, 7  ;;  %v9675_v42 = vrot.slane %v3249_v12, 7  ;;  %v9683_v60 = vld [vmem:[#allocation2 + $0xe8] sm:$0xf] }
 0x210   : > { %v8557_v39 = vpop.eup %8556  ;;  %8576 = vrcp.f32 %v779_v41  ;;  %v781_v6 = vadd.f32 1.0, %v8555_v38  ;;  %v9681_v46 = vrot.slane %v3258_v48, 7  ;;  %11216 = vst [vmem:[#allocation26_spill] sm:$0xff] %v9683_v60  ;;  %v1439_v7 = vshrl.u32 %v1193_v49, 16  ;;  %v9686_v12 = vld [vmem:[#allocation2 + $0xc0] sm:$0xf] }
 0x211   : > { %v8559_v40 = vpop.eup %8558  ;;  %8578 = vrcp.f32 %v780_v51  ;;  %v782_v52 = vadd.f32 1.0, %v8557_v39  ;;  %11212 = vst [vmem:[#allocation22_spill] sm:$0xff] %v9671_v32  ;;  %11214 = vst [vmem:[#allocation24_spill] sm:$0xff] %v9675_v42  ;;  %v3271_v41 = vshrl.u32 %v9673_v22, 16  ;;  %v1448_v38 = vshrl.u32 %v1194_v59, 16 }
 0x212   : > { %v8561_v47 = vpop.eup %8560  ;;  %8580 = vrcp.f32 %v781_v6  ;;  %v783_v14 = vadd.f32 1.0, %v8559_v40  ;;  %11215 = vst [vmem:[#allocation25_spill] sm:$0xff] %v9681_v46  ;;  %v1441_v40 = vrot.slane %v1439_v7, 7  ;;  %v3280_v48 = vshrl.u32 %v9683_v60, 16  ;;  %v9696_v11 = vld [vmem:[#allocation2 + $0xf8] sm:$0xf] }
 0x213   : > { %v8563_v44 = vpop.eup %8562  ;;  %8582 = vrcp.f32 %v782_v52  ;;  %v784_v21 = vadd.f32 1.0, %v8561_v47  ;;  %v1442_v47 = vshll.u32 %v1193_v49, 16  ;;  %v1451_v35 = vshll.u32 %v1194_v59, 16  ;;  %11218 = vst [vmem:[#allocation28_spill] sm:$0xff] %v9696_v11 }
 0x214   : > { %v8565_v19 = vpop.eup %8564  ;;  %8584 = vrcp.f32 %v783_v14  ;;  %v785_v5 = vadd.f32 1.0, %v8563_v44  ;;  %v1450_v14 = vrot.slane %v1448_v38, 7  ;;  %v9693_v18 = vrot.slane %v3271_v41, 7 }
 0x215   : > { %v8567_v33 = vpop.eup %8566  ;;  %8586 = vrcp.f32 %v784_v21  ;;  %v786_v26 = vadd.f32 1.0, %v8565_v19  ;;  %v1426_v19 = vshrl.u32 %v9686_v12, 16  ;;  %v1444_v7 = vor.u32 %v1442_v47, %v1441_v40 }
 0x216   : > { %v8569_v51 = vpop.eup %8568  ;;  %8588 = vrcp.f32 %v785_v5  ;;  %v787_v39 = vadd.f32 1.0, %v8567_v33  ;;  %11217 = vst [vmem:[#allocation27_spill] sm:$0xff] %v9693_v18  ;;  %v1446_v49 = vrot.slane %v1441_v40, 4  ;;  %v1453_v38 = vor.u32 %v1451_v35, %v1450_v14 }
 0x217   : > { %v8571_v52 = vpop.eup %8570  ;;  %8590 = vrcp.f32 %v786_v26  ;;  %v788_v33 = vadd.f32 1.0, %v8569_v51  ;;  %v9699_v59 = vrot.slane %v3280_v48, 7  ;;  %v1428_v47 = vrot.slane %v1426_v19, 7 }
 0x218   : > { %v8573_v44 = vpop.eup %8572  ;;  %v872_v21 = vmul.f32 %v8571_v52, %v9472_v36  ;;  %8592 = vrcp.f32 %v787_v39 }
 0x219   : > { %v8575_v29 = vpop.eup %8574  ;;  %v873_v5 = vmul.f32 %v8573_v44, %v9475_v37  ;;  %11219 = vst [vmem:[#allocation29_spill] sm:$0xff] %v9699_v59  ;;  %8594 = vpow2.f32 %v9610_v58  ;;  %v1454_v58 = vsel %vm9347_vm3, %v1446_v49, %v1453_v38 }
 0x21a   : > { %v8577_v6 = vpop.eup %8576  ;;  %v7112_v26 = vpack.c.bf16 %v872_v21, %v872_v21  ;;  %v874_v25 = vmul.f32 %v8575_v29, %v9486_v27  ;;  %v1429_v27 = vshll.u32 %v9686_v12, 16  ;;  %8596 = vrcp.f32 %v788_v33  ;;  %v9715_v12 = vld [vmem:[#allocation2 + $0x10c] sm:$0xf] }
 0x21b   : > { %v8579_v36 = vpop.eup %8578  ;;  %v7113_v39 = vpack.c.bf16 %v873_v5, %v873_v5  ;;  %v875_v52 = vmul.f32 %v8577_v6, %v9489_v4  ;;  %v9706_v4 = vld [vmem:[#allocation2 + $0xfc] sm:$0xf]  ;;  %v3293_v6 = vshrl.u32 %v9696_v11, 16  ;;  %11221 = vst [vmem:[#allocation31_spill] sm:$0xff] %v9715_v12  ;;  %8598 = vpow2.f32 %v9628_v15 }
 0x21c   : > { %v8581_v51 = vpop.eup %8580  ;;  %1123 = vst [vmem:[#allocation2 + $0x1c] sm:$0xf] %v7112_v26  ;;  %v876_v41 = vmul.f32 %v8579_v36, %v9492_v13  ;;  %11220 = vst [vmem:[#allocation30_spill] sm:$0xff] %v9706_v4  ;;  %v1445_v13 = vsel %vm9347_vm3, %v9659_v63, %v1444_v7  ;;  %8600 = vpow2.f32 %v9636_v20  ;;  %v9725_v33 = vor.u32 %v1429_v27, %v1428_v47  ;;  %v8378_v27 = vld [vmem:[#allocation8 + $0x148] sm:$0xff]  }
 0x21d   : > { %v8583_v35 = vpop.eup %8582  ;;  %1124 = vst [vmem:[#allocation2 + $0x20] sm:$0xf] %v7113_v39  ;;  %v7148_v29 = vpack.c.bf16 %v875_v52, %v874_v25  ;;  %v877_v40 = vmul.f32 %v8581_v51, %v9496_v31  ;;  %v3302_v7 = vshrl.u32 %v9706_v4, 16  ;;  %v9729_v49 = vcombine.low %v1445_v13, %v1454_v58  ;;  %v9752_v13 = vld [vmem:[#allocation2 + $0x138] sm:$0xf] }
 0x21e   : > { %v8585_v48 = vpop.eup %8584  ;;  %v7116_v14 = vpack.c.bf16 %v876_v41, %v876_v41  ;;  %v878_v44 = vmul.f32 %v8583_v35, %v9519_v45  ;;  %v9721_v45 = vld [vmem:[#allocation2 + $0x110] sm:$0xf]  ;;  %v3315_v38 = vshrl.u32 %v9715_v12, 16  ;;  %v9739_v35 = vld [vmem:[#allocation2 + $0xe4] sm:$0xf] }
 0x21f   : > { %v8587_v25 = vpop.eup %8586  ;;  %7185 = vst [vmem:[#allocation2 + $0x30] sm:$0xff] %v7148_v29   ;;  %v7117_v31 = vpack.c.bf16 %v877_v40, %v877_v40  ;;  %v879_v21 = vmul.f32 %v8585_v48, %v9522_v50  ;;  %11222 = vst [vmem:[#allocation32_spill] sm:$0xff] %v9721_v45  ;;  %v3324_v20 = vshrl.u32 %v9721_v45, 16  ;;  %v9741_v48 = vrot.slane %v3302_v7, 7 }
 0x220   : > { %v8589_v5 = vpop.eup %8588  ;;  %1127 = vst [vmem:[#allocation2 + $0x44] sm:$0xf] %v7116_v14  ;;  %v880_v63 = vmul.f32 %v8587_v25, %v9531_v8  ;;  %v9733_v8 = vrot.slane %v3293_v6, 7  ;;  %v9746_v14 = vld [vmem:[#allocation2 + $0x120] sm:$0xf] }
 0x221   : > { %v8591_v26 = vpop.eup %8590  ;;  %1128 = vst [vmem:[#allocation2 + $0x48] sm:$0xf] %v7117_v31  ;;  %v7153_v50 = vpack.c.bf16 %v879_v21, %v878_v44  ;;  %v881_v15 = vmul.f32 %v8589_v5, %v9535_v23  ;;  %11224 = vst [vmem:[#allocation34_spill] sm:$0xff] %v9741_v48  ;;  %v9748_v44 = vld [vmem:[#allocation2 + $0x124] sm:$0xf]  ;;  %v9756_v21 = vrot.slane %v3315_v38, 7 }
 0x222   : > { %v8593_v36 = vpop.eup %8592  ;;  %v7120_v39 = vpack.c.bf16 %v880_v63, %v880_v63  ;;  %v882_v52 = vmul.f32 %v8591_v26, %v9551_v30  ;;  %11223 = vst [vmem:[#allocation33_spill] sm:$0xff] %v9733_v8 }
 0x223   : > { %v2998_v51 = vld [vmem:[#allocation2 + $0x1c] sm:$0xf]  ;;  %7186 = vst [vmem:[#allocation2 + $0x58] sm:$0xff] %v7153_v50   ;;  %v7121_v41 = vpack.c.bf16 %v881_v15, %v881_v15  ;;  %v883_v47 = vmul.f32 %v8593_v36, %v9554_v53  ;;  %v9750_v53 = vld [vmem:[#allocation2 + $0x134] sm:$0xf]  ;;  %11225 = vst [vmem:[#allocation35_spill] sm:$0xff] %v9756_v21  ;;  %v9759_v63 = vpop.eup %8594 }
 0x224   : > { %v2999_v29 = vld [vmem:[#allocation2 + $0x20] sm:$0xf]  ;;  %v3051_v40 = vshrl.u32 %v2998_v51, 16  ;;  %1131 = vst [vmem:[#allocation2 + $0x6c] sm:$0xf] %v7120_v39  ;;  %v9765_v15 = vrot.slane %v3324_v20, 7  ;;  %v8597_v38 = vpop.eup %8596 }
 0x225   : > { %v3060_v58 = vshrl.u32 %v2999_v29, 16  ;;  %v6970_v25 = vcombine.low %v2998_v51, %v2999_v29  ;;  %v9754_v31 = vld [vmem:[#allocation2 + $0x1c] sm:$0xf]  ;;  %1132 = vst [vmem:[#allocation2 + $0x70] sm:$0xf] %v7121_v41  ;;  %v7158_v50 = vpack.c.bf16 %v883_v47, %v882_v52  ;;  %v9771_v39 = vrot.slane %v1456_v28, 11 }
 0x226   : > { %v9761_v7 = vld [vmem:[#allocation2 + $0x30] sm:$0xf]  ;;  %v9763_v26 = vld [vmem:[#allocation2 + $0x34] sm:$0xf]  ;;  %11226 = vst [vmem:[#allocation36_spill] sm:$0xff] %v9765_v15  ;;  %v9773_v41 = vrot.slane %v3051_v40, 7 }
 0x227   : > { %v3062_v5 = vrot.slane %v3060_v58, 7  ;;  %7721 = vmatprep.mubr.bf16.mxu0 %v6970_v25  ;;  %v9775_v6 = vld [vmem:[#allocation2 + $0x44] sm:$0xf]  ;;  %v3073_v20 = vshrl.u32 %v9761_v7, 16  ;;  %v3082_v47 = vshrl.u32 %v9763_v26, 16  ;;  %v6971_v62 = vcombine.low %v9761_v7, %v9763_v26  ;;  %7187 = vst [vmem:[#allocation2 + $0x80] sm:$0xff] %v7158_v50   ;;  %v9786_v58 = vpop.eup %8598 }
 0x228   : > { %11227 = vst [vmem:[#allocation37_spill] sm:$0xff] %v9773_v41  ;;  %11228 = vst [vmem:[#allocation38_spill] sm:$0xff] %v9775_v6  ;;  %v9783_v28 = vld [vmem:[#allocation2 + $0x48] sm:$0xf]  ;;  %v1241_v40 = vshrl.u32 %v9754_v31, 16  ;;  %v3054_v25 = vshll.u32 %v2998_v51, 16  ;;  %v9794_v1 = vpop.eup %8600 }
 0x229   : > { %11229 = vst [vmem:[#allocation39_spill] sm:$0xff] %v9783_v28  ;;  %v3063_v37 = vshll.u32 %v2999_v29, 16  ;;  %v9788_v36 = vld [vmem:[#allocation2 + $0x20] sm:$0xf]  ;;  %v3076_v52 = vshll.u32 %v9761_v7, 16  ;;  %7722 = vmatmul.mubr.bf16.vlgmr.msra.gmra.mrb[0].mxu0 %v6971_v62  ;;  %v6972_v50 = vcombine.low %v9775_v6, %v9783_v28  ;;  %v1244_v23 = vshll.u32 %v9754_v31, 16 }
 0x22a   : > { %v9800_v51 = vld [vmem:[#allocation2 + $0x30] sm:$0xf]  ;;  %v9802_v29 = vld [vmem:[#allocation2 + $0x34] sm:$0xf]  ;;  %v9808_v30 = vor.u32 %v3054_v25, %v9773_v41  ;;  %v3085_v7 = vshll.u32 %v9763_v26, 16  ;;  %v8608_v62 = vld [vmem:[#allocation8 + $0x140] sm:$0xff]  }
 0x22b   : > { %v11230_v15 = vld [vmem:[#allocation18_spill] sm:$0xff]  ;;  %v9811_v48 = vor.u32 %v3063_v37, %v3062_v5  ;;  %7754 = vmatpush3.bf16.msra.mxu0 %v8608_v62  ;;  %v9814_v8 = vrot.slane %v3073_v20, 7  ;;  %v3084_v59 = vrot.slane %v3082_v47, 7  ;;  %7725 = vmatprep.mubr.bf16.mxu0 %v6972_v50  ;;  %v1243_v32 = vrot.slane %v1241_v40, 7  ;;  %v9822_v47 = vld [vmem:[#allocation2 + $0x58] sm:$0xf] }
 0x22c   : > { %v9805_v21 = vmul.f32 %v8597_v38, %v11230_v15  ;;  %11231 = vst [vmem:[#allocation18_spill] sm:$0xff] %v9808_v30  ;;  %v1250_v18 = vshrl.u32 %v9788_v36, 16  ;;  %7755 = vmatprep.subr.bf16.mxu0 %v8378_v27  ;;  %v8381_v15 = vld [vmem:[#allocation8 + $0x150] sm:$0xff]   ;;  %v3095_v38 = vshrl.u32 %v9775_v6, 16  ;;  %v1263_v37 = vshrl.u32 %v9800_v51, 16  ;;  %11234 = vst [vmem:[#allocation42_spill] sm:$0xff] %v9822_v47 }
 0x22d   : > { %11232 = vst [vmem:[#allocation40_spill] sm:$0xff] %v9811_v48  ;;  %11233 = vst [vmem:[#allocation41_spill] sm:$0xff] %v9814_v8  ;;  %v1272_v5 = vshrl.u32 %v9802_v29, 16  ;;  %v1246_v26 = vor.u32 %v1244_v23, %v1243_v32  ;;  %v1248_v19 = vrot.slane %v1243_v32, 4  ;;  %v1253_v20 = vshll.u32 %v9788_v36, 16  ;;  %v11236_v23 = vld [vmem:[#allocation13_spill] sm:$0xff] }
 0x22e   : > { %v1252_v62 = vrot.slane %v1250_v18, 7  ;;  %v1265_v40 = vrot.slane %v1263_v37, 7  ;;  %v1266_v50 = vshll.u32 %v9800_v51, 16  ;;  %v1275_v42 = vshll.u32 %v9802_v29, 16  ;;  %v9826_v30 = vld [vmem:[#allocation2 + $0x5c] sm:$0xf] }
 0x22f   : > { %v1274_v46 = vrot.slane %v1272_v5, 7  ;;  %11235 = vst [vmem:[#allocation43_spill] sm:$0xff] %v9826_v30  ;;  %7756 = vmatpush3.bf16.msra.mxu0 %v8378_v27  ;;  %v3104_v25 = vshrl.u32 %v9783_v28, 16  ;;  %v1247_v32 = vsel %vm9347_vm3, %v11236_v23, %v1246_v26  ;;  %v8384_v41 = vld [vmem:[#allocation8 + $0x158] sm:$0xff]   ;;  %v9834_v37 = vor.u32 %v3076_v52, %v9814_v8  ;;  %v9836_v12 = vld [vmem:[#allocation2 + $0x6c] sm:$0xf] }
 0x230   : > { %v1255_v18 = vor.u32 %v1253_v20, %v1252_v62  ;;  %7757 = vmatprep.subr.bf16.mxu0 %v8381_v15  ;;  %v1268_v5 = vor.u32 %v1266_v50, %v1265_v40  ;;  %v1270_v48 = vrot.slane %v1265_v40, 4  ;;  %11238 = vst [vmem:[#allocation44_spill] sm:$0xff] %v9836_v12  ;;  %v9838_v27 = vld [vmem:[#allocation2 + $0x70] sm:$0xf]  ;;  %v3117_v26 = vshrl.u32 %v9822_v47, 16 }
 0x231   : > { %11237 = vst [vmem:[#allocation13_spill] sm:$0xff] %v9834_v37  ;;  %v1277_v45 = vor.u32 %v1275_v42, %v1274_v46  ;;  %11239 = vst [vmem:[#allocation45_spill] sm:$0xff] %v9838_v27  ;;  %v6973_v62 = vcombine.low %v9822_v47, %v9826_v30  ;;  %v9846_v20 = vld [vmem:[#allocation2 + $0x44] sm:$0xf]  ;;  %v9848_v52 = vld [vmem:[#allocation2 + $0x48] sm:$0xf]  ;;  %v9850_v40 = vor.u32 %v3085_v7, %v3084_v59 }
 0x232   : > { %v1256_v6 = vsel %vm9347_vm3, %v1248_v19, %v1255_v18  ;;  %11240 = vst [vmem:[#allocation46_spill] sm:$0xff] %v9846_v20  ;;  %11241 = vst [vmem:[#allocation47_spill] sm:$0xff] %v9848_v52  ;;  %v11243_v46 = vld [vmem:[#allocation14_spill] sm:$0xff]  ;;  %v9857_v19 = vld [vmem:[#allocation2 + $0x58] sm:$0xf]  ;;  %v9861_v4 = vrot.slane %v3095_v38, 7  ;;  %v6974_v59 = vcombine.low %v9836_v12, %v9838_v27 }
 0x233   : > { %11242 = vst [vmem:[#allocation48_spill] sm:$0xff] %v9850_v40  ;;  %v6859_v42 = vcombine.low %v1247_v32, %v1256_v6  ;;  %v1269_v50 = vsel %vm9347_vm3, %v11243_v46, %v1268_v5  ;;  %v1278_v23 = vsel %vm9347_vm3, %v1270_v48, %v1277_v45  ;;  %11244 = vst [vmem:[#allocation14_spill] sm:$0xff] %v9857_v19  ;;  %v9859_v18 = vld [vmem:[#allocation2 + $0x5c] sm:$0xf]  ;;  %7758 = vmatpush3.bf16.msra.mxu0 %v8381_v15  ;;  %v8387_v6 = vld [vmem:[#allocation8 + $0x160] sm:$0xff]  }
 0x234   : > { %11245 = vst [vmem:[#allocation49_spill] sm:$0xff] %v9859_v18  ;;  %11246 = vst [vmem:[#allocation50_spill] sm:$0xff] %v9861_v4  ;;  %v9863_v37 = vrot.slane %v3104_v25, 7  ;;  %v6860_v28 = vcombine.low %v1269_v50, %v1278_v23  ;;  %7726 = vmatmul.mubr.bf16.gmra.mrb[4].mxu0 %v6973_v62  ;;  %7759 = vmatprep.subr.bf16.mxu0 %v8384_v41  ;;  %v8394_v7 = vld [vmem:[#allocation8 + $0x48] sm:$0xff]   ;;  %v3126_v48 = vshrl.u32 %v9826_v30, 16  ;;  %v1285_v32 = vshrl.u32 %v9846_v20, 16 }
 0x235   : > { %7530 = vmatmul.mubr.bf16.vlgmr.msra.gmra.mrb[4].mxu1 %v6859_v42  ;;  %v1294_v15 = vshrl.u32 %v9848_v52, 16  ;;  %v9871_v38 = vrot.slane %v3117_v26, 7  ;;  %7729 = vmatprep.mubr.bf16.mxu0 %v6974_v59  ;;  %v1307_v5 = vshrl.u32 %v9857_v19, 16  ;;  %v1316_v62 = vshrl.u32 %v9859_v18, 16  ;;  %v8391_v46 = vld [vmem:[#allocation8 + $0x168] sm:$0xff]   ;;  %v8395_v42 = vld [vmem:[#allocation8 + $0x50] sm:$0xff]  }
 0x236   : > { %11247 = vst [vmem:[#allocation51_spill] sm:$0xff] %v9863_v37  ;;  %7533 = vmatprep.mubr.bf16.mxu1 %v6860_v28  ;;  %v1287_v50 = vrot.slane %v1285_v32, 7  ;;  %v1288_v23 = vshll.u32 %v9846_v20, 16  ;;  %v1297_v47 = vshll.u32 %v9848_v52, 16  ;;  %v9878_v37 = vld [vmem:[#allocation2 + $0x80] sm:$0xf] }
 0x237   : > { %11248 = vst [vmem:[#allocation52_spill] sm:$0xff] %v9871_v38  ;;  %v1296_v45 = vrot.slane %v1294_v15, 7  ;;  %11249 = vst [vmem:[#allocation53_spill] sm:$0xff] %v9878_v37  ;;  %7760 = vmatpush3.bf16.msra.mxu0 %v8384_v41  ;;  %v11250_v28 = vld [vmem:[#allocation17_spill] sm:$0xff]  ;;  %v1309_v26 = vrot.slane %v1307_v5, 7  ;;  %v1310_v59 = vshll.u32 %v9857_v19, 16 }
 0x238   : > { %7562 = vmatpush3.bf16.msra.mxu1 %v11250_v28  ;;  %v1318_v25 = vrot.slane %v1316_v62, 7  ;;  %v1319_v30 = vshll.u32 %v9859_v18, 16  ;;  %v9883_v38 = vld [vmem:[#allocation2 + $0x84] sm:$0xf]  ;;  %7761 = vmatprep.subr.bf16.mxu0 %v8387_v6  ;;  %v9885_v32 = vrot.slane %v3126_v48, 7  ;;  %v1290_v15 = vor.u32 %v1288_v23, %v1287_v50  ;;  %v11253_v19 = vld [vmem:[#allocation15_spill] sm:$0xff] }
 0x239   : > { %11251 = vst [vmem:[#allocation17_spill] sm:$0xff] %v9883_v38  ;;  %7563 = vmatprep.subr.bf16.mxu1 %v8394_v7  ;;  %v1292_v4 = vrot.slane %v1287_v50, 4  ;;  %v1299_v8 = vor.u32 %v1297_v47, %v1296_v45  ;;  %v3139_v40 = vshrl.u32 %v9836_v12, 16  ;;  %v1312_v41 = vor.u32 %v1310_v59, %v1309_v26  ;;  %v9888_v5 = vld [vmem:[#allocation2 + $0x6c] sm:$0xf] }
 0x23a   : > { %11252 = vst [vmem:[#allocation54_spill] sm:$0xff] %v9885_v32  ;;  %v1314_v11 = vrot.slane %v1309_v26, 4  ;;  %v1321_v28 = vor.u32 %v1319_v30, %v1318_v25  ;;  %v1291_v18 = vsel %vm9347_vm3, %v11253_v19, %v1290_v15  ;;  %v6975_v50 = vcombine.low %v9878_v37, %v9883_v38  ;;  %v9898_v47 = vld [vmem:[#allocation2 + $0x70] sm:$0xf]  ;;  %v9900_v45 = vld [vmem:[#allocation2 + $0x80] sm:$0xf] }
 0x23b   : > { %v1300_v48 = vsel %vm9347_vm3, %v1292_v4, %v1299_v8  ;;  %11254 = vst [vmem:[#allocation15_spill] sm:$0xff] %v9900_v45  ;;  %7762 = vmatpush3.bf16.msra.mxu0 %v8387_v6  ;;  %v11255_v25 = vld [vmem:[#allocation16_spill] sm:$0xff]  ;;  %v789_v26 = vadd.f32 1.0, %v9759_v63  ;;  %v8396_v8 = vld [vmem:[#allocation8 + $0x170] sm:$0xff]   ;;  %v7124_v6 = vpack.c.bf16 %v9805_v21, %v9805_v21  ;;  %v1341_v63 = vshll.u32 %v9898_v47, 16 }
 0x23c   : > { %7564 = vmatpush3.bf16.msra.mxu1 %v8394_v7  ;;  %v6861_v30 = vcombine.low %v1291_v18, %v1300_v48  ;;  %v1313_v23 = vsel %vm9347_vm3, %v11255_v25, %v1312_v41  ;;  %v1322_v19 = vsel %vm9347_vm3, %v1314_v11, %v1321_v28  ;;  %v9908_v4 = vld [vmem:[#allocation2 + $0x84] sm:$0xf]  ;;  %7763 = vmatprep.subr.bf16.mxu0 %v8391_v46  ;;  %v1329_v18 = vshrl.u32 %v9888_v5, 16 }
 0x23d   : > { %7565 = vmatprep.subr.bf16.mxu1 %v8395_v42  ;;  %v6862_v59 = vcombine.low %v1313_v23, %v1322_v19  ;;  %7730 = vmatmul.mubr.bf16.gmra.mrb[8].mxu0 %v6975_v50  ;;  %v1332_v7 = vshll.u32 %v9888_v5, 16  ;;  %v8399_v15 = vld [vmem:[#allocation8 + $0x58] sm:$0xff]   ;;  %8602 = vrcp.f32 %v789_v26  ;;  %v1338_v11 = vshrl.u32 %v9898_v47, 16  ;;  %1135 = vst [vmem:[#allocation2 + $0x94] sm:$0xf] %v7124_v6 }
 0x23e   : > { %7534 = vmatmul.mubr.bf16.gmra.mrb[8].mxu1 %v6861_v30  ;;  %v1351_v41 = vshrl.u32 %v9900_v45, 16  ;;  %v1331_v28 = vrot.slane %v1329_v18, 7  ;;  %v1354_v48 = vshll.u32 %v9900_v45, 16  ;;  %v1360_v21 = vshrl.u32 %v9908_v4, 16  ;;  %v8401_v26 = vld [vmem:[#allocation8 + $0x178] sm:$0xff]   ;;  %v8400_v45 = vld [vmem:[#allocation8 + $0x60] sm:$0xff]  }
 0x23f   : > { %7537 = vmatprep.mubr.bf16.mxu1 %v6862_v59  ;;  %v1363_v50 = vshll.u32 %v9908_v4, 16  ;;  %7764 = vmatpush3.bf16.msra.mxu0 %v8391_v46  ;;  %v1340_v25 = vrot.slane %v1338_v11, 7  ;;  %v790_v30 = vadd.f32 1.0, %v9786_v58  ;;  %v792_v19 = vadd.f32 1.0, %v9794_v1  ;;  %v1197_v18 = vld [vmem:[#allocation2 + $0xe8] sm:$0xf] }
 0x240   : > { %v1353_v23 = vrot.slane %v1351_v41, 7  ;;  %7566 = vmatpush3.bf16.msra.mxu1 %v8395_v42  ;;  %7765 = vmatprep.subr.bf16.mxu0 %v8396_v8  ;;  %v1334_v62 = vor.u32 %v1332_v7, %v1331_v28  ;;  %v1336_v59 = vrot.slane %v1331_v28, 4  ;;  %v1362_v6 = vrot.slane %v1360_v21, 7  ;;  %v9937_v21 = vld [vmem:[#allocation8 + $0x180] sm:$0xff]  }
 0x241   : > { %v11256_v12 = vshrl.u32 %v9739_v35, 16  ;;  %7567 = vmatprep.subr.bf16.mxu1 %v8399_v15  ;;  %v1343_v46 = vor.u32 %v1341_v63, %v1340_v25  ;;  %8604 = vrcp.f32 %v790_v30  ;;  %v3148_v58 = vshrl.u32 %v9838_v27, 16  ;;  %v1200_v25 = vld [vmem:[#allocation2 + $0xfc] sm:$0xf] }
 0x242   : > { %v1356_v11 = vor.u32 %v1354_v48, %v1353_v23  ;;  %v1358_v41 = vrot.slane %v1353_v23, 4  ;;  %v1335_v1 = vsel %vm9347_vm3, %v9614_v3, %v1334_v62  ;;  %v1365_v42 = vor.u32 %v1363_v50, %v1362_v6  ;;  %v8403_v48 = vld [vmem:[#allocation8 + $0x68] sm:$0xff]   ;;  %v1199_v50 = vld [vmem:[#allocation2 + $0xf8] sm:$0xf] }
 0x243   : > { %v9924_v32 = vrot.slane %v11256_v12, 7  ;;  %8606 = vrcp.f32 %v792_v19  ;;  %7766 = vmatpush3.bf16.msra.mxu0 %v8396_v8  ;;  %v9930_v7 = vrot.slane %v3139_v40, 7  ;;  %v1344_v12 = vsel %vm9347_vm3, %v1336_v59, %v1343_v46 }
 0x244   : > { %v1357_v63 = vsel %vm9347_vm3, %v9619_v16, %v1356_v11  ;;  %v1470_v28 = vshrl.u32 %v1197_v18, 16  ;;  %7568 = vmatpush3.bf16.msra.mxu1 %v8399_v15  ;;  %7767 = vmatprep.subr.bf16.mxu0 %v8401_v26  ;;  %v3161_v3 = vshrl.u32 %v9878_v37, 16  ;;  %v3170_v62 = vshrl.u32 %v9883_v38, 16  ;;  %v9943_v30 = vld [vmem:[#allocation2 + $0x94] sm:$0xf]  ;;  %v8406_v37 = vld [vmem:[#allocation8 + $0x78] sm:$0xff]  }
 0x245   : > { %11257 = vst [vmem:[#allocation16_spill] sm:$0xff] %v9930_v7  ;;  %v6863_v8 = vcombine.low %v1335_v1, %v1344_v12  ;;  %v1366_v40 = vsel %vm9347_vm3, %v1358_v41, %v1365_v42  ;;  %7569 = vmatprep.subr.bf16.mxu1 %v8400_v45  ;;  %v11258_v16 = vshll.u32 %v9739_v35, 16  ;;  %v1473_v59 = vshll.u32 %v1197_v18, 16  ;;  %v9953_v42 = vld [vmem:[#allocation2 + $0x94] sm:$0xf] }
 0x246   : > { %v6864_v23 = vcombine.low %v1357_v63, %v1366_v40  ;;  %v1472_v19 = vrot.slane %v1470_v28, 7  ;;  %v9948_v6 = vrot.slane %v3148_v58, 7  ;;  %v1373_v41 = vshrl.u32 %v9943_v30, 16  ;;  %11260 = vst [vmem:[#allocation56_spill] sm:$0xff] %v9953_v42 }
 0x247   : > { %v1466_v15 = vor.u32 %v11258_v16, %v9924_v32  ;;  %7538 = vmatmul.mubr.bf16.gmra.mrb[12].mxu1 %v6863_v8  ;;  %7768 = vmatpush3.bf16.msra.mxu0 %v8401_v26  ;;  %v8603_v1 = vpop.eup %8602  ;;  %v1468_v12 = vrot.slane %v9924_v32, 4  ;;  %v1483_v63 = vshrl.u32 %v1199_v50, 16  ;;  %v1492_v28 = vshrl.u32 %v1200_v25, 16  ;;  %v8404_v26 = vld [vmem:[#allocation8 + $0x70] sm:$0xff]  }
 0x248   : > { %11259 = vst [vmem:[#allocation55_spill] sm:$0xff] %v9948_v6  ;;  %7541 = vmatprep.mubr.bf16.mxu1 %v6864_v23  ;;  %v1475_v35 = vor.u32 %v1473_v59, %v1472_v19  ;;  %7570 = vmatpush3.bf16.msra.mxu1 %v8400_v45  ;;  %v9956_v18 = vrot.slane %v3161_v3, 7  ;;  %v9958_v58 = vrot.slane %v3170_v62, 7  ;;  %v885_v40 = vmul.f32 %v8603_v1, %v9567_v61  ;;  %v9968_v3 = vld [vmem:[#allocation2 + $0x148] sm:$0xf] }
 0x249   : > { %v9961_v8 = vrot.slane %v1373_v41, 7  ;;  %7571 = vmatprep.subr.bf16.mxu1 %v8403_v48  ;;  %7801 = vmatprep.subr.bf16.mxu0 %v9937_v21  ;;  %v1376_v23 = vshll.u32 %v9943_v30, 16  ;;  %v1467_v32 = vsel %vm9347_vm3, %v9771_v39, %v1466_v15  ;;  %v1485_v16 = vrot.slane %v1483_v63, 7  ;;  %v9971_v41 = vld [vmem:[#allocation2 + $0x14c] sm:$0xf] }
 0x24a   : > { %11261 = vst [vmem:[#allocation57_spill] sm:$0xff] %v9956_v18  ;;  %11262 = vst [vmem:[#allocation58_spill] sm:$0xff] %v9958_v58  ;;  %v1494_v45 = vrot.slane %v1492_v28, 7  ;;  %v7125_v62 = vpack.c.bf16 %v885_v40, %v885_v40  ;;  %v3183_v19 = vshrl.u32 %v9953_v42, 16  ;;  %v1486_v61 = vshll.u32 %v1199_v50, 16 }
 0x24b   : > { %v1495_v59 = vshll.u32 %v1200_v25, 16  ;;  %v8605_v1 = vpop.eup %8604  ;;  %v9974_v11 = vor.u32 %v1376_v23, %v9961_v8  ;;  %v1476_v46 = vsel %vm9347_vm3, %v1468_v12, %v1475_v35  ;;  %v11263_v39 = vshrl.u32 %v9652_v34, 16  ;;  %v1202_v34 = vld [vmem:[#allocation2 + $0x10c] sm:$0xf] }
 0x24c   : > { %v3337_v63 = vshrl.u32 %v9746_v14, 16  ;;  %7572 = vmatpush3.bf16.msra.mxu1 %v8403_v48  ;;  %1136 = vst [vmem:[#allocation2 + $0x98] sm:$0xf] %v7125_v62  ;;  %v886_v50 = vmul.f32 %v8605_v1, %v9584_v17  ;;  %v1488_v25 = vor.u32 %v1486_v61, %v1485_v16  ;;  %v1490_v40 = vrot.slane %v1485_v16, 4  ;;  %v10019_v62 = vld [vmem:[#allocation2 + $0x124] sm:$0xf] }
 0x24d   : > { %v6854_v15 = vrot.slane %v11263_v39, 11  ;;  %v8607_v28 = vpop.eup %8606  ;;  %v1497_v58 = vor.u32 %v1495_v59, %v1494_v45  ;;  %7573 = vmatprep.subr.bf16.mxu1 %v8404_v26  ;;  %v3346_v12 = vshrl.u32 %v9748_v44, 16  ;;  %v9987_v48 = vrot.slane %v3183_v19, 7  ;;  %v9992_v45 = vld [vmem:[#allocation2 + $0x110] sm:$0xf] }
 0x24e   : > { %v888_v18 = vmul.f32 %v8607_v28, %v9592_v56  ;;  %v7163_v17 = vpack.c.bf16 %v9669_v10, %v886_v50  ;;  %11265 = vst [vmem:[#allocation60_spill] sm:$0xff] %v9992_v45  ;;  %v9994_v59 = vcombine.low %v1467_v32, %v1476_v46  ;;  %v9996_v56 = vrot.slane %v3337_v63, 7  ;;  %v1204_v46 = vld [vmem:[#allocation2 + $0x11c] sm:$0x8]  ;;  %v10007_v32 = vld [vmem:[#allocation8 + $0x80] sm:$0xff]  }
 0x24f   : > { %11264 = vst [vmem:[#allocation59_spill] sm:$0xff] %v9987_v48  ;;  %v3359_v1 = vshrl.u32 %v9750_v53, 16  ;;  %v1489_v10 = vsel %vm9347_vm3, %v6854_v15, %v1488_v25  ;;  %v1498_v39 = vsel %vm9347_vm3, %v1490_v40, %v1497_v58  ;;  %v10010_v63 = vrot.slane %v3346_v12, 7 }
 0x250   : > { %v7128_v61 = vpack.c.bf16 %v888_v18, %v888_v18  ;;  %11266 = vst [vmem:[#allocation61_spill] sm:$0xff] %v9996_v56  ;;  %7574 = vmatpush3.bf16.msra.mxu1 %v8404_v26  ;;  %7188 = vst [vmem:[#allocation2 + $0xa8] sm:$0xff] %v7163_v17   ;;  %v1505_v18 = vshrl.u32 %v1202_v34, 16  ;;  %v1514_v50 = vshrl.u32 %v9992_v45, 16  ;;  %v10014_v17 = vld [vmem:[#allocation2 + $0x120] sm:$0xf]  ;;  %v10025_v12 = vcombine.low %v1489_v10, %v1498_v39 }
 0x251   : > { %7575 = vmatprep.subr.bf16.mxu1 %v8406_v37  ;;  %11267 = vst [vmem:[#allocation62_spill] sm:$0xff] %v10010_v63  ;;  %11268 = vst [vmem:[#allocation63_spill] sm:$0xff] %v10014_v17  ;;  %v3368_v58 = vshrl.u32 %v9752_v13, 16  ;;  %v10027_v28 = vrot.slane %v3359_v1, 7  ;;  %v11271_v25 = vshrl.u32 %v9654_v9, 16  ;;  %v1522_v16 = vshrl.u32 %v1204_v46, 16 }
 0x252   : > { %1139 = vst [vmem:[#allocation2 + $0xbc] sm:$0xf] %v7128_v61  ;;  %v1507_v40 = vrot.slane %v1505_v18, 7  ;;  %v1516_v23 = vrot.slane %v1514_v50, 7  ;;  %v1508_v10 = vshll.u32 %v1202_v34, 16  ;;  %v1527_v39 = vshrl.u32 %v10014_v17, 16 }
 0x253   : > { %v10021_v61 = vld [vmem:[#allocation2 + $0x98] sm:$0xf]  ;;  %11270 = vst [vmem:[#allocation65_spill] sm:$0xff] %v10027_v28  ;;  %v10036_v19 = vrot.slane %v11271_v25, 11  ;;  %v10042_v15 = vrot.slane %v3368_v58, 7  ;;  %v1536_v63 = vshrl.u32 %v10019_v62, 16  ;;  %v11275_v6 = vsel %vm9347_vm3, %v9643_v57, %v9974_v11 }
 0x254   : > { %11269 = vst [vmem:[#allocation64_spill] sm:$0xff] %v10021_v61  ;;  %v10023_v26 = vld [vmem:[#allocation2 + $0x98] sm:$0xf]  ;;  %7576 = vmatpush3.bf16.msra.mxu1 %v8406_v37  ;;  %v6976_v35 = vcombine.low %v9953_v42, %v10021_v61  ;;  %v3192_v1 = vshrl.u32 %v10021_v61, 16  ;;  %v1517_v37 = vshll.u32 %v9992_v45, 16  ;;  %v1512_v28 = vrot.slane %v1507_v40, 4 }
 0x255   : > { %v1382_v18 = vshrl.u32 %v10023_v26, 16  ;;  %7609 = vmatprep.subr.bf16.mxu1 %v10007_v32  ;;  %11272 = vst [vmem:[#allocation66_spill] sm:$0xff] %v10042_v15  ;;  %v10051_v56 = vor.u32 %v1508_v10, %v1507_v40  ;;  %v1385_v15 = vshll.u32 %v10023_v26, 16  ;;  %v6856_v48 = vrot.slane %v1522_v16, 11  ;;  %v10072_v58 = vld [vmem:[#allocation2 + $0xc] sm:$0xf] }
 0x256   : > { %7733 = vmatprep.mubr.bf16.mxu0 %v6976_v35  ;;  %v1519_v34 = vor.u32 %v1517_v37, %v1516_v23  ;;  %v1530_v38 = vshll.u32 %v10014_v17, 16  ;;  %v10062_v27 = vrot.slane %v3192_v1, 7  ;;  %v1529_v37 = vrot.slane %v1527_v39, 7  ;;  %v10070_v35 = vld [vmem:[#allocation2 + $0x8] sm:$0xf] }
 0x257   : > { %v1384_v50 = vrot.slane %v1382_v18, 7  ;;  %v10045_v9 = vld [vmem:[#allocation2 + $0xa8] sm:$0xf]  ;;  %v10047_v25 = vld [vmem:[#allocation2 + $0xac] sm:$0xf]  ;;  %v1511_v39 = vsel %vm9347_vm3, %v10036_v19, %v10051_v56  ;;  %v1539_v52 = vshll.u32 %v10019_v62, 16 }
 0x258   : > { %v10049_v46 = vld [vmem:[#allocation2 + $0xa8] sm:$0xf]  ;;  %11273 = vst [vmem:[#allocation67_spill] sm:$0xff] %v10062_v27  ;;  %v6977_v23 = vcombine.low %v10045_v9, %v10047_v25  ;;  %v10066_v40 = vld [vmem:[#allocation2 + $0xac] sm:$0xf]  ;;  %v1538_v27 = vrot.slane %v1536_v63, 7  ;;  %v1520_v42 = vsel %vm9347_vm3, %v1512_v28, %v1519_v34  ;;  %v1532_v34 = vor.u32 %v1530_v38, %v1529_v37 }
 0x259   : > { %v10058_v18 = vld [vmem:[#allocation2 + $0xbc] sm:$0xf]  ;;  %v1387_v1 = vor.u32 %v1385_v15, %v1384_v50  ;;  %v1395_v61 = vshrl.u32 %v10049_v46, 16  ;;  %v1404_v7 = vshrl.u32 %v10066_v40, 16  ;;  %v1398_v50 = vshll.u32 %v10049_v46, 16 }
 0x25a   : > { %v10068_v10 = vld [vmem:[#allocation2 + $0xbc] sm:$0xf]  ;;  %v6978_v16 = vcombine.low %v10058_v18, %v9638_v54  ;;  %7734 = vmatmul.mubr.bf16.gmra.mrb[12].mxu0 %v6977_v23  ;;  %v11274_v54 = vrot.slane %v9961_v8, 4  ;;  %v1407_v28 = vshll.u32 %v10066_v40, 16  ;;  %v1534_v45 = vrot.slane %v1529_v37, 4 }
 0x25b   : > { %v1397_v63 = vrot.slane %v1395_v61, 7  ;;  %v1417_v23 = vshrl.u32 %v10068_v10, 16  ;;  %v1406_v19 = vrot.slane %v1404_v7, 7  ;;  %v4073_v37 = vld [vmem:[#allocation2 + $0x1c] sm:$0xf] }
 0x25c   : > { %7737 = vmatprep.mubr.bf16.mxu0 %v6978_v16  ;;  %v1388_v15 = vsel %vm9347_vm3, %v11274_v54, %v1387_v1  ;;  %v1420_v54 = vshll.u32 %v10068_v10, 16 }
 0x25d   : > { %v6865_v56 = vcombine.low %v11275_v6, %v1388_v15  ;;  %v1400_v16 = vor.u32 %v1398_v50, %v1397_v63  ;;  %v1402_v8 = vrot.slane %v1397_v63, 4  ;;  %v1419_v17 = vrot.slane %v1417_v23, 7  ;;  %v4075_v50 = vld [vmem:[#allocation2 + $0x24] sm:$0x1]  ;;  %v11281_v6 = vld [vmem:[#allocation30_spill] sm:$0xff] }
 0x25e   : > { %v1409_v1 = vor.u32 %v1407_v28, %v1406_v19  ;;  %v1533_v15 = vsel %vm9347_vm3, %v6856_v48, %v1532_v34  ;;  %v1541_v63 = vor.u32 %v1539_v52, %v1538_v27  ;;  %v4074_v19 = vld [vmem:[#allocation2 + $0x20] sm:$0xf]  ;;  %v1207_v28 = vld [vmem:[#allocation2 + $0x130] sm:$0x8]  ;;  %v10121_v52 = vcombine.low %v1511_v39, %v1520_v42  ;;  %v10125_v34 = vld [vmem:[#allocation2 + $0x134] sm:$0xf] }
 0x25f   : > { %7542 = vmatmul.mubr.bf16.gmra.mrb[16].mxu1 %v6865_v56  ;;  %v1401_v57 = vsel %vm9347_vm3, %v9645_v43, %v1400_v16  ;;  %v1422_v7 = vor.u32 %v1420_v54, %v1419_v17  ;;  %v1424_v38 = vrot.slane %v1419_v17, 4  ;;  %v11276_v16 = vcombine.low %v9647_v24, %v9657_v0  ;;  %v11283_v0 = vld [vmem:[#allocation31_spill] sm:$0xff]  ;;  %v11284_v24 = vld [vmem:[#allocation32_spill] sm:$0xff] }
 0x260   : > { %v1410_v11 = vsel %vm9347_vm3, %v1402_v8, %v1409_v1  ;;  %v1542_v48 = vsel %vm9347_vm3, %v1534_v45, %v1541_v63  ;;  %v4122_v8 = vshrl.u32 %v4073_v37, 16  ;;  %v4125_v54 = vshll.u32 %v4073_v37, 16  ;;  %v10132_v1 = vld [vmem:[#allocation2 + $0x138] sm:$0xf]  ;;  %v4076_v45 = vld [vmem:[#allocation2 + $0x30] sm:$0xf] }
 0x261   : > { %v6866_v56 = vcombine.low %v1401_v57, %v1410_v11  ;;  %v1423_v43 = vsel %vm9347_vm3, %v9650_v55, %v1422_v7  ;;  %v1432_v17 = vsel %vm9347_vm3, %v1424_v38, %v9725_v33  ;;  %v11277_v55 = vcombine.low %v9673_v22, %v9683_v60 }
 0x262   : > { %7738 = vmatmul.mubr.bf16.gmra.mrb[16].mxu0 %v11276_v16  ;;  %v6867_v27 = vcombine.low %v1423_v43, %v1432_v17  ;;  %v10130_v33 = vcombine.low %v1533_v15, %v1542_v48  ;;  %v4131_v42 = vshll.u32 %v4074_v19, 16  ;;  %v4135_v39 = vshrl.u32 %v4074_v19, 16  ;;  %v4077_v43 = vld [vmem:[#allocation2 + $0x34] sm:$0xf] }
 0x263   : > { %7545 = vmatprep.mubr.bf16.mxu1 %v6866_v56  ;;  %7741 = vmatprep.mubr.bf16.mxu0 %v11277_v55  ;;  %v4141_v57 = vshll.u32 %v4075_v50, 16  ;;  %v1544_v7 = vshrl.u32 %v1207_v28, 16  ;;  %v4124_v38 = vrot.slane %v4122_v8, 4  ;;  %v4127_v11 = vrot.slane %v4125_v54, 5 }
 0x264   : > { %v1549_v63 = vshrl.u32 %v10125_v34, 16  ;;  %v1552_v56 = vshll.u32 %v10125_v34, 16  ;;  %v4133_v15 = vrot.slane %v4131_v42, 5  ;;  %v4137_v17 = vrot.slane %v4135_v39, 4 }
 0x265   : > { %v4143_v16 = vrot.slane %v4141_v57, 5  ;;  %v6857_v48 = vrot.slane %v1544_v7, 11  ;;  %v4128_v37 = vor.u32 %v4127_v11, %v4124_v38  ;;  %v1558_v50 = vshrl.u32 %v10132_v1, 16  ;;  %v4079_v11 = vld [vmem:[#allocation2 + $0x44] sm:$0xf] }
 0x266   : > { %v1551_v55 = vrot.slane %v1549_v63, 7  ;;  %v1561_v19 = vshll.u32 %v10132_v1, 16  ;;  %v4138_v8 = vor.u32 %v4137_v17, %v4133_v15  ;;  %v4146_v54 = vshrl.u32 %v4076_v45, 16  ;;  %v11280_v63 = vld [vmem:[#allocation28_spill] sm:$0xff] }
 0x267   : > { %7546 = vmatmul.mubr.bf16.gmra.mrb[20].mxu1 %v6867_v27  ;;  %v4078_v27 = vld [vmem:[#allocation2 + $0x38] sm:$0x1]  ;;  %v4149_v42 = vshll.u32 %v4076_v45, 16  ;;  %v4155_v39 = vshll.u32 %v4077_v43, 16  ;;  %v4129_v57 = vrot.slane %v4128_v37, 4  ;;  %v1560_v38 = vrot.slane %v1558_v50, 7 }
 0x268   : > { %7549 = vmatprep.mubr.bf16.mxu1 %v9729_v49  ;;  %v1554_v7 = vor.u32 %v1552_v56, %v1551_v55  ;;  %v1556_v49 = vrot.slane %v1551_v55, 4  ;;  %v11282_v61 = vcombine.low %v11280_v63, %v11281_v6  ;;  %v4139_v23 = vrot.slane %v4138_v8, 4 }
 0x269   : > { %v4148_v20 = vrot.slane %v4146_v54, 4  ;;  %v4151_v60 = vrot.slane %v4149_v42, 5  ;;  %v4157_v22 = vrot.slane %v4155_v39, 5  ;;  %v11285_v17 = vcombine.low %v11283_v0, %v11284_v24  ;;  %v4080_v54 = vld [vmem:[#allocation2 + $0x48] sm:$0xf] }
 0x26a   : > { %7742 = vmatmul.mubr.bf16.gmra.mrb[20].mxu0 %v11282_v61  ;;  %v4134_v45 = vsel %vm10141_vm6, %v4129_v57, %v4133_v15  ;;  %v1555_v56 = vsel %vm9347_vm3, %v6857_v48, %v1554_v7  ;;  %v1563_v37 = vor.u32 %v1561_v19, %v1560_v38  ;;  %v4159_v55 = vshrl.u32 %v4077_v43, 16  ;;  %v4081_v0 = vld [vmem:[#allocation2 + $0x4c] sm:$0x1]  ;;  %v4082_v57 = vld [vmem:[#allocation2 + $0x58] sm:$0xf] }
 0x26b   : > { %7745 = vmatprep.mubr.bf16.mxu0 %v11285_v17  ;;  %v4144_v50 = vsel %vm10141_vm6, %v4139_v23, %v4143_v16  ;;  %v4152_v61 = vor.u32 %v4151_v60, %v4148_v20  ;;  %v4165_v8 = vshll.u32 %v4078_v27, 16  ;;  %v4170_v42 = vshrl.u32 %v4079_v11, 16  ;;  %v4083_v7 = vld [vmem:[#allocation2 + $0x5c] sm:$0xf] }
 0x26c   : > { %v10157_v39 = vcombine.low %v4134_v45, %v4144_v50  ;;  %v1564_v17 = vsel %vm9347_vm3, %v1556_v49, %v1563_v37  ;;  %v4161_v24 = vrot.slane %v4159_v55, 4  ;;  %v4173_v15 = vshll.u32 %v4079_v11, 16  ;;  %v4084_v50 = vld [vmem:[#allocation2 + $0x60] sm:$0x1] }
 0x26d   : > { %v10162_v48 = vcombine.low %v1555_v56, %v1564_v17  ;;  %v4153_v43 = vrot.slane %v4152_v61, 4  ;;  %v4167_v19 = vrot.slane %v4165_v8, 5  ;;  %v4172_v23 = vrot.slane %v4170_v42, 4  ;;  %v4085_v42 = vld [vmem:[#allocation2 + $0x6c] sm:$0xf] }
 0x26e   : > { %v4162_v60 = vor.u32 %v4161_v24, %v4157_v22  ;;  %v4175_v20 = vrot.slane %v4173_v15, 5  ;;  %v4179_v16 = vshll.u32 %v4080_v54, 16  ;;  %v4183_v27 = vshrl.u32 %v4080_v54, 16 }
 0x26f   : > { %7550 = vmatmul.mubr.bf16.gmra.mrb[24].mxu1 %v9994_v59  ;;  %v4158_v49 = vsel %vm10141_vm6, %v4153_v43, %v4157_v22  ;;  %v4189_v38 = vshll.u32 %v4081_v0, 16  ;;  %v4194_v11 = vshrl.u32 %v4082_v57, 16  ;;  %v4197_v45 = vshll.u32 %v4082_v57, 16  ;;  %v4086_v43 = vld [vmem:[#allocation2 + $0x70] sm:$0xf] }
 0x270   : > { %7553 = vmatprep.mubr.bf16.mxu1 %v10025_v12  ;;  %v4163_v37 = vrot.slane %v4162_v60, 4  ;;  %v4176_v59 = vor.u32 %v4175_v20, %v4172_v23  ;;  %v4181_v56 = vrot.slane %v4179_v16, 5  ;;  %v4185_v55 = vrot.slane %v4183_v27, 4 }
 0x271   : > { %v11286_v61 = vcombine.low %v9746_v14, %v9748_v44  ;;  %v4191_v24 = vrot.slane %v4189_v38, 5  ;;  %v4196_v12 = vrot.slane %v4194_v11, 4  ;;  %v4199_v8 = vrot.slane %v4197_v45, 5 }
 0x272   : > { %v4203_v54 = vshll.u32 %v4083_v7, 16  ;;  %v11287_v22 = vcombine.low %v9750_v53, %v9752_v13  ;;  %v4168_v0 = vsel %vm10141_vm6, %v4163_v37, %v4167_v19  ;;  %v4177_v17 = vrot.slane %v4176_v59, 4  ;;  %v4087_v19 = vld [vmem:[#allocation2 + $0x74] sm:$0x1] }
 0x273   : > { %7746 = vmatmul.mubr.bf16.gmra.mrb[24].mxu0 %v11286_v61  ;;  %v4186_v15 = vor.u32 %v4185_v55, %v4181_v56  ;;  %v4207_v57 = vshrl.u32 %v4083_v7, 16  ;;  %v10175_v23 = vcombine.low %v4158_v49, %v4168_v0  ;;  %v4200_v60 = vor.u32 %v4199_v8, %v4196_v12  ;;  %v4088_v12 = vld [vmem:[#allocation2 + $0x80] sm:$0xf] }
 0x274   : > { %7749 = vmatprep.mubr.bf16.mxu0 %v11287_v22  ;;  %v4205_v20 = vrot.slane %v4203_v54, 5  ;;  %v4213_v16 = vshll.u32 %v4084_v50, 16  ;;  %v4182_v27 = vsel %vm10141_vm6, %v4177_v17, %v4181_v56  ;;  %v4218_v45 = vshrl.u32 %v4085_v42, 16  ;;  %v4089_v56 = vld [vmem:[#allocation2 + $0x84] sm:$0xf] }
 0x275   : > { %v4187_v38 = vrot.slane %v4186_v15, 4  ;;  %v4209_v11 = vrot.slane %v4207_v57, 4  ;;  %v4201_v61 = vrot.slane %v4200_v60, 4  ;;  %v4221_v37 = vshll.u32 %v4085_v42, 16  ;;  %v11288_v57 = vld [vmem:[#allocation49_spill] sm:$0xff]  ;;  %v11289_v60 = vld [vmem:[#allocation14_spill] sm:$0xff] }
 0x276   : > { %v4215_v22 = vrot.slane %v4213_v16, 5  ;;  %v4227_v59 = vshll.u32 %v4086_v43, 16  ;;  %v4220_v55 = vrot.slane %v4218_v45, 4  ;;  %v4231_v50 = vshrl.u32 %v4086_v43, 16  ;;  %v4090_v43 = vld [vmem:[#allocation2 + $0x88] sm:$0x1] }
 0x277   : > { %7554 = vmatmul.mubr.bf16.gmra.mrb[28].mxu1 %v10121_v52  ;;  %v4192_v7 = vsel %vm10141_vm6, %v4187_v38, %v4191_v24  ;;  %v4210_v49 = vor.u32 %v4209_v11, %v4205_v20  ;;  %v4206_v54 = vsel %vm10141_vm6, %v4201_v61, %v4205_v20  ;;  %v4223_v52 = vrot.slane %v4221_v37, 5  ;;  %v4091_v37 = vld [vmem:[#allocation2 + $0x94] sm:$0xf] }
 0x278   : > { %7557 = vmatprep.mubr.bf16.mxu1 %v10130_v33  ;;  %v6996_v8 = vcombine.low %v4182_v27, %v4192_v7  ;;  %v4229_v0 = vrot.slane %v4227_v59, 5  ;;  %v4233_v15 = vrot.slane %v4231_v50, 4  ;;  %v4237_v42 = vshll.u32 %v4087_v19, 16 }
 0x279   : > { %v4211_v17 = vrot.slane %v4210_v49, 4  ;;  %v6886_v33 = vcombine.low %v11289_v60, %v11288_v57  ;;  %v11290_v24 = vcombine.low %v9968_v3, %v9971_v41  ;;  %v4224_v16 = vor.u32 %v4223_v52, %v4220_v55  ;;  %v4092_v41 = vld [vmem:[#allocation2 + $0x98] sm:$0xf] }
 0x27a   : > { %v4242_v38 = vshrl.u32 %v4088_v12, 16  ;;  %v4245_v11 = vshll.u32 %v4088_v12, 16  ;;  %v4251_v27 = vshll.u32 %v4089_v56, 16  ;;  %v4234_v45 = vor.u32 %v4233_v15, %v4229_v0 }
 0x27b   : > { %7750 = vmatmul.mubr.bf16.gmra.mrb[28].mxu0 %v11290_v24  ;;  %v4216_v20 = vsel %vm10141_vm6, %v4211_v17, %v4215_v22  ;;  %v4239_v61 = vrot.slane %v4237_v42, 5  ;;  %v4255_v19 = vshrl.u32 %v4089_v56, 16  ;;  %v4225_v7 = vrot.slane %v4224_v16, 4  ;;  %v4093_v17 = vld [vmem:[#allocation2 + $0x9c] sm:$0x1] }
 0x27c   : > { %7769 = vmatprep.mubr.bf16.mxu0 %v10157_v39  ;;  %v10193_v59 = vcombine.low %v4206_v54, %v4216_v20  ;;  %v4244_v49 = vrot.slane %v4242_v38, 4  ;;  %v4247_v3 = vrot.slane %v4245_v11, 5  ;;  %v4235_v55 = vrot.slane %v4234_v45, 4  ;;  %v4094_v20 = vld [vmem:[#allocation2 + $0xa8] sm:$0xf] }
 0x27d   : > { %v4253_v50 = vrot.slane %v4251_v27, 5  ;;  %v4257_v52 = vrot.slane %v4255_v19, 4  ;;  %v4261_v12 = vshll.u32 %v4090_v43, 16  ;;  %v4230_v39 = vsel %vm10141_vm6, %v4225_v7, %v4229_v0  ;;  %v8410_v43 = vld [vmem:[#allocation8 + $0x188] sm:$0xff]  }
 0x27e   : > { %v4248_v22 = vor.u32 %v4247_v3, %v4244_v49  ;;  %v4266_v15 = vshrl.u32 %v4091_v37, 16  ;;  %v4269_v56 = vshll.u32 %v4091_v37, 16  ;;  %v11291_v54 = vcombine.low %v10070_v35, %v10072_v58  ;;  %v4095_v49 = vld [vmem:[#allocation2 + $0xac] sm:$0xf]  ;;  %v11292_v3 = vld [vmem:[#allocation15_spill] sm:$0xff] }
 0x27f   : > { %7558 = vmatmul.mubr.bf16.gmra.mrb[32].mxu1 %v10162_v48  ;;  %v4240_v42 = vsel %vm10141_vm6, %v4235_v55, %v4239_v61  ;;  %v4258_v24 = vor.u32 %v4257_v52, %v4253_v50  ;;  %v4263_v16 = vrot.slane %v4261_v12, 5  ;;  %v4275_v38 = vshll.u32 %v4092_v41, 16  ;;  %v4096_v52 = vld [vmem:[#allocation2 + $0xb0] sm:$0x1] }
 0x280   : > { %7577 = vmatprep.mubr.bf16.mxu1 %v11291_v54  ;;  %v10203_v11 = vcombine.low %v4230_v39, %v4240_v42  ;;  %v4249_v48 = vrot.slane %v4248_v22, 4  ;;  %v4268_v27 = vrot.slane %v4266_v15, 4  ;;  %v4271_v0 = vrot.slane %v4269_v56, 5  ;;  %v4097_v22 = vld [vmem:[#allocation2 + $0xbc] sm:$0xf] }
 0x281   : > { %v4259_v45 = vrot.slane %v4258_v24, 4  ;;  %v4277_v19 = vrot.slane %v4275_v38, 5  ;;  %v4279_v37 = vshrl.u32 %v4092_v41, 16  ;;  %v4285_v7 = vshll.u32 %v4093_v17, 16 }
 0x282   : > { %v4254_v35 = vsel %vm10141_vm6, %v4249_v48, %v4253_v50  ;;  %v4272_v58 = vor.u32 %v4271_v0, %v4268_v27  ;;  %v6887_v61 = vcombine.low %v9888_v5, %v9898_v47  ;;  %v6888_v55 = vcombine.low %v11292_v3, %v9908_v4  ;;  %v8413_v50 = vld [vmem:[#allocation8 + $0x190] sm:$0xff]   ;;  %v4111_v4 = vld [vmem:[#allocation2 + $0x114] sm:$0x1] }
 0x283   : > { %7770 = vmatmul.mubr.bf16.vlgmr.msra.gmra.mrb[0].mxu0 %v10175_v23  ;;  %v4264_v41 = vsel %vm10141_vm6, %v4259_v45, %v4263_v16  ;;  %v4281_v12 = vrot.slane %v4279_v37, 4  ;;  %v4287_v39 = vrot.slane %v4285_v7, 5  ;;  %v4290_v23 = vshrl.u32 %v4094_v20, 16  ;;  %v4099_v37 = vld [vmem:[#allocation2 + $0xc4] sm:$0x1] }
 0x284   : > { %7802 = vmatpush3.bf16.msra.mxu0 %v9937_v21  ;;  %7773 = vmatprep.mubr.bf16.mxu0 %v6996_v8  ;;  %v10215_v17 = vcombine.low %v4254_v35, %v4264_v41  ;;  %v4273_v15 = vrot.slane %v4272_v58, 4  ;;  %v4293_v56 = vshll.u32 %v4094_v20, 16  ;;  %v4299_v54 = vshll.u32 %v4095_v49, 16  ;;  %v4098_v21 = vld [vmem:[#allocation2 + $0xc0] sm:$0xf]  ;;  %v8424_v8 = vld [vmem:[#allocation8 + $0x88] sm:$0xff]  }
 0x285   : > { %7803 = vmatprep.subr.bf16.mxu0 %v8410_v43  ;;  %v4282_v42 = vor.u32 %v4281_v12, %v4277_v19  ;;  %v4292_v24 = vrot.slane %v4290_v23, 4  ;;  %v4303_v38 = vshrl.u32 %v4095_v49, 16  ;;  %v4309_v48 = vshll.u32 %v4096_v52, 16  ;;  %v8416_v41 = vld [vmem:[#allocation8 + $0x198] sm:$0xff]  }
 0x286   : > { %v11293_v16 = vcombine.low %v9754_v31, %v9788_v36  ;;  %v4278_v27 = vsel %vm10141_vm6, %v4273_v15, %v4277_v19  ;;  %v4295_v0 = vrot.slane %v4293_v56, 5  ;;  %v4301_v45 = vrot.slane %v4299_v54, 5 }
 0x287   : > { %v4314_v7 = vshrl.u32 %v4097_v22, 16  ;;  %v11294_v20 = vcombine.low %v9800_v51, %v9802_v29  ;;  %v4283_v49 = vrot.slane %v4282_v42, 4  ;;  %v4305_v35 = vrot.slane %v4303_v38, 4  ;;  %v4100_v29 = vld [vmem:[#allocation2 + $0xd0] sm:$0xf] }
 0x288   : > { %7578 = vmatmul.mubr.bf16.vlgmr.msra.gmra.mrb[4].mxu1 %v11293_v16  ;;  %7804 = vmatpush3.bf16.msra.mxu0 %v8410_v43  ;;  %v4311_v58 = vrot.slane %v4309_v48, 5  ;;  %v4317_v52 = vshll.u32 %v4097_v22, 16  ;;  %v4296_v31 = vor.u32 %v4295_v0, %v4292_v24  ;;  %v4323_v12 = vshll.u32 %v4098_v21, 16  ;;  %v8426_v43 = vld [vmem:[#allocation8 + $0x90] sm:$0xff]   ;;  %v4101_v38 = vld [vmem:[#allocation2 + $0xd4] sm:$0xf] }
 0x289   : > { %7581 = vmatprep.mubr.bf16.mxu1 %v11294_v20  ;;  %7805 = vmatprep.subr.bf16.mxu0 %v8413_v50  ;;  %v4316_v36 = vrot.slane %v4314_v7, 4  ;;  %v4327_v23 = vshrl.u32 %v4098_v21, 16  ;;  %v4288_v19 = vsel %vm10141_vm6, %v4283_v49, %v4287_v39  ;;  %v4306_v15 = vor.u32 %v4305_v35, %v4301_v45  ;;  %v4103_v35 = vld [vmem:[#allocation2 + $0xe4] sm:$0xf] }
 0x28a   : > { %7610 = vmatpush3.bf16.msra.mxu1 %v10007_v32  ;;  %v4319_v56 = vrot.slane %v4317_v52, 5  ;;  %v4333_v51 = vshll.u32 %v4099_v37, 16  ;;  %v7000_v22 = vcombine.low %v4278_v27, %v4288_v19  ;;  %v4297_v54 = vrot.slane %v4296_v31, 4  ;;  %v8419_v27 = vld [vmem:[#allocation8 + $0x1a0] sm:$0xff]   ;;  %v4102_v37 = vld [vmem:[#allocation2 + $0xd8] sm:$0x1] }
 0x28b   : > { %7611 = vmatprep.subr.bf16.mxu1 %v8424_v8  ;;  %7774 = vmatmul.mubr.bf16.gmra.mrb[4].mxu0 %v10193_v59  ;;  %v4325_v42 = vrot.slane %v4323_v12, 5  ;;  %v4329_v24 = vrot.slane %v4327_v23, 4  ;;  %v4307_v32 = vrot.slane %v4306_v15, 4  ;;  %v6889_v39 = vcombine.low %v9943_v30, %v10023_v26  ;;  %v8429_v52 = vld [vmem:[#allocation8 + $0x98] sm:$0xff]   ;;  %v11295_v31 = vld [vmem:[#allocation46_spill] sm:$0xff] }
 0x28c   : > { %7777 = vmatprep.mubr.bf16.mxu0 %v10203_v11  ;;  %7806 = vmatpush3.bf16.msra.mxu0 %v8413_v50  ;;  %v4320_v48 = vor.u32 %v4319_v56, %v4316_v36  ;;  %v4335_v21 = vrot.slane %v4333_v51, 5  ;;  %v4302_v16 = vsel %vm10141_vm6, %v4297_v54, %v4301_v45  ;;  %v6890_v59 = vcombine.low %v10049_v46, %v10066_v40  ;;  %v11296_v36 = vld [vmem:[#allocation47_spill] sm:$0xff]  ;;  %v4104_v56 = vld [vmem:[#allocation2 + $0xe8] sm:$0xf] }
 0x28d   : > { %7807 = vmatprep.subr.bf16.mxu0 %v8416_v41  ;;  %v4330_v0 = vor.u32 %v4329_v24, %v4325_v42  ;;  %v4338_v7 = vshrl.u32 %v4100_v29, 16  ;;  %v4312_v11 = vsel %vm10141_vm6, %v4307_v32, %v4311_v58  ;;  %v4341_v20 = vshll.u32 %v4100_v29, 16  ;;  %v4105_v32 = vld [vmem:[#allocation2 + $0xec] sm:$0x1] }
 0x28e   : > { %7612 = vmatpush3.bf16.msra.mxu1 %v8424_v8  ;;  %v4321_v50 = vrot.slane %v4320_v48, 4  ;;  %v4347_v49 = vshll.u32 %v4101_v38, 16  ;;  %v11297_v45 = vcombine.low %v11295_v31, %v11296_v36  ;;  %v10241_v12 = vcombine.low %v4302_v16, %v4312_v11  ;;  %v8423_v16 = vld [vmem:[#allocation8 + $0x1a8] sm:$0xff]   ;;  %v4106_v11 = vld [vmem:[#allocation2 + $0xf8] sm:$0xf] }
 0x28f   : > { %7613 = vmatprep.subr.bf16.mxu1 %v8426_v43  ;;  %v4331_v23 = vrot.slane %v4330_v0, 4  ;;  %v4340_v19 = vrot.slane %v4338_v7, 4  ;;  %v4351_v15 = vshrl.u32 %v4101_v38, 16  ;;  %v4343_v58 = vrot.slane %v4341_v20, 5  ;;  %v4107_v31 = vld [vmem:[#allocation2 + $0xfc] sm:$0xf] }
 0x290   : > { %7582 = vmatmul.mubr.bf16.gmra.mrb[8].mxu1 %v11297_v45  ;;  %7808 = vmatpush3.bf16.msra.mxu0 %v8416_v41  ;;  %v4326_v8 = vsel %vm10141_vm6, %v4321_v50, %v4325_v42  ;;  %v4349_v51 = vrot.slane %v4347_v49, 5  ;;  %v4357_v29 = vshll.u32 %v4102_v37, 16  ;;  %v4362_v48 = vshrl.u32 %v4103_v35, 16  ;;  %v8431_v41 = vld [vmem:[#allocation8 + $0xa0] sm:$0xff]  }
 0x291   : > { %7585 = vmatprep.mubr.bf16.mxu1 %v6886_v33  ;;  %v4336_v54 = vsel %vm10141_vm6, %v4331_v23, %v4335_v21  ;;  %7809 = vmatprep.subr.bf16.mxu0 %v8419_v27  ;;  %v4353_v24 = vrot.slane %v4351_v15, 4  ;;  %v4365_v38 = vshll.u32 %v4103_v35, 16  ;;  %v4344_v57 = vor.u32 %v4343_v58, %v4340_v19  ;;  %v10259_v19 = vld [vmem:[#allocation2 + $0xd4] sm:$0xf] }
 0x292   : > { %7614 = vmatpush3.bf16.msra.mxu1 %v8426_v43  ;;  %v10250_v0 = vcombine.low %v4326_v8, %v4336_v54  ;;  %v4359_v60 = vrot.slane %v4357_v29, 5  ;;  %v4371_v33 = vshll.u32 %v4104_v56, 16  ;;  %v4364_v37 = vrot.slane %v4362_v48, 4  ;;  %v10253_v43 = vld [vmem:[#allocation2 + $0xc0] sm:$0xf]  ;;  %v8434_v54 = vld [vmem:[#allocation8 + $0xa8] sm:$0xff]  }
 0x293   : > { %7615 = vmatprep.subr.bf16.mxu1 %v8429_v52  ;;  %7778 = vmatmul.mubr.bf16.gmra.mrb[8].mxu0 %v10215_v17  ;;  %v4354_v42 = vor.u32 %v4353_v24, %v4349_v51  ;;  %v4367_v7 = vrot.slane %v4365_v38, 5  ;;  %v4375_v21 = vshrl.u32 %v4104_v56, 16  ;;  %v4345_v50 = vrot.slane %v4344_v57, 4  ;;  %v10257_v17 = vld [vmem:[#allocation2 + $0xd0] sm:$0xf] }
 0x294   : > { %7781 = vmatprep.mubr.bf16.mxu0 %v7000_v22  ;;  %7810 = vmatpush3.bf16.msra.mxu0 %v8419_v27  ;;  %v4373_v20 = vrot.slane %v4371_v33, 5  ;;  %v4381_v49 = vshll.u32 %v4105_v32, 16  ;;  %v6891_v35 = vcombine.low %v10068_v10, %v10253_v43  ;;  %v6892_v22 = vcombine.low %v10257_v17, %v10259_v19  ;;  %v8428_v27 = vld [vmem:[#allocation8 + $0x1b0] sm:$0xff]   ;;  %v4108_v8 = vld [vmem:[#allocation2 + $0x100] sm:$0x1] }
 0x295   : > { %v4355_v36 = vrot.slane %v4354_v42, 4  ;;  %v4368_v45 = vor.u32 %v4367_v7, %v4364_v37  ;;  %v4377_v23 = vrot.slane %v4375_v21, 4  ;;  %7811 = vmatprep.subr.bf16.mxu0 %v8423_v16  ;;  %v4350_v15 = vsel %vm10141_vm6, %v4345_v50, %v4349_v51  ;;  %v4110_v37 = vld [vmem:[#allocation2 + $0x110] sm:$0xf]  ;;  %v8433_v7 = vld [vmem:[#allocation8 + $0x1b8] sm:$0xff]   ;;  %v8436_v50 = vld [vmem:[#allocation8 + $0xb0] sm:$0xff]  }
 0x296   : > { %7616 = vmatpush3.bf16.msra.mxu1 %v8429_v52  ;;  %v4383_v56 = vrot.slane %v4381_v49, 5  ;;  %v4386_v58 = vshrl.u32 %v4106_v11, 16  ;;  %v4389_v29 = vshll.u32 %v4106_v11, 16  ;;  %v4395_v38 = vshll.u32 %v4107_v31, 16  ;;  %v4109_v52 = vld [vmem:[#allocation2 + $0x10c] sm:$0xf] }
 0x297   : > { %7617 = vmatprep.subr.bf16.mxu1 %v8431_v41  ;;  %v4360_v24 = vsel %vm10141_vm6, %v4355_v36, %v4359_v60  ;;  %v4369_v32 = vrot.slane %v4368_v45, 4  ;;  %v4378_v48 = vor.u32 %v4377_v23, %v4373_v20  ;;  %v4399_v42 = vshrl.u32 %v4107_v31, 16 }
 0x298   : > { %7586 = vmatmul.mubr.bf16.gmra.mrb[12].mxu1 %v6887_v61  ;;  %v10273_v51 = vcombine.low %v4350_v15, %v4360_v24  ;;  %v4388_v57 = vrot.slane %v4386_v58, 4  ;;  %v4391_v33 = vrot.slane %v4389_v29, 5  ;;  %7812 = vmatpush3.bf16.msra.mxu0 %v8423_v16  ;;  %v4397_v61 = vrot.slane %v4395_v38, 5  ;;  %v4112_v15 = vld [vmem:[#allocation2 + $0x120] sm:$0xf] }
 0x299   : > { %7589 = vmatprep.mubr.bf16.mxu1 %v6888_v55  ;;  %v4374_v5 = vsel %vm10141_vm6, %v4369_v32, %v4373_v20  ;;  %v4379_v47 = vrot.slane %v4378_v48, 4  ;;  %v4405_v60 = vshll.u32 %v4108_v8, 16  ;;  %7813 = vmatprep.subr.bf16.mxu0 %v8428_v27  ;;  %v4401_v11 = vrot.slane %v4399_v42, 4  ;;  %v4113_v8 = vld [vmem:[#allocation2 + $0x124] sm:$0xf] }
 0x29a   : > { %7618 = vmatpush3.bf16.msra.mxu1 %v8431_v41  ;;  %v4392_v21 = vor.u32 %v4391_v33, %v4388_v57  ;;  %v4410_v3 = vshrl.u32 %v4109_v52, 16  ;;  %v4413_v55 = vshll.u32 %v4109_v52, 16  ;;  %v4419_v20 = vshll.u32 %v4110_v37, 16  ;;  %v10287_v38 = vld [vmem:[#allocation2 + $0xe8] sm:$0xf]  ;;  %v8438_v33 = vld [vmem:[#allocation8 + $0xb8] sm:$0xff]  }
 0x29b   : > { %7619 = vmatprep.subr.bf16.mxu1 %v8434_v54  ;;  %7782 = vmatmul.mubr.bf16.gmra.mrb[12].mxu0 %v10241_v12  ;;  %v4384_v16 = vsel %vm10141_vm6, %v4379_v47, %v4383_v56  ;;  %v4407_v49 = vrot.slane %v4405_v60, 5  ;;  %v4423_v31 = vshrl.u32 %v4110_v37, 16  ;;  %v4402_v45 = vor.u32 %v4401_v11, %v4397_v61  ;;  %v10281_v12 = vld [vmem:[#allocation8 + $0x1c0] sm:$0xff]   ;;  %v10293_v57 = vld [vmem:[#allocation2 + $0xfc] sm:$0xf] }
 0x29c   : > { %7785 = vmatprep.mubr.bf16.mxu0 %v10250_v0  ;;  %v7004_v36 = vcombine.low %v4374_v5, %v4384_v16  ;;  %v4393_v41 = vrot.slane %v4392_v21, 4  ;;  %v4412_v23 = vrot.slane %v4410_v3, 4  ;;  %7814 = vmatpush3.bf16.msra.mxu0 %v8428_v27  ;;  %v4415_v58 = vrot.slane %v4413_v55, 5  ;;  %v10285_v0 = vld [vmem:[#allocation2 + $0xe4] sm:$0xf] }
 0x29d   : > { %v4421_v29 = vrot.slane %v4419_v20, 5  ;;  %v4425_v24 = vrot.slane %v4423_v31, 4  ;;  %v4429_v32 = vshll.u32 %v4111_v4, 16  ;;  %7815 = vmatprep.subr.bf16.mxu0 %v8433_v7  ;;  %v4403_v48 = vrot.slane %v4402_v45, 4  ;;  %v10291_v27 = vld [vmem:[#allocation2 + $0xf8] sm:$0xf] }
 0x29e   : > { %7620 = vmatpush3.bf16.msra.mxu1 %v8434_v54  ;;  %v4398_v56 = vsel %vm10141_vm6, %v4393_v41, %v4397_v61  ;;  %v6893_v52 = vcombine.low %v10285_v0, %v10287_v38  ;;  %v6894_v54 = vcombine.low %v10291_v27, %v10293_v57  ;;  %v4416_v42 = vor.u32 %v4415_v58, %v4412_v23  ;;  %v4114_v47 = vld [vmem:[#allocation2 + $0x128] sm:$0x1]  ;;  %v4115_v3 = vld [vmem:[#allocation2 + $0x134] sm:$0xf]  ;;  %v4116_v16 = vld [vmem:[#allocation2 + $0x138] sm:$0xf] }
 0x29f   : > { %7621 = vmatprep.subr.bf16.mxu1 %v8436_v50  ;;  %v4426_v37 = vor.u32 %v4425_v24, %v4421_v29  ;;  %v4431_v5 = vrot.slane %v4429_v32, 5  ;;  %v4434_v61 = vshrl.u32 %v4112_v15, 16  ;;  %v4408_v60 = vsel %vm10141_vm6, %v4403_v48, %v4407_v49  ;;  %v4117_v41 = vld [vmem:[#allocation2 + $0x13c] sm:$0x1] }
 0x2a0   : > { %7590 = vmatmul.mubr.bf16.gmra.mrb[16].mxu1 %v6889_v39  ;;  %v4437_v21 = vshll.u32 %v4112_v15, 16  ;;  %v4443_v11 = vshll.u32 %v4113_v8, 16  ;;  %v4447_v4 = vshrl.u32 %v4113_v8, 16  ;;  %7816 = vmatpush3.bf16.msra.mxu0 %v8433_v7  ;;  %v7005_v55 = vcombine.low %v4398_v56, %v4408_v60 }
 0x2a1   : > { %7593 = vmatprep.mubr.bf16.mxu1 %v6890_v59  ;;  %v4417_v30 = vrot.slane %v4416_v42, 4  ;;  %v4427_v26 = vrot.slane %v4426_v37, 4  ;;  %v4436_v39 = vrot.slane %v4434_v61, 4  ;;  %7849 = vmatprep.subr.bf16.mxu0 %v10281_v12  ;;  %v4453_v40 = vshll.u32 %v4114_v47, 16  ;;  %v10306_v59 = vld [vmem:[#allocation8 + $0xc0] sm:$0xff]  }
 0x2a2   : > { %7622 = vmatpush3.bf16.msra.mxu1 %v8436_v50  ;;  %v4439_v20 = vrot.slane %v4437_v21, 5  ;;  %v4445_v31 = vrot.slane %v4443_v11, 5  ;;  %v4449_v46 = vrot.slane %v4447_v4, 4  ;;  %v4458_v45 = vshrl.u32 %v4115_v3, 16  ;;  %v4118_v42 = vld [vmem:[#allocation2 + $0x148] sm:$0xf] }
 0x2a3   : > { %7623 = vmatprep.subr.bf16.mxu1 %v8438_v33  ;;  %7786 = vmatmul.mubr.bf16.gmra.mrb[16].mxu0 %v10273_v51  ;;  %v4422_v7 = vsel %vm10141_vm6, %v4417_v30, %v4421_v29  ;;  %v4432_v49 = vsel %vm10141_vm6, %v4427_v26, %v4431_v5  ;;  %v4461_v50 = vshll.u32 %v4115_v3, 16  ;;  %v4455_v58 = vrot.slane %v4453_v40, 5  ;;  %v10313_v47 = vld [vmem:[#allocation2 + $0x10c] sm:$0xf]  ;;  %v11298_v5 = vld [vmem:[#allocation60_spill] sm:$0xff]  ;;  %v11299_v11 = vld [vmem:[#allocation63_spill] sm:$0xff] }
 0x2a4   : > { %7789 = vmatprep.mubr.bf16.mxu0 %v7004_v36  ;;  %v7006_v23 = vcombine.low %v4422_v7, %v4432_v49  ;;  %v4440_v15 = vor.u32 %v4439_v20, %v4436_v39  ;;  %v4450_v8 = vor.u32 %v4449_v46, %v4445_v31  ;;  %v4460_v24 = vrot.slane %v4458_v45, 4  ;;  %v4119_v4 = vld [vmem:[#allocation2 + $0x14c] sm:$0xf]  ;;  %v4120_v3 = vld [vmem:[#allocation2 + $0x150] sm:$0x1] }
 0x2a5   : > { %v4463_v32 = vrot.slane %v4461_v50, 5  ;;  %v4467_v56 = vshll.u32 %v4116_v16, 16  ;;  %v4471_v48 = vshrl.u32 %v4116_v16, 16  ;;  %v4477_v29 = vshll.u32 %v4117_v41, 16  ;;  %v4829_v40 = vld [vmem:[#allocation2 + $0x30] sm:$0xf] }
 0x2a6   : > { %7624 = vmatpush3.bf16.msra.mxu1 %v8438_v33  ;;  %v4441_v51 = vrot.slane %v4440_v15, 4  ;;  %v4451_v37 = vrot.slane %v4450_v8, 4  ;;  %v6895_v61 = vcombine.low %v10313_v47, %v11298_v5  ;;  %v6896_v33 = vcombine.low %v11299_v11, %v10019_v62  ;;  %v2244_v47 = vld [vmem:[#allocation2 + $0x20] sm:$0xf]  ;;  %v2245_v11 = vld [vmem:[#allocation2 + $0x24] sm:$0x1] }
 0x2a7   : > { %7657 = vmatprep.subr.bf16.mxu1 %v10306_v59  ;;  %v4464_v36 = vor.u32 %v4463_v32, %v4460_v24  ;;  %v4469_v60 = vrot.slane %v4467_v56, 5  ;;  %v4473_v21 = vrot.slane %v4471_v48, 4  ;;  %v4479_v10 = vrot.slane %v4477_v29, 5  ;;  %v4831_v32 = vld [vmem:[#allocation2 + $0x40] sm:$0x8] }
 0x2a8   : > { %7594 = vmatmul.mubr.bf16.gmra.mrb[20].mxu1 %v6891_v35  ;;  %v4446_v30 = vsel %vm10141_vm6, %v4441_v51, %v4445_v31  ;;  %v4456_v26 = vsel %vm10141_vm6, %v4451_v37, %v4455_v58  ;;  %v4482_v43 = vshrl.u32 %v4118_v42, 16  ;;  %v4828_v35 = vld [vmem:[#allocation2 + $0x2c] sm:$0x8]  ;;  %v4485_v46 = vshll.u32 %v4118_v42, 16  ;;  %v4830_v31 = vld [vmem:[#allocation2 + $0x34] sm:$0xf] }
 0x2a9   : > { %7597 = vmatprep.mubr.bf16.mxu1 %v6892_v22  ;;  %v7007_v39 = vcombine.low %v4446_v30, %v4456_v26  ;;  %v4465_v16 = vrot.slane %v4464_v36, 4  ;;  %v4474_v20 = vor.u32 %v4473_v21, %v4469_v60  ;;  %v4491_v49 = vshll.u32 %v4119_v4, 16 }
 0x2aa   : > { %v4484_v7 = vrot.slane %v4482_v43, 4  ;;  %v4495_v41 = vshrl.u32 %v4119_v4, 16  ;;  %v4501_v45 = vshll.u32 %v4120_v3, 16  ;;  %v4487_v22 = vrot.slane %v4485_v46, 5  ;;  %v4833_v3 = vld [vmem:[#allocation2 + $0x48] sm:$0xf] }
 0x2ab   : > { %7790 = vmatmul.mubr.bf16.gmra.mrb[20].mxu0 %v7005_v55  ;;  %v4470_v17 = vsel %vm10141_vm6, %v4465_v16, %v4469_v60  ;;  %v4475_v19 = vrot.slane %v4474_v20, 4  ;;  %v4877_v50 = vshrl.u32 %v4828_v35, 16  ;;  %v4493_v15 = vrot.slane %v4491_v49, 5  ;;  %v4832_v60 = vld [vmem:[#allocation2 + $0x44] sm:$0xf] }
 0x2ac   : > { %7793 = vmatprep.mubr.bf16.mxu0 %v7006_v23  ;;  %v4497_v8 = vrot.slane %v4495_v41, 4  ;;  %v4503_v58 = vrot.slane %v4501_v45, 5  ;;  %v4882_v24 = vshrl.u32 %v4829_v40, 16  ;;  %v4488_v48 = vor.u32 %v4487_v22, %v4484_v7  ;;  %v4834_v16 = vld [vmem:[#allocation2 + $0x54] sm:$0x8] }
 0x2ad   : > { %v4480_v56 = vsel %vm10141_vm6, %v4475_v19, %v4479_v10  ;;  %v7018_v42 = vrot.slane %v4877_v50, 11  ;;  %v4885_v51 = vshll.u32 %v4829_v40, 16  ;;  %v4891_v36 = vshrl.u32 %v4830_v31, 16  ;;  %v4835_v46 = vld [vmem:[#allocation2 + $0x58] sm:$0xf] }
 0x2ae   : > { %v7008_v55 = vcombine.low %v4470_v17, %v4480_v56  ;;  %v4498_v37 = vor.u32 %v4497_v8, %v4493_v15  ;;  %v4884_v29 = vrot.slane %v4882_v24, 7  ;;  %v4489_v23 = vrot.slane %v4488_v48, 4  ;;  %v2240_v19 = vld [vmem:[#allocation2 + $0x8] sm:$0xf]  ;;  %v2241_v8 = vld [vmem:[#allocation2 + $0xc] sm:$0xf] }
 0x2af   : > { %v4894_v21 = vshll.u32 %v4830_v31, 16  ;;  %v6897_v4 = vcombine.low %v10125_v34, %v10132_v1  ;;  %v4899_v30 = vshrl.u32 %v4831_v32, 16  ;;  %v4893_v35 = vrot.slane %v4891_v36, 7 }
 0x2b0   : > { %7598 = vmatmul.mubr.bf16.gmra.mrb[24].mxu1 %v6893_v52  ;;  %v4499_v26 = vrot.slane %v4498_v37, 4  ;;  %v4887_v10 = vor.u32 %v4885_v51, %v4884_v29  ;;  %v4889_v43 = vrot.slane %v4884_v29, 4  ;;  %v4494_v0 = vsel %vm10141_vm6, %v4489_v23, %v4493_v15  ;;  %v2242_v37 = vld [vmem:[#allocation2 + $0x10] sm:$0x1] }
 0x2b1   : > { %7601 = vmatprep.mubr.bf16.mxu1 %v6894_v54  ;;  %v7019_v38 = vrot.slane %v4899_v30, 11  ;;  %v4904_v52 = vshrl.u32 %v4832_v60, 16  ;;  %v4907_v20 = vshll.u32 %v4832_v60, 16  ;;  %v4896_v27 = vor.u32 %v4894_v21, %v4893_v35  ;;  %v4836_v54 = vld [vmem:[#allocation2 + $0x5c] sm:$0xf] }
 0x2b2   : > { %v4504_v40 = vsel %vm10141_vm6, %v4499_v26, %v4503_v58  ;;  %v4888_v7 = vsel %vm9347_vm3, %v7018_v42, %v4887_v10  ;;  %v4913_v57 = vshrl.u32 %v4833_v3, 16  ;;  %v4916_v45 = vshll.u32 %v4833_v3, 16  ;;  %v2243_v26 = vld [vmem:[#allocation2 + $0x1c] sm:$0xf] }
 0x2b3   : > { %7794 = vmatmul.mubr.bf16.gmra.mrb[24].mxu0 %v7007_v39  ;;  %v7009_v49 = vcombine.low %v4494_v0, %v4504_v40  ;;  %v4906_v41 = vrot.slane %v4904_v52, 7  ;;  %v4921_v17 = vshrl.u32 %v4834_v16, 16  ;;  %v4897_v22 = vsel %vm9347_vm3, %v4889_v43, %v4896_v27 }
 0x2b4   : > { %7797 = vmatprep.mubr.bf16.mxu0 %v7008_v55  ;;  %v4915_v31 = vrot.slane %v4913_v57, 7  ;;  %v4926_v50 = vshrl.u32 %v4835_v46, 16  ;;  %v4929_v15 = vshll.u32 %v4835_v46, 16  ;;  %v7034_v58 = vcombine.low %v4888_v7, %v4897_v22  ;;  %v2246_v57 = vld [vmem:[#allocation2 + $0x30] sm:$0xf] }
 0x2b5   : > { %v4909_v24 = vor.u32 %v4907_v20, %v4906_v41  ;;  %v4911_v32 = vrot.slane %v4906_v41, 4  ;;  %v7020_v56 = vrot.slane %v4921_v17, 11  ;;  %v4935_v39 = vshrl.u32 %v4836_v54, 16 }
 0x2b6   : > { %v4918_v48 = vor.u32 %v4916_v45, %v4915_v31  ;;  %v4928_v42 = vrot.slane %v4926_v50, 7  ;;  %v4938_v51 = vshll.u32 %v4836_v54, 16  ;;  %v2292_v29 = vshrl.u32 %v2240_v19, 16 }
 0x2b7   : > { %v4910_v55 = vsel %vm9347_vm3, %v7019_v38, %v4909_v24  ;;  %v2295_v36 = vshll.u32 %v2240_v19, 16  ;;  %v2301_v60 = vshll.u32 %v2241_v8, 16  ;;  %v4937_v30 = vrot.slane %v4935_v39, 7  ;;  %v2247_v19 = vld [vmem:[#allocation2 + $0x34] sm:$0xf] }
 0x2b8   : > { %7602 = vmatmul.mubr.bf16.gmra.mrb[28].mxu1 %v6895_v61  ;;  %v4919_v23 = vsel %vm9347_vm3, %v4911_v32, %v4918_v48  ;;  %v4931_v21 = vor.u32 %v4929_v15, %v4928_v42  ;;  %v4933_v3 = vrot.slane %v4928_v42, 4  ;;  %v2294_v61 = vrot.slane %v2292_v29, 4 }
 0x2b9   : > { %7605 = vmatprep.mubr.bf16.mxu1 %v6896_v33  ;;  %v7035_v5 = vcombine.low %v4910_v55, %v4919_v23  ;;  %v2297_v10 = vrot.slane %v2295_v36, 5  ;;  %v2303_v43 = vrot.slane %v2301_v60, 5  ;;  %v4940_v16 = vor.u32 %v4938_v51, %v4937_v30  ;;  %v8439_v51 = vld [vmem:[#allocation8 + $0x1c8] sm:$0xff]   ;;  %v4837_v55 = vld [vmem:[#allocation2 + $0x68] sm:$0x8] }
 0x2ba   : > { %v4932_v35 = vsel %vm9347_vm3, %v7020_v56, %v4931_v21  ;;  %v2305_v0 = vshrl.u32 %v2241_v8, 16  ;;  %v2311_v38 = vshll.u32 %v2242_v37, 16  ;;  %v2316_v33 = vshrl.u32 %v2243_v26, 16  ;;  %v4838_v23 = vld [vmem:[#allocation2 + $0x6c] sm:$0xf] }
 0x2bb   : > { %7798 = vmatmul.mubr.bf16.gmra.mrb[28].mxu0 %v7009_v49  ;;  %v2298_v62 = vor.u32 %v2297_v10, %v2294_v61  ;;  %v2319_v52 = vshll.u32 %v2243_v26, 16  ;;  %v2325_v20 = vshll.u32 %v2244_v47, 16  ;;  %v4941_v46 = vsel %vm9347_vm3, %v4933_v3, %v4940_v16  ;;  %v4839_v61 = vld [vmem:[#allocation2 + $0x70] sm:$0xf]  ;;  %v4840_v10 = vld [vmem:[#allocation2 + $0x7c] sm:$0x8] }
 0x2bc   : > { %7817 = vmatprep.mubr.bf16.mxu0 %v7034_v58  ;;  %v2307_v40 = vrot.slane %v2305_v0, 4  ;;  %v2313_v7 = vrot.slane %v2311_v38, 5  ;;  %v2329_v27 = vshrl.u32 %v2244_v47, 16  ;;  %v7036_v54 = vcombine.low %v4932_v35, %v4941_v46  ;;  %v2248_v58 = vld [vmem:[#allocation2 + $0x38] sm:$0x1] }
 0x2bd   : > { %v2299_v41 = vrot.slane %v2298_v62, 4  ;;  %v2318_v45 = vrot.slane %v2316_v33, 4  ;;  %v2321_v17 = vrot.slane %v2319_v52, 5  ;;  %v2327_v49 = vrot.slane %v2325_v20, 5  ;;  %v4841_v38 = vld [vmem:[#allocation2 + $0x80] sm:$0xf] }
 0x2be   : > { %v2308_v22 = vor.u32 %v2307_v40, %v2303_v43  ;;  %v2331_v31 = vrot.slane %v2329_v27, 4  ;;  %v2335_v50 = vshll.u32 %v2245_v11, 16  ;;  %v2340_v24 = vshrl.u32 %v2246_v57, 16  ;;  %v8440_v52 = vld [vmem:[#allocation8 + $0x1d0] sm:$0xff]   ;;  %v8445_v20 = vld [vmem:[#allocation8 + $0xc8] sm:$0xff]  }
 0x2bf   : > { %v2304_v15 = vsel %vm10141_vm6, %v2299_v41, %v2303_v43  ;;  %v2322_v8 = vor.u32 %v2321_v17, %v2318_v45  ;;  %v2343_v32 = vshll.u32 %v2246_v57, 16  ;;  %v2349_v39 = vshll.u32 %v2247_v19, 16  ;;  %v4842_v27 = vld [vmem:[#allocation2 + $0x84] sm:$0xf] }
 0x2c0   : > { %7606 = vmatmul.mubr.bf16.gmra.mrb[32].mxu1 %v6897_v4  ;;  %v2309_v56 = vrot.slane %v2308_v22, 4  ;;  %v2332_v48 = vor.u32 %v2331_v31, %v2327_v49  ;;  %v2337_v42 = vrot.slane %v2335_v50, 5  ;;  %v2342_v29 = vrot.slane %v2340_v24, 4  ;;  %v2249_v31 = vld [vmem:[#allocation2 + $0x44] sm:$0xf] }
 0x2c1   : > { %v2323_v37 = vrot.slane %v2322_v8, 4  ;;  %v2345_v36 = vrot.slane %v2343_v32, 5  ;;  %v2353_v60 = vshrl.u32 %v2247_v19, 16  ;;  %v2351_v4 = vrot.slane %v2349_v39, 5  ;;  %v2250_v24 = vld [vmem:[#allocation2 + $0x48] sm:$0xf] }
 0x2c2   : > { %v2314_v34 = vsel %vm10141_vm6, %v2309_v56, %v2313_v7  ;;  %v2333_v1 = vrot.slane %v2332_v48, 4  ;;  %v2359_v21 = vshll.u32 %v2248_v58, 16  ;;  %v4943_v16 = vshrl.u32 %v4837_v55, 16  ;;  %v8441_v32 = vld [vmem:[#allocation8 + $0x1d8] sm:$0xff]   ;;  %v8446_v55 = vld [vmem:[#allocation8 + $0xd0] sm:$0xff]  }
 0x2c3   : > { %7818 = vmatmul.mubr.bf16.vlgmr.msra.gmra.mrb[0].mxu0 %v7035_v5  ;;  %v6906_v3 = vcombine.low %v2304_v15, %v2314_v34  ;;  %v2328_v30 = vsel %vm10141_vm6, %v2323_v37, %v2327_v49  ;;  %v2346_v26 = vor.u32 %v2345_v36, %v2342_v29  ;;  %v2355_v47 = vrot.slane %v2353_v60, 4  ;;  %v2252_v60 = vld [vmem:[#allocation2 + $0x58] sm:$0xf] }
 0x2c4   : > { %7850 = vmatpush3.bf16.msra.mxu0 %v10281_v12  ;;  %7821 = vmatprep.mubr.bf16.mxu0 %v7036_v54  ;;  %v2338_v43 = vsel %vm10141_vm6, %v2333_v1, %v2337_v42  ;;  %v2361_v35 = vrot.slane %v2359_v21, 5  ;;  %v4948_v0 = vshrl.u32 %v4838_v23, 16  ;;  %v4951_v33 = vshll.u32 %v4838_v23, 16  ;;  %v2253_v21 = vld [vmem:[#allocation2 + $0x5c] sm:$0xf] }
 0x2c5   : > { %7625 = vmatprep.mubr.bf16.mxu1 %v6906_v3  ;;  %v6907_v5 = vcombine.low %v2328_v30, %v2338_v43  ;;  %v2347_v62 = vrot.slane %v2346_v26, 4  ;;  %v2356_v11 = vor.u32 %v2355_v47, %v2351_v4  ;;  %7851 = vmatprep.subr.bf16.mxu0 %v8439_v51  ;;  %v7021_v46 = vrot.slane %v4943_v16, 11 }
 0x2c6   : > { %v4950_v40 = vrot.slane %v4948_v0, 7  ;;  %v4957_v7 = vshrl.u32 %v4839_v61, 16  ;;  %v4960_v12 = vshll.u32 %v4839_v61, 16  ;;  %v4965_v41 = vshrl.u32 %v4840_v10, 16  ;;  %v2254_v61 = vld [vmem:[#allocation2 + $0x60] sm:$0x1] }
 0x2c7   : > { %v2352_v57 = vsel %vm10141_vm6, %v2347_v62, %v2351_v4  ;;  %v2357_v54 = vrot.slane %v2356_v11, 4  ;;  %v4970_v45 = vshrl.u32 %v4841_v38, 16  ;;  %v4973_v49 = vshll.u32 %v4841_v38, 16  ;;  %v8442_v10 = vld [vmem:[#allocation8 + $0x1e0] sm:$0xff]   ;;  %v8448_v38 = vld [vmem:[#allocation8 + $0xd8] sm:$0xff]  }
 0x2c8   : > { %7626 = vmatmul.mubr.bf16.vlgmr.msra.gmra.mrb[4].mxu1 %v6907_v5  ;;  %v4953_v17 = vor.u32 %v4951_v33, %v4950_v40  ;;  %v4955_v19 = vrot.slane %v4950_v40, 4  ;;  %v4959_v22 = vrot.slane %v4957_v7, 7  ;;  %7852 = vmatpush3.bf16.msra.mxu0 %v8439_v51  ;;  %v7022_v15 = vrot.slane %v4965_v41, 11  ;;  %v2251_v51 = vld [vmem:[#allocation2 + $0x4c] sm:$0x1] }
 0x2c9   : > { %7658 = vmatpush3.bf16.msra.mxu1 %v10306_v59  ;;  %v2362_v50 = vsel %vm10141_vm6, %v2357_v54, %v2361_v35  ;;  %v4972_v8 = vrot.slane %v4970_v45, 7  ;;  %v4979_v58 = vshrl.u32 %v4842_v27, 16  ;;  %7853 = vmatprep.subr.bf16.mxu0 %v8440_v52  ;;  %v4982_v39 = vshll.u32 %v4842_v27, 16  ;;  %v4844_v27 = vld [vmem:[#allocation2 + $0x94] sm:$0xf] }
 0x2ca   : > { %7659 = vmatprep.subr.bf16.mxu1 %v8445_v20  ;;  %v6908_v56 = vcombine.low %v2352_v57, %v2362_v50  ;;  %v4954_v48 = vsel %vm9347_vm3, %v7021_v46, %v4953_v17  ;;  %v4962_v42 = vor.u32 %v4960_v12, %v4959_v22  ;;  %v2364_v36 = vshrl.u32 %v2249_v31, 16  ;;  %v4845_v45 = vld [vmem:[#allocation2 + $0x98] sm:$0xf]  ;;  %v4846_v17 = vld [vmem:[#allocation2 + $0xa4] sm:$0x8] }
 0x2cb   : > { %v4975_v37 = vor.u32 %v4973_v49, %v4972_v8  ;;  %v4977_v59 = vrot.slane %v4972_v8, 4  ;;  %v4981_v29 = vrot.slane %v4979_v58, 7  ;;  %v2367_v34 = vshll.u32 %v2249_v31, 16 }
 0x2cc   : > { %7629 = vmatprep.mubr.bf16.mxu1 %v6908_v56  ;;  %v4963_v23 = vsel %vm9347_vm3, %v4955_v19, %v4962_v42  ;;  %v2373_v1 = vshll.u32 %v2250_v24, 16  ;;  %v2377_v4 = vshrl.u32 %v2250_v24, 16  ;;  %7854 = vmatpush3.bf16.msra.mxu0 %v8440_v52  ;;  %v2366_v47 = vrot.slane %v2364_v36, 4  ;;  %v4843_v52 = vld [vmem:[#allocation2 + $0x90] sm:$0x8] }
 0x2cd   : > { %v7037_v3 = vcombine.low %v4954_v48, %v4963_v23  ;;  %v4976_v30 = vsel %vm9347_vm3, %v7022_v15, %v4975_v37  ;;  %v4984_v26 = vor.u32 %v4982_v39, %v4981_v29  ;;  %7855 = vmatprep.subr.bf16.mxu0 %v8441_v32  ;;  %7660 = vmatpush3.bf16.msra.mxu1 %v8445_v20  ;;  %v2369_v43 = vrot.slane %v2367_v34, 5  ;;  %v8444_v19 = vld [vmem:[#allocation8 + $0x1e8] sm:$0xff]   ;;  %v8449_v15 = vld [vmem:[#allocation8 + $0xe0] sm:$0xff]  }
 0x2ce   : > { %v2375_v35 = vrot.slane %v2373_v1, 5  ;;  %v2379_v16 = vrot.slane %v2377_v4, 4  ;;  %v2383_v0 = vshll.u32 %v2251_v51, 16  ;;  %7661 = vmatprep.subr.bf16.mxu1 %v8446_v55  ;;  %v2388_v62 = vshrl.u32 %v2252_v60, 16  ;;  %v4847_v56 = vld [vmem:[#allocation2 + $0xa8] sm:$0xf] }
 0x2cf   : > { %7822 = vmatmul.mubr.bf16.gmra.mrb[4].mxu0 %v7037_v3  ;;  %v4985_v5 = vsel %vm9347_vm3, %v4977_v59, %v4984_v26  ;;  %v2391_v11 = vshll.u32 %v2252_v60, 16  ;;  %v2397_v33 = vshll.u32 %v2253_v21, 16  ;;  %v2370_v40 = vor.u32 %v2369_v43, %v2366_v47  ;;  %v4848_v36 = vld [vmem:[#allocation2 + $0xac] sm:$0xf]  ;;  %v8447_v60 = vld [vmem:[#allocation8 + $0x1f0] sm:$0xff]  }
 0x2d0   : > { %v7038_v46 = vcombine.low %v4976_v30, %v4985_v5  ;;  %v2380_v7 = vor.u32 %v2379_v16, %v2375_v35  ;;  %v2385_v12 = vrot.slane %v2383_v0, 5  ;;  %7856 = vmatpush3.bf16.msra.mxu0 %v8441_v32  ;;  %v2390_v20 = vrot.slane %v2388_v62, 4  ;;  %v2256_v0 = vld [vmem:[#allocation2 + $0x70] sm:$0xf] }
 0x2d1   : > { %v2393_v57 = vrot.slane %v2391_v11, 5  ;;  %v2399_v54 = vrot.slane %v2397_v33, 5  ;;  %v2401_v41 = vshrl.u32 %v2253_v21, 16  ;;  %7857 = vmatprep.subr.bf16.mxu0 %v8442_v10  ;;  %7662 = vmatpush3.bf16.msra.mxu1 %v8446_v55  ;;  %v2371_v22 = vrot.slane %v2370_v40, 4  ;;  %v8452_v21 = vld [vmem:[#allocation8 + $0xe8] sm:$0xff]  }
 0x2d2   : > { %7825 = vmatprep.mubr.bf16.mxu0 %v7038_v46  ;;  %v2381_v49 = vrot.slane %v2380_v7, 4  ;;  %v2407_v31 = vshll.u32 %v2254_v61, 16  ;;  %v4987_v50 = vshrl.u32 %v4843_v52, 16  ;;  %7663 = vmatprep.subr.bf16.mxu1 %v8448_v38  ;;  %v4992_v24 = vshrl.u32 %v4844_v27, 16  ;;  %v2255_v61 = vld [vmem:[#allocation2 + $0x6c] sm:$0xf] }
 0x2d3   : > { %v2394_v8 = vor.u32 %v2393_v57, %v2390_v20  ;;  %v2403_v58 = vrot.slane %v2401_v41, 4  ;;  %v4995_v32 = vshll.u32 %v4844_v27, 16  ;;  %v2376_v48 = vsel %vm10141_vm6, %v2371_v22, %v2375_v35  ;;  %v2257_v33 = vld [vmem:[#allocation2 + $0x74] sm:$0x1]  ;;  %v8450_v52 = vld [vmem:[#allocation8 + $0x1f8] sm:$0xff]   ;;  %v8453_v27 = vld [vmem:[#allocation8 + $0xf0] sm:$0xff]  }
 0x2d4   : > { %v2386_v42 = vsel %vm10141_vm6, %v2381_v49, %v2385_v12  ;;  %v2409_v39 = vrot.slane %v2407_v31, 5  ;;  %v7023_v51 = vrot.slane %v4987_v50, 11  ;;  %7858 = vmatpush3.bf16.msra.mxu0 %v8442_v10  ;;  %v4994_v29 = vrot.slane %v4992_v24, 7  ;;  %v2259_v31 = vld [vmem:[#allocation2 + $0x84] sm:$0xf] }
 0x2d5   : > { %v6909_v55 = vcombine.low %v2376_v48, %v2386_v42  ;;  %v2395_v37 = vrot.slane %v2394_v8, 4  ;;  %v2404_v59 = vor.u32 %v2403_v58, %v2399_v54  ;;  %7859 = vmatprep.subr.bf16.mxu0 %v8444_v19  ;;  %7664 = vmatpush3.bf16.msra.mxu1 %v8448_v38  ;;  %v5001_v23 = vshrl.u32 %v4845_v45, 16  ;;  %v2260_v24 = vld [vmem:[#allocation2 + $0x88] sm:$0x1] }
 0x2d6   : > { %v5004_v34 = vshll.u32 %v4845_v45, 16  ;;  %v5009_v1 = vshrl.u32 %v4846_v17, 16  ;;  %v5014_v4 = vshrl.u32 %v4847_v56, 16  ;;  %7665 = vmatprep.subr.bf16.mxu1 %v8449_v15  ;;  %v4997_v26 = vor.u32 %v4995_v32, %v4994_v29  ;;  %v2258_v45 = vld [vmem:[#allocation2 + $0x80] sm:$0xf]  ;;  %v10403_v32 = vld [vmem:[#allocation8 + $0x200] sm:$0xff]  }
 0x2d7   : > { %7630 = vmatmul.mubr.bf16.gmra.mrb[8].mxu1 %v6909_v55  ;;  %v2400_v3 = vsel %vm10141_vm6, %v2395_v37, %v2399_v54  ;;  %v2405_v30 = vrot.slane %v2404_v59, 4  ;;  %v4999_v47 = vrot.slane %v4994_v29, 4  ;;  %v5003_v10 = vrot.slane %v5001_v23, 7 }
 0x2d8   : > { %v7024_v43 = vrot.slane %v5009_v1, 11  ;;  %v5016_v35 = vrot.slane %v5014_v4, 7  ;;  %v5017_v16 = vshll.u32 %v4847_v56, 16  ;;  %7860 = vmatpush3.bf16.msra.mxu0 %v8444_v19  ;;  %v4998_v5 = vsel %vm9347_vm3, %v7023_v51, %v4997_v26  ;;  %v8457_v51 = vld [vmem:[#allocation8 + $0xf8] sm:$0xff]  }
 0x2d9   : > { %v2410_v38 = vsel %vm10141_vm6, %v2405_v30, %v2409_v39  ;;  %v5023_v62 = vshrl.u32 %v4848_v36, 16  ;;  %v5026_v11 = vshll.u32 %v4848_v36, 16  ;;  %7861 = vmatprep.subr.bf16.mxu0 %v8447_v60  ;;  %7666 = vmatpush3.bf16.msra.mxu1 %v8449_v15  ;;  %v5006_v40 = vor.u32 %v5004_v34, %v5003_v10  ;;  %v4849_v36 = vld [vmem:[#allocation2 + $0xb8] sm:$0x8]  ;;  %v10410_v10 = vld [vmem:[#allocation2 + $0xc0] sm:$0xf] }
 0x2da   : > { %v6910_v46 = vcombine.low %v2400_v3, %v2410_v38  ;;  %v5019_v7 = vor.u32 %v5017_v16, %v5016_v35  ;;  %v5021_v12 = vrot.slane %v5016_v35, 4  ;;  %7667 = vmatprep.subr.bf16.mxu1 %v8452_v21  ;;  %v2412_v57 = vshrl.u32 %v2255_v61, 16 }
 0x2db   : > { %v5025_v20 = vrot.slane %v5023_v62, 7  ;;  %v2415_v54 = vshll.u32 %v2255_v61, 16  ;;  %v2421_v41 = vshll.u32 %v2256_v0, 16  ;;  %v5007_v17 = vsel %vm9347_vm3, %v4999_v47, %v5006_v40  ;;  %v4852_v62 = vld [vmem:[#allocation2 + $0xcc] sm:$0x8] }
 0x2dc   : > { %7633 = vmatprep.mubr.bf16.mxu1 %v6910_v46  ;;  %v5020_v19 = vsel %vm9347_vm3, %v7024_v43, %v5019_v7  ;;  %v2425_v22 = vshrl.u32 %v2256_v0, 16  ;;  %v2431_v49 = vshll.u32 %v2257_v33, 16  ;;  %7862 = vmatpush3.bf16.msra.mxu0 %v8447_v60  ;;  %v7039_v50 = vcombine.low %v4998_v5, %v5007_v17  ;;  %v10407_v60 = vld [vmem:[#allocation2 + $0xbc] sm:$0xf]  ;;  %v4853_v40 = vld [vmem:[#allocation2 + $0xd0] sm:$0xf] }
 0x2dd   : > { %v5028_v15 = vor.u32 %v5026_v11, %v5025_v20  ;;  %v2414_v8 = vrot.slane %v2412_v57, 4  ;;  %v2417_v58 = vrot.slane %v2415_v54, 5  ;;  %7863 = vmatprep.subr.bf16.mxu0 %v8450_v52  ;;  %7668 = vmatpush3.bf16.msra.mxu1 %v8452_v21  ;;  %v2423_v56 = vrot.slane %v2421_v41, 5  ;;  %v4854_v57 = vld [vmem:[#allocation2 + $0xd4] sm:$0xf] }
 0x2de   : > { %v2427_v48 = vrot.slane %v2425_v22, 4  ;;  %v2433_v42 = vrot.slane %v2431_v49, 5  ;;  %v2436_v39 = vshrl.u32 %v2258_v45, 16  ;;  %7669 = vmatprep.subr.bf16.mxu1 %v8453_v27  ;;  %7826 = vmatmul.mubr.bf16.gmra.mrb[8].mxu0 %v7039_v50  ;;  %v2439_v59 = vshll.u32 %v2258_v45, 16 }
 0x2df   : > { %v5029_v55 = vsel %vm9347_vm3, %v5021_v12, %v5028_v15  ;;  %v2418_v37 = vor.u32 %v2417_v58, %v2414_v8  ;;  %v2445_v29 = vshll.u32 %v2259_v31, 16  ;;  %v2449_v4 = vshrl.u32 %v2259_v31, 16  ;;  %v2262_v15 = vld [vmem:[#allocation2 + $0x98] sm:$0xf] }
 0x2e0   : > { %v7040_v23 = vcombine.low %v5020_v19, %v5029_v55  ;;  %v2428_v34 = vor.u32 %v2427_v48, %v2423_v56  ;;  %v2438_v1 = vrot.slane %v2436_v39, 4  ;;  %7864 = vmatpush3.bf16.msra.mxu0 %v8450_v52  ;;  %v2441_v3 = vrot.slane %v2439_v59, 5  ;;  %v2261_v19 = vld [vmem:[#allocation2 + $0x94] sm:$0xf] }
 0x2e1   : > { %v2419_v21 = vrot.slane %v2418_v37, 4  ;;  %v2447_v30 = vrot.slane %v2445_v29, 5  ;;  %v2455_v26 = vshll.u32 %v2260_v24, 16  ;;  %7670 = vmatpush3.bf16.msra.mxu1 %v8453_v27  ;;  %7897 = vmatprep.subr.bf16.mxu0 %v10403_v32  ;;  %v2451_v61 = vrot.slane %v2449_v4, 4  ;;  %v2263_v37 = vld [vmem:[#allocation2 + $0x9c] sm:$0x1] }
 0x2e2   : > { %7829 = vmatprep.mubr.bf16.mxu0 %v7040_v23  ;;  %v2429_v47 = vrot.slane %v2428_v34, 4  ;;  %v5031_v43 = vshrl.u32 %v4849_v36, 16  ;;  %v5036_v35 = vshrl.u32 %v10407_v60, 16  ;;  %7671 = vmatprep.subr.bf16.mxu1 %v8457_v51  ;;  %v2442_v0 = vor.u32 %v2441_v3, %v2438_v1 }
 0x2e3   : > { %v2424_v16 = vsel %vm10141_vm6, %v2419_v21, %v2423_v56  ;;  %v2457_v38 = vrot.slane %v2455_v26, 5  ;;  %v5039_v5 = vshll.u32 %v10407_v60, 16  ;;  %v2452_v33 = vor.u32 %v2451_v61, %v2447_v30  ;;  %v2264_v21 = vld [vmem:[#allocation2 + $0xa8] sm:$0xf]  ;;  %v2265_v61 = vld [vmem:[#allocation2 + $0xac] sm:$0xf] }
 0x2e4   : > { %v2434_v11 = vsel %vm10141_vm6, %v2429_v47, %v2433_v42  ;;  %v7025_v52 = vrot.slane %v5031_v43, 11  ;;  %v5038_v46 = vrot.slane %v5036_v35, 7  ;;  %v2443_v12 = vrot.slane %v2442_v0, 4 }
 0x2e5   : > { %v6911_v7 = vcombine.low %v2424_v16, %v2434_v11  ;;  %v5045_v27 = vshrl.u32 %v10410_v10, 16  ;;  %v5048_v20 = vshll.u32 %v10410_v10, 16  ;;  %7672 = vmatpush3.bf16.msra.mxu1 %v8457_v51  ;;  %v2453_v54 = vrot.slane %v2452_v33, 4 }
 0x2e6   : > { %v5041_v41 = vor.u32 %v5039_v5, %v5038_v46  ;;  %v5043_v45 = vrot.slane %v5038_v46, 4  ;;  %v5053_v17 = vshrl.u32 %v4852_v62, 16  ;;  %v2448_v22 = vsel %vm10141_vm6, %v2443_v12, %v2447_v30  ;;  %v2266_v62 = vld [vmem:[#allocation2 + $0xb0] sm:$0x1] }
 0x2e7   : > { %7634 = vmatmul.mubr.bf16.gmra.mrb[12].mxu1 %v6911_v7  ;;  %v5047_v49 = vrot.slane %v5045_v27, 7  ;;  %v5058_v31 = vshrl.u32 %v4853_v40, 16  ;;  %v5061_v50 = vshll.u32 %v4853_v40, 16  ;;  %v2458_v8 = vsel %vm10141_vm6, %v2453_v54, %v2457_v38  ;;  %v10432_v27 = vld [vmem:[#allocation2 + $0xe4] sm:$0xf] }
 0x2e8   : > { %v5042_v58 = vsel %vm9347_vm3, %v7025_v52, %v5041_v41  ;;  %v7026_v24 = vrot.slane %v5053_v17, 11  ;;  %v5067_v56 = vshrl.u32 %v4854_v57, 16  ;;  %v6912_v48 = vcombine.low %v2448_v22, %v2458_v8  ;;  %v4855_v52 = vld [vmem:[#allocation2 + $0xe0] sm:$0x8]  ;;  %v10434_v22 = vld [vmem:[#allocation2 + $0xe8] sm:$0xf] }
 0x2e9   : > { %v5050_v42 = vor.u32 %v5048_v20, %v5047_v49  ;;  %v5060_v39 = vrot.slane %v5058_v31, 7  ;;  %v5070_v51 = vshll.u32 %v4854_v57, 16  ;;  %v2460_v59 = vshrl.u32 %v2261_v19, 16 }
 0x2ea   : > { %v5069_v55 = vrot.slane %v5067_v56, 7  ;;  %v2463_v29 = vshll.u32 %v2261_v19, 16  ;;  %v2469_v36 = vshll.u32 %v2262_v15, 16  ;;  %7637 = vmatprep.mubr.bf16.mxu1 %v6912_v48  ;;  %v2473_v4 = vshrl.u32 %v2262_v15, 16 }
 0x2eb   : > { %v5051_v23 = vsel %vm9347_vm3, %v5043_v45, %v5050_v42  ;;  %v5063_v34 = vor.u32 %v5061_v50, %v5060_v39  ;;  %v5065_v1 = vrot.slane %v5060_v39, 4  ;;  %v2462_v26 = vrot.slane %v2460_v59, 4 }
 0x2ec   : > { %v7041_v3 = vcombine.low %v5042_v58, %v5051_v23  ;;  %v5072_v30 = vor.u32 %v5070_v51, %v5069_v55  ;;  %v2465_v47 = vrot.slane %v2463_v29, 5  ;;  %v2471_v35 = vrot.slane %v2469_v36, 5  ;;  %v4858_v58 = vld [vmem:[#allocation2 + $0xf4] sm:$0x8]  ;;  %v10446_v23 = vld [vmem:[#allocation2 + $0xfc] sm:$0xf] }
 0x2ed   : > { %v5064_v43 = vsel %vm9347_vm3, %v7026_v24, %v5063_v34  ;;  %v2475_v16 = vrot.slane %v2473_v4, 4  ;;  %v2479_v0 = vshll.u32 %v2263_v37, 16  ;;  %v2484_v11 = vshrl.u32 %v2264_v21, 16  ;;  %v10439_v24 = vld [vmem:[#allocation2 + $0xf8] sm:$0xf] }
 0x2ee   : > { %7830 = vmatmul.mubr.bf16.gmra.mrb[12].mxu0 %v7041_v3  ;;  %v5073_v38 = vsel %vm9347_vm3, %v5065_v1, %v5072_v30  ;;  %v2466_v5 = vor.u32 %v2465_v47, %v2462_v26  ;;  %v2487_v33 = vshll.u32 %v2264_v21, 16  ;;  %v2493_v12 = vshll.u32 %v2265_v61, 16  ;;  %v2267_v26 = vld [vmem:[#allocation2 + $0xbc] sm:$0xf] }
 0x2ef   : > { %v7042_v46 = vcombine.low %v5064_v43, %v5073_v38  ;;  %v2476_v40 = vor.u32 %v2475_v16, %v2471_v35  ;;  %v2481_v7 = vrot.slane %v2479_v0, 5  ;;  %v2486_v57 = vrot.slane %v2484_v11, 4  ;;  %v2268_v16 = vld [vmem:[#allocation2 + $0xc0] sm:$0xf]  ;;  %v2269_v11 = vld [vmem:[#allocation2 + $0xc4] sm:$0x1] }
 0x2f0   : > { %v2467_v20 = vrot.slane %v2466_v5, 4  ;;  %v2489_v54 = vrot.slane %v2487_v33, 5  ;;  %v2497_v41 = vshrl.u32 %v2265_v61, 16  ;;  %v2495_v17 = vrot.slane %v2493_v12, 5 }
 0x2f1   : > { %7833 = vmatprep.mubr.bf16.mxu0 %v7042_v46  ;;  %v2477_v45 = vrot.slane %v2476_v40, 4  ;;  %v2503_v19 = vshll.u32 %v2266_v62, 16  ;;  %v5075_v49 = vshrl.u32 %v4855_v52, 16  ;;  %v5080_v8 = vshrl.u32 %v10432_v27, 16 }
 0x2f2   : > { %v2472_v31 = vsel %vm10141_vm6, %v2467_v20, %v2471_v35  ;;  %v2490_v50 = vor.u32 %v2489_v54, %v2486_v57  ;;  %v2499_v15 = vrot.slane %v2497_v41, 4  ;;  %v5083_v39 = vshll.u32 %v10432_v27, 16  ;;  %v2270_v54 = vld [vmem:[#allocation2 + $0xd0] sm:$0xf] }
 0x2f3   : > { %v2482_v56 = vsel %vm10141_vm6, %v2477_v45, %v2481_v7  ;;  %v2505_v48 = vrot.slane %v2503_v19, 5  ;;  %v7027_v42 = vrot.slane %v5075_v49, 11  ;;  %v5082_v59 = vrot.slane %v5080_v8, 7  ;;  %v2271_v49 = vld [vmem:[#allocation2 + $0xd4] sm:$0xf] }
 0x2f4   : > { %v6913_v51 = vcombine.low %v2472_v31, %v2482_v56  ;;  %v2491_v55 = vrot.slane %v2490_v50, 4  ;;  %v2500_v37 = vor.u32 %v2499_v15, %v2495_v17  ;;  %v5089_v29 = vshrl.u32 %v10434_v22, 16 }
 0x2f5   : > { %v5092_v36 = vshll.u32 %v10434_v22, 16  ;;  %v5097_v34 = vshrl.u32 %v4858_v58, 16  ;;  %v5102_v1 = vshrl.u32 %v10439_v24, 16  ;;  %v5085_v3 = vor.u32 %v5083_v39, %v5082_v59 }
 0x2f6   : > { %7638 = vmatmul.mubr.bf16.gmra.mrb[16].mxu1 %v6913_v51  ;;  %v2496_v4 = vsel %vm10141_vm6, %v2491_v55, %v2495_v17  ;;  %v2501_v21 = vrot.slane %v2500_v37, 4  ;;  %v5087_v30 = vrot.slane %v5082_v59, 4  ;;  %v5091_v47 = vrot.slane %v5089_v29, 7  ;;  %v4861_v29 = vld [vmem:[#allocation2 + $0x108] sm:$0x8] }
 0x2f7   : > { %v7028_v61 = vrot.slane %v5097_v34, 11  ;;  %v5104_v43 = vrot.slane %v5102_v1, 7  ;;  %v5105_v35 = vshll.u32 %v10439_v24, 16  ;;  %v5086_v38 = vsel %vm9347_vm3, %v7027_v42, %v5085_v3  ;;  %v2272_v42 = vld [vmem:[#allocation2 + $0xd8] sm:$0x1] }
 0x2f8   : > { %v2506_v0 = vsel %vm10141_vm6, %v2501_v21, %v2505_v48  ;;  %v5111_v5 = vshrl.u32 %v10446_v23, 16  ;;  %v5114_v62 = vshll.u32 %v10446_v23, 16  ;;  %v5094_v52 = vor.u32 %v5092_v36, %v5091_v47  ;;  %v10464_v36 = vld [vmem:[#allocation2 + $0x10c] sm:$0xf] }
 0x2f9   : > { %v6914_v33 = vcombine.low %v2496_v4, %v2506_v0  ;;  %v5107_v46 = vor.u32 %v5105_v35, %v5104_v43  ;;  %v5109_v40 = vrot.slane %v5104_v43, 4  ;;  %v2508_v12 = vshrl.u32 %v2267_v26, 16  ;;  %v10466_v35 = vld [vmem:[#allocation2 + $0x110] sm:$0xf] }
 0x2fa   : > { %v5113_v7 = vrot.slane %v5111_v5, 7  ;;  %v2511_v20 = vshll.u32 %v2267_v26, 16  ;;  %v2517_v57 = vshll.u32 %v2268_v16, 16  ;;  %v5095_v41 = vsel %vm9347_vm3, %v5087_v30, %v5094_v52 }
 0x2fb   : > { %7641 = vmatprep.mubr.bf16.mxu1 %v6914_v33  ;;  %v5108_v45 = vsel %vm9347_vm3, %v7028_v61, %v5107_v46  ;;  %v2521_v17 = vshrl.u32 %v2268_v16, 16  ;;  %v2527_v19 = vshll.u32 %v2269_v11, 16  ;;  %v7043_v31 = vcombine.low %v5086_v38, %v5095_v41  ;;  %v4864_v33 = vld [vmem:[#allocation2 + $0x11c] sm:$0x8] }
 0x2fc   : > { %v5116_v50 = vor.u32 %v5114_v62, %v5113_v7  ;;  %v2510_v15 = vrot.slane %v2508_v12, 4  ;;  %v2513_v8 = vrot.slane %v2511_v20, 5  ;;  %v2519_v58 = vrot.slane %v2517_v57, 5  ;;  %v10474_v12 = vld [vmem:[#allocation2 + $0x120] sm:$0xf] }
 0x2fd   : > { %v2523_v56 = vrot.slane %v2521_v17, 4  ;;  %v2529_v48 = vrot.slane %v2527_v19, 5  ;;  %v2532_v39 = vshrl.u32 %v2270_v54, 16  ;;  %7834 = vmatmul.mubr.bf16.gmra.mrb[16].mxu0 %v7043_v31  ;;  %v2535_v37 = vshll.u32 %v2270_v54, 16 }
 0x2fe   : > { %v5117_v51 = vsel %vm9347_vm3, %v5109_v40, %v5116_v50  ;;  %v2514_v55 = vor.u32 %v2513_v8, %v2510_v15  ;;  %v2541_v59 = vshll.u32 %v2271_v49, 16  ;;  %v2545_v21 = vshrl.u32 %v2271_v49, 16  ;;  %v2273_v50 = vld [vmem:[#allocation2 + $0xe4] sm:$0xf] }
 0x2ff   : > { %v7044_v34 = vcombine.low %v5108_v45, %v5117_v51  ;;  %v2524_v1 = vor.u32 %v2523_v56, %v2519_v58  ;;  %v2534_v4 = vrot.slane %v2532_v39, 4  ;;  %v2537_v30 = vrot.slane %v2535_v37, 5  ;;  %v10478_v45 = vld [vmem:[#allocation2 + $0x124] sm:$0xf] }
 0x300   : > { %v2515_v3 = vrot.slane %v2514_v55, 4  ;;  %v2543_v26 = vrot.slane %v2541_v59, 5  ;;  %v2551_v47 = vshll.u32 %v2272_v42, 16  ;;  %v2547_v43 = vrot.slane %v2545_v21, 4 }
 0x301   : > { %7837 = vmatprep.mubr.bf16.mxu0 %v7044_v34  ;;  %v2525_v61 = vrot.slane %v2524_v1, 4  ;;  %v5119_v16 = vshrl.u32 %v4861_v29, 16  ;;  %v5124_v0 = vshrl.u32 %v10464_v36, 16  ;;  %v2538_v5 = vor.u32 %v2537_v30, %v2534_v4  ;;  %v2275_v4 = vld [vmem:[#allocation2 + $0xec] sm:$0x1] }
 0x302   : > { %v2520_v38 = vsel %vm10141_vm6, %v2515_v3, %v2519_v58  ;;  %v2553_v62 = vrot.slane %v2551_v47, 5  ;;  %v5127_v11 = vshll.u32 %v10464_v36, 16  ;;  %v2548_v46 = vor.u32 %v2547_v43, %v2543_v26 }
 0x303   : > { %v2530_v52 = vsel %vm10141_vm6, %v2525_v61, %v2529_v48  ;;  %v7029_v40 = vrot.slane %v5119_v16, 11  ;;  %v5126_v7 = vrot.slane %v5124_v0, 7  ;;  %v2539_v57 = vrot.slane %v2538_v5, 4  ;;  %v2274_v48 = vld [vmem:[#allocation2 + $0xe8] sm:$0xf] }
 0x304   : > { %v6915_v20 = vcombine.low %v2520_v38, %v2530_v52  ;;  %v5133_v54 = vshrl.u32 %v10466_v35, 16  ;;  %v5136_v41 = vshll.u32 %v10466_v35, 16  ;;  %v2549_v17 = vrot.slane %v2548_v46, 4  ;;  %v2276_v16 = vld [vmem:[#allocation2 + $0xf8] sm:$0xf] }
 0x305   : > { %v5129_v19 = vor.u32 %v5127_v11, %v5126_v7  ;;  %v5131_v49 = vrot.slane %v5126_v7, 4  ;;  %v5141_v31 = vshrl.u32 %v4864_v33, 16  ;;  %v2544_v15 = vsel %vm10141_vm6, %v2539_v57, %v2543_v26  ;;  %v2277_v11 = vld [vmem:[#allocation2 + $0xfc] sm:$0xf]  ;;  %v2278_v57 = vld [vmem:[#allocation2 + $0x100] sm:$0x1] }
 0x306   : > { %7642 = vmatmul.mubr.bf16.gmra.mrb[20].mxu1 %v6915_v20  ;;  %v5135_v8 = vrot.slane %v5133_v54, 7  ;;  %v5146_v58 = vshrl.u32 %v10474_v12, 16  ;;  %v5149_v56 = vshll.u32 %v10474_v12, 16  ;;  %v2554_v42 = vsel %vm10141_vm6, %v2549_v17, %v2553_v62  ;;  %v4867_v17 = vld [vmem:[#allocation2 + $0x130] sm:$0x8] }
 0x307   : > { %v5130_v39 = vsel %vm9347_vm3, %v7029_v40, %v5129_v19  ;;  %v7030_v51 = vrot.slane %v5141_v31, 11  ;;  %v5155_v55 = vshrl.u32 %v10478_v45, 16  ;;  %v6916_v37 = vcombine.low %v2544_v15, %v2554_v42  ;;  %v10496_v15 = vld [vmem:[#allocation2 + $0x134] sm:$0xf] }
 0x308   : > { %v5138_v59 = vor.u32 %v5136_v41, %v5135_v8  ;;  %v5148_v29 = vrot.slane %v5146_v58, 7  ;;  %v5158_v34 = vshll.u32 %v10478_v45, 16  ;;  %v2556_v21 = vshrl.u32 %v2273_v50, 16 }
 0x309   : > { %v5157_v1 = vrot.slane %v5155_v55, 7  ;;  %v2559_v3 = vshll.u32 %v2273_v50, 16  ;;  %v2565_v30 = vshll.u32 %v2274_v48, 16  ;;  %7645 = vmatprep.mubr.bf16.mxu1 %v6916_v37  ;;  %v2569_v43 = vshrl.u32 %v2274_v48, 16  ;;  %v10498_v55 = vld [vmem:[#allocation2 + $0x138] sm:$0xf] }
 0x30a   : > { %v5139_v26 = vsel %vm9347_vm3, %v5131_v49, %v5138_v59  ;;  %v5151_v47 = vor.u32 %v5149_v56, %v5148_v29  ;;  %v5153_v61 = vrot.slane %v5148_v29, 4  ;;  %v2558_v5 = vrot.slane %v2556_v21, 4  ;;  %v10503_v21 = vld [vmem:[#allocation2 + $0x148] sm:$0xf] }
 0x30b   : > { %v7045_v0 = vcombine.low %v5130_v39, %v5139_v26  ;;  %v5160_v38 = vor.u32 %v5158_v34, %v5157_v1  ;;  %v2561_v62 = vrot.slane %v2559_v3, 5  ;;  %v2567_v52 = vrot.slane %v2565_v30, 5 }
 0x30c   : > { %v5152_v33 = vsel %vm9347_vm3, %v7030_v51, %v5151_v47  ;;  %v2571_v46 = vrot.slane %v2569_v43, 4  ;;  %v2575_v40 = vshll.u32 %v2275_v4, 16  ;;  %v2580_v54 = vshrl.u32 %v2276_v16, 16  ;;  %v4870_v4 = vld [vmem:[#allocation2 + $0x144] sm:$0x8] }
 0x30d   : > { %7838 = vmatmul.mubr.bf16.gmra.mrb[20].mxu0 %v7045_v0  ;;  %v5161_v7 = vsel %vm9347_vm3, %v5153_v61, %v5160_v38  ;;  %v2562_v20 = vor.u32 %v2561_v62, %v2558_v5  ;;  %v2583_v41 = vshll.u32 %v2276_v16, 16  ;;  %v2589_v50 = vshll.u32 %v2277_v11, 16  ;;  %v10510_v62 = vld [vmem:[#allocation2 + $0x14c] sm:$0xf] }
 0x30e   : > { %v7046_v19 = vcombine.low %v5152_v33, %v5161_v7  ;;  %v2572_v49 = vor.u32 %v2571_v46, %v2567_v52  ;;  %v2577_v31 = vrot.slane %v2575_v40, 5  ;;  %v2582_v58 = vrot.slane %v2580_v54, 4 }
 0x30f   : > { %v2563_v8 = vrot.slane %v2562_v20, 4  ;;  %v2585_v56 = vrot.slane %v2583_v41, 5  ;;  %v2593_v48 = vshrl.u32 %v2277_v11, 16  ;;  %v2591_v39 = vrot.slane %v2589_v50, 5  ;;  %v2279_v20 = vld [vmem:[#allocation2 + $0x10c] sm:$0xf] }
 0x310   : > { %7841 = vmatprep.mubr.bf16.mxu0 %v7046_v19  ;;  %v2573_v42 = vrot.slane %v2572_v49, 4  ;;  %v2599_v51 = vshll.u32 %v2278_v57, 16  ;;  %v5163_v37 = vshrl.u32 %v4867_v17, 16  ;;  %v5168_v1 = vshrl.u32 %v10496_v15, 16  ;;  %v2280_v19 = vld [vmem:[#allocation2 + $0x110] sm:$0xf] }
 0x311   : > { %v2568_v59 = vsel %vm10141_vm6, %v2563_v8, %v2567_v52  ;;  %v2586_v29 = vor.u32 %v2585_v56, %v2582_v58  ;;  %v2595_v34 = vrot.slane %v2593_v48, 4  ;;  %v5171_v47 = vshll.u32 %v10496_v15, 16  ;;  %v2281_v58 = vld [vmem:[#allocation2 + $0x114] sm:$0x1] }
 0x312   : > { %v2578_v3 = vsel %vm10141_vm6, %v2573_v42, %v2577_v31  ;;  %v2601_v30 = vrot.slane %v2599_v51, 5  ;;  %v7031_v26 = vrot.slane %v5163_v37, 11  ;;  %v5170_v0 = vrot.slane %v5168_v1, 7 }
 0x313   : > { %v6917_v61 = vcombine.low %v2568_v59, %v2578_v3  ;;  %v2587_v43 = vrot.slane %v2586_v29, 4  ;;  %v2596_v16 = vor.u32 %v2595_v34, %v2591_v39  ;;  %v5177_v38 = vshrl.u32 %v10498_v55, 16  ;;  %v2282_v34 = vld [vmem:[#allocation2 + $0x120] sm:$0xf] }
 0x314   : > { %v5180_v5 = vshll.u32 %v10498_v55, 16  ;;  %v5185_v11 = vshrl.u32 %v4870_v4, 16  ;;  %v5190_v33 = vshrl.u32 %v10503_v21, 16  ;;  %v5173_v40 = vor.u32 %v5171_v47, %v5170_v0 }
 0x315   : > { %7646 = vmatmul.mubr.bf16.gmra.mrb[24].mxu1 %v6917_v61  ;;  %v2592_v52 = vsel %vm10141_vm6, %v2587_v43, %v2591_v39  ;;  %v2597_v46 = vrot.slane %v2596_v16, 4  ;;  %v5175_v7 = vrot.slane %v5170_v0, 4  ;;  %v5179_v57 = vrot.slane %v5177_v38, 7 }
 0x316   : > { %v7032_v54 = vrot.slane %v5185_v11, 11  ;;  %v5192_v41 = vrot.slane %v5190_v33, 7  ;;  %v5193_v17 = vshll.u32 %v10503_v21, 16  ;;  %v5174_v31 = vsel %vm9347_vm3, %v7031_v26, %v5173_v40  ;;  %v2283_v26 = vld [vmem:[#allocation2 + $0x124] sm:$0xf] }
 0x317   : > { %v2602_v49 = vsel %vm10141_vm6, %v2597_v46, %v2601_v30  ;;  %v5199_v50 = vshrl.u32 %v10510_v62, 16  ;;  %v5202_v8 = vshll.u32 %v10510_v62, 16  ;;  %v5182_v48 = vor.u32 %v5180_v5, %v5179_v57  ;;  %v2284_v11 = vld [vmem:[#allocation2 + $0x128] sm:$0x1]  ;;  %v10528_v57 = vld [vmem:[#allocation2 + $0x15c] sm:$0xf] }
 0x318   : > { %v6918_v56 = vcombine.low %v2592_v52, %v2602_v49  ;;  %v5195_v42 = vor.u32 %v5193_v17, %v5192_v41  ;;  %v5197_v39 = vrot.slane %v5192_v41, 4  ;;  %v2604_v37 = vshrl.u32 %v2279_v20, 16 }
 0x319   : > { %v5201_v51 = vrot.slane %v5199_v50, 7  ;;  %v2607_v59 = vshll.u32 %v2279_v20, 16  ;;  %v2613_v29 = vshll.u32 %v2280_v19, 16  ;;  %v5183_v1 = vsel %vm9347_vm3, %v5175_v7, %v5182_v48  ;;  %v4873_v20 = vld [vmem:[#allocation2 + $0x158] sm:$0x8] }
 0x31a   : > { %7649 = vmatprep.mubr.bf16.mxu1 %v6918_v56  ;;  %v5196_v4 = vsel %vm9347_vm3, %v7032_v54, %v5195_v42  ;;  %v2617_v3 = vshrl.u32 %v2280_v19, 16  ;;  %v2623_v30 = vshll.u32 %v2281_v58, 16  ;;  %v7047_v47 = vcombine.low %v5174_v31, %v5183_v1  ;;  %v10530_v48 = vld [vmem:[#allocation2 + $0x160] sm:$0xf] }
 0x31b   : > { %v5204_v61 = vor.u32 %v5202_v8, %v5201_v51  ;;  %v2606_v43 = vrot.slane %v2604_v37, 4  ;;  %v2609_v16 = vrot.slane %v2607_v59, 5  ;;  %v2615_v0 = vrot.slane %v2613_v29, 5 }
 0x31c   : > { %v2619_v38 = vrot.slane %v2617_v3, 4  ;;  %v2625_v5 = vrot.slane %v2623_v30, 5  ;;  %v2628_v33 = vshrl.u32 %v2282_v34, 16  ;;  %7842 = vmatmul.mubr.bf16.gmra.mrb[24].mxu0 %v7047_v47  ;;  %v2631_v40 = vshll.u32 %v2282_v34, 16  ;;  %v2285_v30 = vld [vmem:[#allocation2 + $0x134] sm:$0xf] }
 0x31d   : > { %v5205_v52 = vsel %vm9347_vm3, %v5197_v39, %v5204_v61  ;;  %v2610_v46 = vor.u32 %v2609_v16, %v2606_v43  ;;  %v2637_v7 = vshll.u32 %v2283_v26, 16  ;;  %v2641_v19 = vshrl.u32 %v2283_v26, 16  ;;  %v2286_v16 = vld [vmem:[#allocation2 + $0x138] sm:$0xf] }
 0x31e   : > { %v7048_v54 = vcombine.low %v5196_v4, %v5205_v52  ;;  %v2620_v41 = vor.u32 %v2619_v38, %v2615_v0  ;;  %v2630_v17 = vrot.slane %v2628_v33, 4  ;;  %v2633_v31 = vrot.slane %v2631_v40, 5  ;;  %v10540_v38 = vld [vmem:[#allocation2 + $0xbc] sm:$0xf] }
 0x31f   : > { %v2611_v49 = vrot.slane %v2610_v46, 4  ;;  %v2639_v50 = vrot.slane %v2637_v7, 5  ;;  %v2647_v8 = vshll.u32 %v2284_v11, 16  ;;  %v2643_v56 = vrot.slane %v2641_v19, 4  ;;  %v2287_v46 = vld [vmem:[#allocation2 + $0x13c] sm:$0x1] }
 0x320   : > { %7845 = vmatprep.mubr.bf16.mxu0 %v7048_v54  ;;  %v2621_v58 = vrot.slane %v2620_v41, 4  ;;  %v5207_v42 = vshrl.u32 %v4873_v20, 16  ;;  %v5212_v39 = vshrl.u32 %v10528_v57, 16  ;;  %v2634_v37 = vor.u32 %v2633_v31, %v2630_v17  ;;  %v2997_v54 = vld [vmem:[#allocation2 + $0x18] sm:$0x8] }
 0x321   : > { %v2616_v51 = vsel %vm10141_vm6, %v2611_v49, %v2615_v0  ;;  %v2649_v59 = vrot.slane %v2647_v8, 5  ;;  %v5215_v29 = vshll.u32 %v10528_v57, 16  ;;  %v2644_v1 = vor.u32 %v2643_v56, %v2639_v50 }
 0x322   : > { %v2626_v34 = vsel %vm10141_vm6, %v2621_v58, %v2625_v5  ;;  %v7033_v4 = vrot.slane %v5207_v42, 11  ;;  %v5214_v3 = vrot.slane %v5212_v39, 7  ;;  %v2635_v47 = vrot.slane %v2634_v37, 4  ;;  %v3000_v37 = vld [vmem:[#allocation2 + $0x2c] sm:$0x8] }
 0x323   : > { %v6919_v26 = vcombine.low %v2616_v51, %v2626_v34  ;;  %v5221_v61 = vshrl.u32 %v10530_v48, 16  ;;  %v5224_v43 = vshll.u32 %v10530_v48, 16  ;;  %v3230_v0 = vshll.u32 %v10540_v38, 16 }
 0x324   : > { %v2645_v11 = vrot.slane %v2644_v1, 4  ;;  %v5217_v33 = vor.u32 %v5215_v29, %v5214_v3  ;;  %v5219_v52 = vrot.slane %v5214_v3, 4  ;;  %v2640_v5 = vsel %vm10141_vm6, %v2635_v47, %v2639_v50  ;;  %v11302_v3 = vld [vmem:[#allocation37_spill] sm:$0xff]  ;;  %v3003_v47 = vld [vmem:[#allocation2 + $0x40] sm:$0x8] }
 0x325   : > { %7650 = vmatmul.mubr.bf16.gmra.mrb[28].mxu1 %v6919_v26  ;;  %v5223_v40 = vrot.slane %v5221_v61, 7  ;;  %v2652_v7 = vshrl.u32 %v2285_v30, 16  ;;  %v2655_v20 = vshll.u32 %v2285_v30, 16  ;;  %v2661_v19 = vshll.u32 %v2286_v16, 16 }
 0x326   : > { %v2650_v41 = vsel %vm10141_vm6, %v2645_v11, %v2649_v59  ;;  %v5218_v17 = vsel %vm9347_vm3, %v7033_v4, %v5217_v33  ;;  %v2665_v49 = vshrl.u32 %v2286_v16, 16  ;;  %v2671_v51 = vshll.u32 %v2287_v46, 16  ;;  %v11301_v4 = vld [vmem:[#allocation40_spill] sm:$0xff]  ;;  %v8620_v33 = vld [vmem:[#allocation2 + $0x30] sm:$0xf] }
 0x327   : > { %v6920_v31 = vcombine.low %v2640_v5, %v2650_v41  ;;  %v5226_v8 = vor.u32 %v5224_v43, %v5223_v40  ;;  %v2654_v58 = vrot.slane %v2652_v7, 4  ;;  %v2657_v56 = vrot.slane %v2655_v20, 5  ;;  %v8621_v46 = vld [vmem:[#allocation2 + $0x34] sm:$0xf]  ;;  %v11304_v20 = vld [vmem:[#allocation48_spill] sm:$0xff] }
 0x328   : > { %v2663_v42 = vrot.slane %v2661_v19, 5  ;;  %v2667_v39 = vrot.slane %v2665_v49, 4  ;;  %v3046_v50 = vshrl.u32 %v2997_v54, 16  ;;  %v11300_v29 = vshrl.u32 %v10045_v9, 16  ;;  %v11305_v54 = vld [vmem:[#allocation41_spill] sm:$0xff]  ;;  %v11307_v49 = vld [vmem:[#allocation18_spill] sm:$0xff] }
 0x329   : > { %7653 = vmatprep.mubr.bf16.mxu1 %v6920_v31  ;;  %v5227_v59 = vsel %vm9347_vm3, %v5219_v52, %v5226_v8  ;;  %v2658_v1 = vor.u32 %v2657_v56, %v2654_v58  ;;  %v11303_v30 = vrot.slane %v11302_v3, 4  ;;  %v2673_v16 = vrot.slane %v2671_v51, 5  ;;  %v11308_v8 = vld [vmem:[#allocation50_spill] sm:$0xff] }
 0x32a   : > { %v10551_v34 = vrot.slane %v11300_v29, 7  ;;  %v7049_v61 = vcombine.low %v5218_v17, %v5227_v59  ;;  %v2668_v43 = vor.u32 %v2667_v39, %v2663_v42  ;;  %v6930_v11 = vrot.slane %v3046_v50, 11  ;;  %v11309_v58 = vld [vmem:[#allocation38_spill] sm:$0xff] }
 0x32b   : > { %v3066_v26 = vsel %vm9347_vm3, %v11303_v30, %v11301_v4  ;;  %v7058_v5 = vcombine.low %v8620_v33, %v8621_v46  ;;  %v2659_v40 = vrot.slane %v2658_v1, 4  ;;  %v3068_v7 = vshrl.u32 %v3000_v37, 16  ;;  %v3006_v51 = vld [vmem:[#allocation2 + $0x54] sm:$0x8]  ;;  %v8622_v46 = vld [vmem:[#allocation2 + $0x44] sm:$0xf] }
 0x32c   : > { %v11306_v52 = vrot.slane %v11305_v54, 4  ;;  %7846 = vmatmul.mubr.bf16.gmra.mrb[28].mxu0 %v7049_v61  ;;  %v2669_v19 = vrot.slane %v2668_v43, 4  ;;  %v3057_v17 = vsel %vm9347_vm3, %v6930_v11, %v11307_v49  ;;  %v3090_v31 = vshrl.u32 %v3003_v47, 16  ;;  %v11312_v47 = vld [vmem:[#allocation51_spill] sm:$0xff]  ;;  %v11317_v49 = vld [vmem:[#allocation42_spill] sm:$0xff] }
 0x32d   : > { %v11310_v56 = vshll.u32 %v11309_v58, 16  ;;  %7865 = vmatprep.mubr.bf16.mxu0 %v7058_v5  ;;  %v2664_v50 = vsel %vm10141_vm6, %v2659_v40, %v2663_v42  ;;  %v6946_v37 = vcombine.low %v3057_v17, %v3066_v26  ;;  %v6931_v29 = vrot.slane %v3068_v7, 11  ;;  %v11313_v61 = vld [vmem:[#allocation39_spill] sm:$0xff]  ;;  %v8623_v5 = vld [vmem:[#allocation2 + $0x48] sm:$0xf] }
 0x32e   : > { %v3088_v41 = vsel %vm9347_vm3, %v11306_v52, %v11304_v20  ;;  %v3102_v59 = vrot.slane %v11308_v8, 4  ;;  %v11311_v1 = vshrl.u32 %v10047_v25, 16  ;;  %v2674_v3 = vsel %vm10141_vm6, %v2669_v19, %v2673_v16  ;;  %v11315_v26 = vld [vmem:[#allocation13_spill] sm:$0xff]  ;;  %v11316_v19 = vld [vmem:[#allocation52_spill] sm:$0xff] }
 0x32f   : > { %v3100_v39 = vor.u32 %v11310_v56, %v11308_v8  ;;  %v6932_v30 = vrot.slane %v3090_v31, 11  ;;  %v11314_v43 = vshll.u32 %v11313_v61, 16  ;;  %v6921_v33 = vcombine.low %v2664_v50, %v2674_v3  ;;  %v3009_v20 = vld [vmem:[#allocation2 + $0x68] sm:$0x8]  ;;  %v11319_v50 = vld [vmem:[#allocation54_spill] sm:$0xff] }
 0x330   : > { %v10576_v4 = vrot.slane %v11311_v1, 7  ;;  %v7059_v42 = vcombine.low %v8622_v46, %v8623_v5  ;;  %v3079_v40 = vsel %vm9347_vm3, %v6931_v29, %v11315_v26  ;;  %v3112_v7 = vshrl.u32 %v3006_v51, 16  ;;  %v11320_v29 = vld [vmem:[#allocation43_spill] sm:$0xff]  ;;  %v8458_v3 = vld [vmem:[#allocation8 + $0x208] sm:$0xff]  }
 0x331   : > { %v3109_v11 = vor.u32 %v11314_v43, %v11312_v47  ;;  %v6947_v54 = vcombine.low %v3079_v40, %v3088_v41  ;;  %v3101_v52 = vsel %vm9347_vm3, %v6932_v30, %v3100_v39  ;;  %v11318_v17 = vshll.u32 %v11317_v49, 16  ;;  %7654 = vmatmul.mubr.bf16.gmra.mrb[32].mxu1 %v6921_v33  ;;  %v3012_v41 = vld [vmem:[#allocation2 + $0x7c] sm:$0x8]  ;;  %v11322_v30 = vld [vmem:[#allocation16_spill] sm:$0xff]  ;;  %v11326_v33 = vld [vmem:[#allocation45_spill] sm:$0xff] }
 0x332   : > { %v6933_v58 = vrot.slane %v3112_v7, 11  ;;  %v3124_v56 = vrot.slane %v11316_v19, 4  ;;  %v11321_v51 = vshll.u32 %v11320_v29, 16  ;;  %7673 = vmatprep.mubr.bf16.mxu1 %v6946_v37  ;;  %v3134_v39 = vshrl.u32 %v3009_v20, 16  ;;  %v11323_v47 = vld [vmem:[#allocation44_spill] sm:$0xff] }
 0x333   : > { %v3110_v16 = vsel %vm9347_vm3, %v3102_v59, %v3109_v11  ;;  %v3122_v31 = vor.u32 %v11318_v17, %v11316_v19  ;;  %v11324_v59 = vshll.u32 %v11323_v47, 16  ;;  %v3146_v43 = vrot.slane %v11322_v30, 4  ;;  %v11325_v11 = vld [vmem:[#allocation55_spill] sm:$0xff]  ;;  %v3015_v26 = vld [vmem:[#allocation2 + $0x90] sm:$0x8] }
 0x334   : > { %v6948_v8 = vcombine.low %v3101_v52, %v3110_v16  ;;  %v3131_v1 = vor.u32 %v11321_v51, %v11319_v50  ;;  %v11327_v46 = vshll.u32 %v11326_v33, 16  ;;  %v10604_v40 = vld [vmem:[#allocation2 + $0x148] sm:$0xf]  ;;  %v8625_v52 = vld [vmem:[#allocation2 + $0x58] sm:$0xf]  ;;  %7866 = vmatmul.mubr.bf16.vlgmr.msra.gmra.mrb[0].mxu0 %v7059_v42  ;;  %v6934_v17 = vrot.slane %v3134_v39, 11 }
 0x335   : > { %v3144_v61 = vor.u32 %v11324_v59, %v11322_v30  ;;  %v3381_v7 = vshrl.u32 %v10604_v40, 16  ;;  %v8626_v16 = vld [vmem:[#allocation2 + $0x5c] sm:$0xf]  ;;  %v3123_v20 = vsel %vm9347_vm3, %v6933_v58, %v3122_v31  ;;  %v3156_v29 = vshrl.u32 %v3012_v41, 16  ;;  %7898 = vmatpush3.bf16.msra.mxu0 %v10403_v32  ;;  %v11328_v51 = vld [vmem:[#allocation57_spill] sm:$0xff]  ;;  %v11331_v58 = vld [vmem:[#allocation58_spill] sm:$0xff] }
 0x336   : > { %v3153_v5 = vor.u32 %v11327_v46, %v11325_v11  ;;  %v7060_v37 = vcombine.low %v8625_v52, %v8626_v16  ;;  %v3132_v19 = vsel %vm9347_vm3, %v3124_v56, %v3131_v1  ;;  %v11329_v30 = vld [vmem:[#allocation53_spill] sm:$0xff]  ;;  %v3168_v31 = vrot.slane %v11328_v51, 4  ;;  %v3018_v33 = vld [vmem:[#allocation2 + $0xa4] sm:$0x8]  ;;  %7899 = vmatprep.subr.bf16.mxu0 %v8458_v3  ;;  %v8461_v41 = vld [vmem:[#allocation8 + $0x210] sm:$0xff]  }
 0x337   : > { %v10611_v49 = vcombine.low %v3123_v20, %v3132_v19  ;;  %v11330_v47 = vshll.u32 %v11329_v30, 16  ;;  %v11332_v11 = vld [vmem:[#allocation17_spill] sm:$0xff]  ;;  %v3178_v1 = vshrl.u32 %v3015_v26, 16  ;;  %v3145_v39 = vsel %vm9347_vm3, %v6934_v17, %v3144_v61  ;;  %v11334_v32 = vld [vmem:[#allocation59_spill] sm:$0xff]  ;;  %v11335_v46 = vld [vmem:[#allocation56_spill] sm:$0xff] }
 0x338   : > { %v3154_v50 = vsel %vm9347_vm3, %v3146_v43, %v3153_v5  ;;  %7869 = vmatprep.mubr.bf16.mxu0 %v7060_v37  ;;  %v11333_v56 = vshll.u32 %v11332_v11, 16  ;;  %v6935_v43 = vrot.slane %v3156_v29, 11  ;;  %v11336_v5 = vshll.u32 %v11335_v46, 16  ;;  %v11337_v26 = vld [vmem:[#allocation67_spill] sm:$0xff]  ;;  %v8627_v29 = vld [vmem:[#allocation2 + $0x6c] sm:$0xf] }
 0x339   : > { %v3166_v59 = vor.u32 %v11330_v47, %v11328_v51  ;;  %v3190_v16 = vrot.slane %v11334_v32, 4  ;;  %v10629_v37 = vcombine.low %v3145_v39, %v3154_v50  ;;  %v6936_v19 = vrot.slane %v3178_v1, 11  ;;  %v11338_v51 = vld [vmem:[#allocation64_spill] sm:$0xff]  ;;  %7674 = vmatmul.mubr.bf16.vlgmr.msra.gmra.mrb[4].mxu1 %v6947_v54  ;;  %7900 = vmatpush3.bf16.msra.mxu0 %v8458_v3 }
 0x33a   : > { %v3175_v42 = vor.u32 %v11333_v56, %v11331_v58  ;;  %v3188_v52 = vor.u32 %v11336_v5, %v11334_v32  ;;  %v11339_v30 = vshll.u32 %v11338_v51, 16  ;;  %v11340_v61 = vshrl.u32 %v10058_v18, 16  ;;  %v8628_v58 = vld [vmem:[#allocation2 + $0x70] sm:$0xf]  ;;  %7677 = vmatprep.mubr.bf16.mxu1 %v6948_v8  ;;  %7901 = vmatprep.subr.bf16.mxu0 %v8461_v41  ;;  %v8464_v32 = vld [vmem:[#allocation8 + $0x218] sm:$0xff]  }
 0x33b   : > { %v7061_v11 = vcombine.low %v8627_v29, %v8628_v58  ;;  %v3167_v56 = vsel %vm9347_vm3, %v6935_v43, %v3166_v59  ;;  %v3200_v50 = vshrl.u32 %v3018_v33, 16  ;;  %v3212_v18 = vrot.slane %v10551_v34, 4  ;;  %v10657_v43 = vld [vmem:[#allocation2 + $0xb8] sm:$0x8]  ;;  %v3024_v5 = vld [vmem:[#allocation2 + $0xcc] sm:$0x8] }
 0x33c   : > { %v3176_v20 = vsel %vm9347_vm3, %v3168_v31, %v3175_v42  ;;  %v3197_v47 = vor.u32 %v11339_v30, %v11337_v26  ;;  %v10638_v17 = vrot.slane %v11340_v61, 7  ;;  %v3189_v31 = vsel %vm9347_vm3, %v6936_v19, %v3188_v52  ;;  %v8631_v19 = vld [vmem:[#allocation2 + $0x84] sm:$0xf]  ;;  %v8632_v51 = vld [vmem:[#allocation2 + $0x94] sm:$0xf] }
 0x33d   : > { %v10642_v39 = vcombine.low %v3167_v56, %v3176_v20  ;;  %v6937_v46 = vrot.slane %v3200_v50, 11  ;;  %v11341_v54 = vshll.u32 %v10045_v9, 16  ;;  %v11342_v59 = vshll.u32 %v10047_v25, 16  ;;  %v8630_v20 = vld [vmem:[#allocation2 + $0x80] sm:$0xf]  ;;  %7870 = vmatmul.mubr.bf16.gmra.mrb[4].mxu0 %v7061_v11 }
 0x33e   : > { %v3198_v42 = vsel %vm9347_vm3, %v3190_v16, %v3197_v47  ;;  %v10659_v52 = vrot.slane %v3381_v7, 7  ;;  %v10661_v16 = vld [vmem:[#allocation2 + $0x14c] sm:$0xf]  ;;  %v7062_v26 = vcombine.low %v8630_v20, %v8631_v19  ;;  %v8633_v30 = vld [vmem:[#allocation2 + $0x98] sm:$0xf]  ;;  %v7065_v61 = vcombine.low %v10407_v60, %v10410_v10  ;;  %7902 = vmatpush3.bf16.msra.mxu0 %v8461_v41 }
 0x33f   : > { %v10649_v1 = vcombine.low %v3189_v31, %v3198_v42  ;;  %v3210_v3 = vor.u32 %v11341_v54, %v10551_v34  ;;  %v3219_v33 = vor.u32 %v11342_v59, %v10576_v4  ;;  %v3390_v8 = vshrl.u32 %v10661_v16, 16  ;;  %v3027_v34 = vld [vmem:[#allocation2 + $0xe0] sm:$0x8]  ;;  %v8634_v47 = vld [vmem:[#allocation2 + $0xa8] sm:$0xf]  ;;  %7903 = vmatprep.subr.bf16.mxu0 %v8464_v32 }
 0x340   : > { %v7063_v9 = vcombine.low %v8632_v51, %v8633_v30  ;;  %v8635_v25 = vld [vmem:[#allocation2 + $0xac] sm:$0xf]  ;;  %7873 = vmatprep.mubr.bf16.mxu0 %v7062_v26  ;;  %v3222_v56 = vshrl.u32 %v10657_v43, 16  ;;  %v10676_v11 = vor.u32 %v3230_v0, %v10638_v17  ;;  %v3244_v50 = vshrl.u32 %v3024_v5, 16  ;;  %v11343_v42 = vld [vmem:[#allocation24_spill] sm:$0xff]  ;;  %v11349_v0 = vld [vmem:[#allocation27_spill] sm:$0xff] }
 0x341   : > { %v7064_v4 = vcombine.low %v8634_v47, %v8635_v25  ;;  %v3211_v7 = vsel %vm9347_vm3, %v6937_v46, %v3210_v3  ;;  %v3220_v29 = vsel %vm9347_vm3, %v3212_v18, %v3219_v33  ;;  %v8467_v31 = vld [vmem:[#allocation8 + $0x220] sm:$0xff]   ;;  %v11344_v54 = vld [vmem:[#allocation20_spill] sm:$0xff]  ;;  %v3256_v18 = vrot.slane %v11343_v42, 4  ;;  %v3030_v26 = vld [vmem:[#allocation2 + $0xf4] sm:$0x8]  ;;  %7678 = vmatmul.mubr.bf16.gmra.mrb[8].mxu1 %v10611_v49 }
 0x342   : > { %v10670_v58 = vcombine.low %v3211_v7, %v3220_v29  ;;  %v11345_v46 = vshll.u32 %v11344_v54, 16  ;;  %v11346_v59 = vld [vmem:[#allocation25_spill] sm:$0xff]  ;;  %v3266_v19 = vshrl.u32 %v3027_v34, 16  ;;  %v6939_v38 = vrot.slane %v3244_v50, 11  ;;  %v11350_v30 = vld [vmem:[#allocation23_spill] sm:$0xff]  ;;  %v11352_v7 = vld [vmem:[#allocation22_spill] sm:$0xff]  ;;  %7904 = vmatpush3.bf16.msra.mxu0 %v8464_v32  ;;  %7681 = vmatprep.mubr.bf16.mxu1 %v10629_v37 }
 0x343   : > { %v11347_v41 = vld [vmem:[#allocation21_spill] sm:$0xff]  ;;  %v11351_v5 = vshll.u32 %v11350_v30, 16  ;;  %v3278_v25 = vrot.slane %v11349_v0, 4  ;;  %v11353_v29 = vld [vmem:[#allocation19_spill] sm:$0xff]  ;;  %7905 = vmatprep.subr.bf16.mxu0 %v8467_v31  ;;  %v11365_v30 = vld [vmem:[#allocation36_spill] sm:$0xff]  ;;  %v11375_v43 = vshll.u32 %v9752_v13, 16 }
 0x344   : > { %v3254_v3 = vor.u32 %v11345_v46, %v11343_v42  ;;  %v11348_v33 = vshll.u32 %v11347_v41, 16  ;;  %v11354_v54 = vshll.u32 %v11353_v29, 16  ;;  %v11355_v34 = vld [vmem:[#allocation29_spill] sm:$0xff]  ;;  %v11356_v41 = vld [vmem:[#allocation26_spill] sm:$0xff] }
 0x345   : > { %v3276_v47 = vor.u32 %v11351_v5, %v11349_v0  ;;  %v7069_v0 = vcombine.low %v10464_v36, %v10466_v35  ;;  %v3288_v5 = vshrl.u32 %v3030_v26, 16  ;;  %v11359_v26 = vshll.u32 %v11280_v63, 16  ;;  %7874 = vmatmul.mubr.bf16.gmra.mrb[8].mxu0 %v7063_v9  ;;  %v5913_v36 = vld [vmem:[#allocation2 + $0x6c] sm:$0xf]  ;;  %v5914_v35 = vld [vmem:[#allocation2 + $0x70] sm:$0xf] }
 0x346   : > { %v3263_v20 = vor.u32 %v11348_v33, %v11346_v59  ;;  %v10693_v46 = vor.u32 %v11354_v54, %v11352_v7  ;;  %v6940_v59 = vrot.slane %v3266_v19, 11  ;;  %v11357_v33 = vshll.u32 %v11356_v41, 16  ;;  %v3033_v7 = vld [vmem:[#allocation2 + $0x108] sm:$0x8]  ;;  %7877 = vmatprep.mubr.bf16.mxu0 %v7064_v4  ;;  %7906 = vmatpush3.bf16.msra.mxu0 %v8467_v31  ;;  %v8473_v4 = vld [vmem:[#allocation8 + $0x230] sm:$0xff]  }
 0x347   : > { %v3255_v50 = vsel %vm9347_vm3, %v6939_v38, %v3254_v3  ;;  %v8470_v3 = vld [vmem:[#allocation8 + $0x228] sm:$0xff]   ;;  %v3036_v38 = vld [vmem:[#allocation2 + $0x11c] sm:$0x8]  ;;  %v6941_v54 = vrot.slane %v3288_v5, 11  ;;  %v7071_v9 = vcombine.low %v10496_v15, %v10498_v55  ;;  %v7072_v31 = vcombine.low %v10503_v21, %v10510_v62 }
 0x348   : > { %v3264_v42 = vsel %vm9347_vm3, %v3256_v18, %v3263_v20  ;;  %v3285_v51 = vor.u32 %v11357_v33, %v11355_v34  ;;  %v3277_v49 = vsel %vm9347_vm3, %v6940_v59, %v3276_v47  ;;  %v11358_v20 = vld [vmem:[#allocation33_spill] sm:$0xff]  ;;  %v11360_v34 = vld [vmem:[#allocation34_spill] sm:$0xff]  ;;  %v3310_v47 = vshrl.u32 %v3033_v7, 16  ;;  %v11362_v59 = vld [vmem:[#allocation35_spill] sm:$0xff]  ;;  %7907 = vmatprep.subr.bf16.mxu0 %v8470_v3 }
 0x349   : > { %v10708_v18 = vcombine.low %v3255_v50, %v3264_v42  ;;  %v3300_v19 = vrot.slane %v11358_v20, 4  ;;  %v3298_v37 = vor.u32 %v11359_v26, %v11358_v20  ;;  %v11361_v42 = vshll.u32 %v11281_v6, 16  ;;  %v11363_v33 = vld [vmem:[#allocation31_spill] sm:$0xff]  ;;  %v3039_v20 = vld [vmem:[#allocation2 + $0x130] sm:$0x8]  ;;  %7682 = vmatmul.mubr.bf16.gmra.mrb[12].mxu1 %v10642_v39 }
 0x34a   : > { %v3286_v32 = vsel %vm9347_vm3, %v3278_v25, %v3285_v51  ;;  %v11364_v51 = vshll.u32 %v11363_v33, 16  ;;  %v3322_v50 = vrot.slane %v11362_v59, 4  ;;  %v3332_v7 = vshrl.u32 %v3036_v38, 16  ;;  %v11370_v38 = vld [vmem:[#allocation62_spill] sm:$0xff]  ;;  %7908 = vmatpush3.bf16.msra.mxu0 %v8470_v3  ;;  %7685 = vmatprep.mubr.bf16.mxu1 %v10649_v1  ;;  %v8476_v3 = vld [vmem:[#allocation8 + $0x238] sm:$0xff]  }
 0x34b   : > { %v10715_v29 = vcombine.low %v3277_v49, %v3286_v32  ;;  %v3307_v41 = vor.u32 %v11361_v42, %v11360_v34  ;;  %v11366_v49 = vld [vmem:[#allocation32_spill] sm:$0xff]  ;;  %v3299_v63 = vsel %vm9347_vm3, %v6941_v54, %v3298_v37  ;;  %v6942_v34 = vrot.slane %v3310_v47, 11  ;;  %v11368_v37 = vld [vmem:[#allocation61_spill] sm:$0xff]  ;;  %7909 = vmatprep.subr.bf16.mxu0 %v8473_v4  ;;  %v11374_v39 = vld [vmem:[#allocation66_spill] sm:$0xff] }
 0x34c   : > { %v3320_v25 = vor.u32 %v11364_v51, %v11362_v59  ;;  %v11367_v32 = vshll.u32 %v11366_v49, 16  ;;  %v6943_v54 = vrot.slane %v3332_v7, 11  ;;  %v11371_v59 = vshll.u32 %v9748_v44, 16 }
 0x34d   : > { %v3308_v6 = vsel %vm9347_vm3, %v3300_v19, %v3307_v41  ;;  %v11369_v19 = vshll.u32 %v9746_v14, 16  ;;  %v3344_v41 = vrot.slane %v11368_v37, 4  ;;  %v3354_v51 = vshrl.u32 %v3039_v20, 16  ;;  %7878 = vmatmul.mubr.bf16.gmra.mrb[12].mxu0 %v7065_v61 }
 0x34e   : > { %v3329_v5 = vor.u32 %v11367_v32, %v11365_v30  ;;  %v10736_v26 = vcombine.low %v3299_v63, %v3308_v6  ;;  %v3351_v33 = vor.u32 %v11371_v59, %v11370_v38  ;;  %v3321_v47 = vsel %vm9347_vm3, %v6942_v34, %v3320_v25  ;;  %v3042_v6 = vld [vmem:[#allocation2 + $0x144] sm:$0x8]  ;;  %7910 = vmatpush3.bf16.msra.mxu0 %v8473_v4 }
 0x34f   : > { %v3342_v42 = vor.u32 %v11369_v19, %v11368_v37  ;;  %v11373_v49 = vshll.u32 %v9750_v53, 16  ;;  %v6938_v14 = vrot.slane %v3222_v56, 11  ;;  %v6944_v7 = vrot.slane %v3354_v51, 11  ;;  %7911 = vmatprep.subr.bf16.mxu0 %v8476_v3 }
 0x350   : > { %v3330_v30 = vsel %vm9347_vm3, %v3322_v50, %v3329_v5  ;;  %v11372_v50 = vld [vmem:[#allocation65_spill] sm:$0xff]  ;;  %v3352_v25 = vsel %vm9347_vm3, %v3344_v41, %v3351_v33  ;;  %v3373_v56 = vor.u32 %v11375_v43, %v11374_v39  ;;  %v7073_v20 = vcombine.low %v10528_v57, %v10530_v48  ;;  %v5911_v39 = vld [vmem:[#allocation2 + $0x5c] sm:$0xf] }
 0x351   : > { %v3364_v32 = vor.u32 %v11373_v49, %v11372_v50  ;;  %v3366_v5 = vrot.slane %v11372_v50, 4  ;;  %v10758_v63 = vcombine.low %v3321_v47, %v3330_v30  ;;  %v3343_v44 = vsel %vm9347_vm3, %v6943_v54, %v3342_v42  ;;  %v8636_v30 = vld [vmem:[#allocation2 + $0xd0] sm:$0xf]  ;;  %v8637_v54 = vld [vmem:[#allocation2 + $0xd4] sm:$0xf]  ;;  %7686 = vmatmul.mubr.bf16.gmra.mrb[16].mxu1 %v10670_v58 }
 0x352   : > { %v10765_v53 = vcombine.low %v3343_v44, %v3352_v25  ;;  %v3392_v34 = vrot.slane %v3390_v8, 7  ;;  %v7066_v37 = vcombine.low %v8636_v30, %v8637_v54  ;;  %v3384_v1 = vshll.u32 %v10604_v40, 16  ;;  %7912 = vmatpush3.bf16.msra.mxu0 %v8476_v3  ;;  %v5905_v47 = vld [vmem:[#allocation2 + $0x34] sm:$0xf]  ;;  %v5908_v50 = vld [vmem:[#allocation2 + $0x48] sm:$0xf] }
 0x353   : > { %v3365_v13 = vsel %vm9347_vm3, %v6944_v7, %v3364_v32  ;;  %v3374_v19 = vsel %vm9347_vm3, %v3366_v5, %v3373_v56  ;;  %v3376_v42 = vshrl.u32 %v3042_v6, 16  ;;  %v3393_v41 = vshll.u32 %v10661_v16, 16  ;;  %v5910_v7 = vld [vmem:[#allocation2 + $0x58] sm:$0xf] }
 0x354   : > { %7881 = vmatprep.mubr.bf16.mxu0 %v7066_v37  ;;  %v3233_v8 = vsel %vm9347_vm3, %v6938_v14, %v10676_v11  ;;  %v11376_v40 = vrot.slane %v10638_v17, 4  ;;  %v10791_v10 = vcombine.low %v3365_v13, %v3374_v19  ;;  %v3386_v38 = vor.u32 %v3384_v1, %v10659_v52  ;;  %v5904_v17 = vld [vmem:[#allocation2 + $0x30] sm:$0xf] }
 0x355   : > { %v6945_v61 = vrot.slane %v3376_v42, 11  ;;  %v3388_v16 = vrot.slane %v10659_v52, 4  ;;  %v3395_v59 = vor.u32 %v3393_v41, %v3392_v34  ;;  %v7067_v4 = vcombine.low %v10432_v27, %v10434_v22  ;;  %v5907_v52 = vld [vmem:[#allocation2 + $0x44] sm:$0xf]  ;;  %v5906_v27 = vld [vmem:[#allocation2 + $0x38] sm:$0x1] }
 0x356   : > { %v3242_v60 = vsel %vm9347_vm3, %v11376_v40, %v10693_v46  ;;  %v7068_v49 = vcombine.low %v10439_v24, %v10446_v23  ;;  %v5953_v32 = vshrl.u32 %v5904_v17, 16  ;;  %v5956_v58 = vshll.u32 %v5904_v17, 16  ;;  %v5909_v24 = vld [vmem:[#allocation2 + $0x4c] sm:$0x1] }
 0x357   : > { %v6954_v33 = vcombine.low %v3233_v8, %v3242_v60  ;;  %v3387_v11 = vsel %vm9347_vm3, %v6945_v61, %v3386_v38  ;;  %v3396_v46 = vsel %vm9347_vm3, %v3388_v16, %v3395_v59  ;;  %7882 = vmatmul.mubr.bf16.gmra.mrb[16].mxu0 %v7067_v4  ;;  %v5962_v5 = vshll.u32 %v5905_v47, 16  ;;  %v5912_v61 = vld [vmem:[#allocation2 + $0x60] sm:$0x1] }
 0x358   : > { %v10802_v51 = vcombine.low %v3387_v11, %v3396_v46  ;;  %v5966_v14 = vshrl.u32 %v5905_v47, 16  ;;  %7885 = vmatprep.mubr.bf16.mxu0 %v7068_v49  ;;  %v5977_v44 = vshrl.u32 %v5907_v52, 16  ;;  %v5980_v2 = vshll.u32 %v5907_v52, 16  ;;  %v5916_v46 = vld [vmem:[#allocation2 + $0x80] sm:$0xf] }
 0x359   : > { %7689 = vmatprep.mubr.bf16.mxu1 %v6954_v33  ;;  %v5986_v25 = vshll.u32 %v5908_v50, 16  ;;  %v5990_v6 = vshrl.u32 %v5908_v50, 16  ;;  %v5955_v22 = vrot.slane %v5953_v32, 4  ;;  %v5958_v43 = vrot.slane %v5956_v58, 5  ;;  %v5917_v50 = vld [vmem:[#allocation2 + $0x84] sm:$0xf] }
 0x35a   : > { %v10806_v56 = vrot.slane %v5962_v5, 5  ;;  %v5968_v3 = vrot.slane %v5966_v14, 4  ;;  %7690 = vmatmul.mubr.bf16.gmra.mrb[20].mxu1 %v10708_v18  ;;  %v5979_v23 = vrot.slane %v5977_v44, 4  ;;  %v5982_v34 = vrot.slane %v5980_v2, 5  ;;  %v5915_v5 = vld [vmem:[#allocation2 + $0x74] sm:$0x1] }
 0x35b   : > { %v10809_v30 = vrot.slane %v5986_v25, 5  ;;  %v5992_v54 = vrot.slane %v5990_v6, 4  ;;  %7693 = vmatprep.mubr.bf16.mxu1 %v10715_v29  ;;  %v6001_v37 = vshrl.u32 %v5910_v7, 16  ;;  %v6004_v1 = vshll.u32 %v5910_v7, 16 }
 0x35c   : > { %v6010_v13 = vshll.u32 %v5911_v39, 16  ;;  %v6014_v19 = vshrl.u32 %v5911_v39, 16  ;;  %v5959_v42 = vor.u32 %v5958_v43, %v5955_v22  ;;  %v5969_v41 = vor.u32 %v5968_v3, %v10806_v56 }
 0x35d   : > { %v5972_v18 = vshll.u32 %v5906_v27, 16  ;;  %v5996_v8 = vshll.u32 %v5909_v24, 16  ;;  %v11377_v40 = vcombine.low %v10474_v12, %v10478_v45  ;;  %v5983_v60 = vor.u32 %v5982_v34, %v5979_v23  ;;  %v5919_v27 = vld [vmem:[#allocation2 + $0x94] sm:$0xf] }
 0x35e   : > { %v5993_v29 = vor.u32 %v5992_v54, %v10809_v30  ;;  %v6003_v38 = vrot.slane %v6001_v37, 4  ;;  %v6006_v16 = vrot.slane %v6004_v1, 5  ;;  %v10820_v59 = vrot.slane %v6010_v13, 5  ;;  %v5918_v54 = vld [vmem:[#allocation2 + $0x88] sm:$0x1] }
 0x35f   : > { %7886 = vmatmul.mubr.bf16.gmra.mrb[20].mxu0 %v7069_v0  ;;  %v6016_v33 = vrot.slane %v6014_v19, 4  ;;  %v5960_v0 = vrot.slane %v5959_v42, 4  ;;  %v5970_v11 = vrot.slane %v5969_v41, 4  ;;  %v5974_v17 = vrot.slane %v5972_v18, 5  ;;  %v5920_v37 = vld [vmem:[#allocation2 + $0x98] sm:$0xf] }
 0x360   : > { %7889 = vmatprep.mubr.bf16.mxu0 %v11377_v40  ;;  %v5998_v47 = vrot.slane %v5996_v8, 5  ;;  %v5984_v12 = vrot.slane %v5983_v60, 4  ;;  %v5994_v45 = vrot.slane %v5993_v29, 4  ;;  %v6020_v4 = vshll.u32 %v5912_v61, 16  ;;  %v5922_v18 = vld [vmem:[#allocation2 + $0xa8] sm:$0xf] }
 0x361   : > { %v6025_v52 = vshrl.u32 %v5913_v36, 16  ;;  %v6007_v49 = vor.u32 %v6006_v16, %v6003_v38  ;;  %v6017_v32 = vor.u32 %v6016_v33, %v10820_v59  ;;  %v6028_v58 = vshll.u32 %v5913_v36, 16  ;;  %v5923_v29 = vld [vmem:[#allocation2 + $0xac] sm:$0xf]  ;;  %v5925_v61 = vld [vmem:[#allocation2 + $0xbc] sm:$0xf] }
 0x362   : > { %7694 = vmatmul.mubr.bf16.gmra.mrb[24].mxu1 %v10736_v26  ;;  %v6034_v14 = vshll.u32 %v5914_v35, 16  ;;  %v6038_v44 = vshrl.u32 %v5914_v35, 16  ;;  %v6049_v2 = vshrl.u32 %v5916_v46, 16  ;;  %v6052_v25 = vshll.u32 %v5916_v46, 16  ;;  %v5926_v33 = vld [vmem:[#allocation2 + $0xc0] sm:$0xf] }
 0x363   : > { %7697 = vmatprep.mubr.bf16.mxu1 %v10758_v63  ;;  %v5965_v26 = vsel %vm10141_vm6, %v5960_v0, %v10806_v56  ;;  %v5975_v63 = vsel %vm10141_vm6, %v5970_v11, %v5974_v17  ;;  %v6058_v6 = vshll.u32 %v5917_v50, 16  ;;  %v6062_v7 = vshrl.u32 %v5917_v50, 16 }
 0x364   : > { %v5989_v39 = vsel %vm10141_vm6, %v5984_v12, %v10809_v30  ;;  %v5999_v15 = vsel %vm10141_vm6, %v5994_v45, %v5998_v47  ;;  %v10841_v55 = vrot.slane %v6020_v4, 5  ;;  %v6008_v22 = vrot.slane %v6007_v49, 4 }
 0x365   : > { %v6018_v43 = vrot.slane %v6017_v32, 4  ;;  %v6030_v56 = vrot.slane %v6028_v58, 5  ;;  %v6044_v3 = vshll.u32 %v5915_v5, 16  ;;  %v10843_v24 = vrot.slane %v6034_v14, 5  ;;  %v5921_v32 = vld [vmem:[#allocation2 + $0x9c] sm:$0x1] }
 0x366   : > { %v6040_v23 = vrot.slane %v6038_v44, 4  ;;  %v6051_v21 = vrot.slane %v6049_v2, 4  ;;  %v6054_v62 = vrot.slane %v6052_v25, 5  ;;  %v6064_v34 = vrot.slane %v6062_v7, 4  ;;  %v5924_v2 = vld [vmem:[#allocation2 + $0xb0] sm:$0x1] }
 0x367   : > { %7890 = vmatmul.mubr.bf16.gmra.mrb[24].mxu0 %v7071_v9  ;;  %v6027_v9 = vrot.slane %v6025_v52, 4  ;;  %v6073_v30 = vshrl.u32 %v5919_v27, 16  ;;  %v6076_v1 = vshll.u32 %v5919_v27, 16  ;;  %v7082_v13 = vcombine.low %v5965_v26, %v5975_v63 }
 0x368   : > { %7893 = vmatprep.mubr.bf16.mxu0 %v7072_v31  ;;  %v10845_v31 = vrot.slane %v6058_v6, 5  ;;  %v7083_v19 = vcombine.low %v5989_v39, %v5999_v15  ;;  %v6013_v42 = vsel %vm10141_vm6, %v6008_v22, %v10820_v59  ;;  %v6023_v8 = vsel %vm10141_vm6, %v6018_v43, %v10841_v55  ;;  %v5927_v15 = vld [vmem:[#allocation2 + $0xc4] sm:$0x1] }
 0x369   : > { %v6031_v41 = vor.u32 %v6030_v56, %v6027_v9  ;;  %v6041_v40 = vor.u32 %v6040_v23, %v10843_v24  ;;  %v6055_v60 = vor.u32 %v6054_v62, %v6051_v21  ;;  %v6068_v38 = vshll.u32 %v5918_v54, 16  ;;  %v5928_v9 = vld [vmem:[#allocation2 + $0xd0] sm:$0xf]  ;;  %v5929_v62 = vld [vmem:[#allocation2 + $0xd4] sm:$0xf] }
 0x36a   : > { %7698 = vmatmul.mubr.bf16.gmra.mrb[28].mxu1 %v10765_v53  ;;  %v6046_v53 = vrot.slane %v6044_v3, 5  ;;  %v6075_v16 = vrot.slane %v6073_v30, 4  ;;  %v6082_v59 = vshll.u32 %v5920_v37, 16  ;;  %v6078_v36 = vrot.slane %v6076_v1, 5 }
 0x36b   : > { %7701 = vmatprep.mubr.bf16.mxu1 %v10791_v10  ;;  %v6065_v10 = vor.u32 %v6064_v34, %v10845_v31  ;;  %v6086_v35 = vshrl.u32 %v5920_v37, 16  ;;  %v6097_v0 = vshrl.u32 %v5922_v18, 16  ;;  %v6100_v11 = vshll.u32 %v5922_v18, 16 }
 0x36c   : > { %v6106_v17 = vshll.u32 %v5923_v29, 16  ;;  %v6110_v47 = vshrl.u32 %v5923_v29, 16  ;;  %v6121_v46 = vshrl.u32 %v5925_v61, 16  ;;  %v6124_v12 = vshll.u32 %v5925_v61, 16 }
 0x36d   : > { %v6032_v45 = vrot.slane %v6031_v41, 4  ;;  %v6042_v4 = vrot.slane %v6041_v40, 4  ;;  %v6130_v52 = vshll.u32 %v5926_v33, 16  ;;  %v6134_v57 = vshrl.u32 %v5926_v33, 16  ;;  %v5932_v40 = vld [vmem:[#allocation2 + $0xe8] sm:$0xf] }
 0x36e   : > { %v6056_v48 = vrot.slane %v6055_v60, 4  ;;  %v6070_v50 = vrot.slane %v6068_v38, 5  ;;  %v10860_v49 = vrot.slane %v6082_v59, 5  ;;  %v6079_v58 = vor.u32 %v6078_v36, %v6075_v16  ;;  %v5935_v36 = vld [vmem:[#allocation2 + $0xfc] sm:$0xf] }
 0x36f   : > { %7894 = vmatmul.mubr.bf16.gmra.mrb[28].mxu0 %v7073_v20  ;;  %v6066_v20 = vrot.slane %v6065_v10, 4  ;;  %v6088_v5 = vrot.slane %v6086_v35, 4  ;;  %v6099_v14 = vrot.slane %v6097_v0, 4  ;;  %v6102_v44 = vrot.slane %v6100_v11, 5  ;;  %v5934_v10 = vld [vmem:[#allocation2 + $0xf8] sm:$0xf] }
 0x370   : > { %7913 = vmatprep.mubr.bf16.mxu0 %v7082_v13  ;;  %v10863_v25 = vrot.slane %v6106_v17, 5  ;;  %v6112_v26 = vrot.slane %v6110_v47, 4  ;;  %v6123_v63 = vrot.slane %v6121_v46, 4  ;;  %v6126_v6 = vrot.slane %v6124_v12, 5  ;;  %v5930_v0 = vld [vmem:[#allocation2 + $0xd8] sm:$0x1] }
 0x371   : > { %v7084_v7 = vcombine.low %v6013_v42, %v6023_v8  ;;  %v6037_v39 = vsel %vm10141_vm6, %v6032_v45, %v10843_v24  ;;  %v10868_v55 = vrot.slane %v6130_v52, 5  ;;  %v6047_v27 = vsel %vm10141_vm6, %v6042_v4, %v6046_v53 }
 0x372   : > { %7702 = vmatmul.mubr.bf16.gmra.mrb[32].mxu1 %v10802_v51  ;;  %v6136_v51 = vrot.slane %v6134_v57, 4  ;;  %v6061_v22 = vsel %vm10141_vm6, %v6056_v48, %v10845_v31  ;;  %v6071_v43 = vsel %vm10141_vm6, %v6066_v20, %v6070_v50  ;;  %v6092_v56 = vshll.u32 %v5921_v32, 16 }
 0x373   : > { %v6080_v3 = vrot.slane %v6079_v58, 4  ;;  %v6089_v24 = vor.u32 %v6088_v5, %v10860_v49  ;;  %v6103_v23 = vor.u32 %v6102_v44, %v6099_v14  ;;  %v6116_v21 = vshll.u32 %v5924_v2, 16 }
 0x374   : > { %v6113_v34 = vor.u32 %v6112_v26, %v10863_v25  ;;  %v6127_v30 = vor.u32 %v6126_v6, %v6123_v63  ;;  %v6140_v54 = vshll.u32 %v5927_v15, 16  ;;  %v6145_v37 = vshrl.u32 %v5928_v9, 16  ;;  %v5933_v6 = vld [vmem:[#allocation2 + $0xec] sm:$0x1] }
 0x375   : > { %v7085_v1 = vcombine.low %v6037_v39, %v6047_v27  ;;  %v6137_v13 = vor.u32 %v6136_v51, %v10868_v55  ;;  %v6148_v31 = vshll.u32 %v5928_v9, 16  ;;  %v7086_v42 = vcombine.low %v6061_v22, %v6071_v43  ;;  %v5936_v39 = vld [vmem:[#allocation2 + $0x100] sm:$0x1]  ;;  %v5937_v43 = vld [vmem:[#allocation2 + $0x10c] sm:$0xf] }
 0x376   : > { %v6094_v41 = vrot.slane %v6092_v56, 5  ;;  %v6154_v18 = vshll.u32 %v5929_v62, 16  ;;  %v6158_v8 = vshrl.u32 %v5929_v62, 16  ;;  %v6085_v53 = vsel %vm10141_vm6, %v6080_v3, %v10860_v49  ;;  %v5940_v62 = vld [vmem:[#allocation2 + $0x120] sm:$0xf] }
 0x377   : > { %7914 = vmatmul.mubr.bf16.vlgmr.msra.gmra.mrb[0].mxu0 %v7083_v19  ;;  %v5931_v19 = vld [vmem:[#allocation2 + $0xe4] sm:$0xf]  ;;  %v6090_v60 = vrot.slane %v6089_v24, 4  ;;  %v6104_v29 = vrot.slane %v6103_v23, 4  ;;  %v6118_v61 = vrot.slane %v6116_v21, 5  ;;  %v6114_v38 = vrot.slane %v6113_v34, 4 }
 0x378   : > { %7917 = vmatprep.mubr.bf16.mxu0 %v7084_v7  ;;  %v6128_v16 = vrot.slane %v6127_v30, 4  ;;  %v6142_v59 = vrot.slane %v6140_v54, 5  ;;  %v6147_v33 = vrot.slane %v6145_v37, 4  ;;  %v6138_v35 = vrot.slane %v6137_v13, 4  ;;  %v5938_v21 = vld [vmem:[#allocation2 + $0x110] sm:$0xf] }
 0x379   : > { %v6150_v11 = vrot.slane %v6148_v31, 5  ;;  %v6169_v17 = vshrl.u32 %v5931_v19, 16  ;;  %v6172_v47 = vshll.u32 %v5931_v19, 16  ;;  %v10883_v46 = vrot.slane %v6154_v18, 5 }
 0x37a   : > { %v6160_v12 = vrot.slane %v6158_v8, 4  ;;  %v6178_v45 = vshll.u32 %v5932_v40, 16  ;;  %v6182_v4 = vshrl.u32 %v5932_v40, 16  ;;  %v6193_v52 = vshrl.u32 %v5934_v10, 16 }
 0x37b   : > { %v6196_v57 = vshll.u32 %v5934_v10, 16  ;;  %v6202_v48 = vshll.u32 %v5935_v36, 16  ;;  %v6206_v20 = vshrl.u32 %v5935_v36, 16  ;;  %v6095_v50 = vsel %vm10141_vm6, %v6090_v60, %v6094_v41 }
 0x37c   : > { %v6109_v49 = vsel %vm10141_vm6, %v6104_v29, %v10863_v25  ;;  %v6119_v32 = vsel %vm10141_vm6, %v6114_v38, %v6118_v61  ;;  %v6164_v58 = vshll.u32 %v5930_v0, 16  ;;  %v6133_v5 = vsel %vm10141_vm6, %v6128_v16, %v10868_v55 }
 0x37d   : > { %v6151_v14 = vor.u32 %v6150_v11, %v6147_v33  ;;  %v6171_v44 = vrot.slane %v6169_v17, 4  ;;  %v6174_v2 = vrot.slane %v6172_v47, 5  ;;  %v6143_v26 = vsel %vm10141_vm6, %v6138_v35, %v6142_v59  ;;  %v5939_v11 = vld [vmem:[#allocation2 + $0x114] sm:$0x1] }
 0x37e   : > { %v6161_v63 = vor.u32 %v6160_v12, %v10883_v46  ;;  %v10898_v7 = vrot.slane %v6178_v45, 5  ;;  %v6184_v25 = vrot.slane %v6182_v4, 4  ;;  %v6195_v15 = vrot.slane %v6193_v52, 4  ;;  %v5942_v4 = vld [vmem:[#allocation2 + $0x128] sm:$0x1] }
 0x37f   : > { %7918 = vmatmul.mubr.bf16.gmra.mrb[4].mxu0 %v7085_v1  ;;  %v6198_v51 = vrot.slane %v6196_v57, 5  ;;  %v10900_v9 = vrot.slane %v6202_v48, 5  ;;  %v6208_v27 = vrot.slane %v6206_v20, 4  ;;  %v7087_v22 = vcombine.low %v6085_v53, %v6095_v50  ;;  %v5941_v1 = vld [vmem:[#allocation2 + $0x124] sm:$0xf] }
 0x380   : > { %7921 = vmatprep.mubr.bf16.mxu0 %v7086_v42  ;;  %v7088_v55 = vcombine.low %v6109_v49, %v6119_v32  ;;  %v7089_v56 = vcombine.low %v6133_v5, %v6143_v26  ;;  %v6152_v3 = vrot.slane %v6151_v14, 4  ;;  %v6166_v24 = vrot.slane %v6164_v58, 5  ;;  %v5943_v48 = vld [vmem:[#allocation2 + $0x134] sm:$0xf]  ;;  %v5944_v49 = vld [vmem:[#allocation2 + $0x138] sm:$0xf] }
 0x381   : > { %v6175_v23 = vor.u32 %v6174_v2, %v6171_v44  ;;  %v6162_v34 = vrot.slane %v6161_v63, 4  ;;  %v6185_v30 = vor.u32 %v6184_v25, %v10898_v7  ;;  %v6188_v54 = vshll.u32 %v5933_v6, 16  ;;  %v5946_v44 = vld [vmem:[#allocation2 + $0x148] sm:$0xf]  ;;  %v5947_v2 = vld [vmem:[#allocation2 + $0x14c] sm:$0xf] }
 0x382   : > { %v6212_v37 = vshll.u32 %v5936_v39, 16  ;;  %v6199_v13 = vor.u32 %v6198_v51, %v6195_v15  ;;  %v6209_v31 = vor.u32 %v6208_v27, %v10900_v9  ;;  %v6217_v19 = vshrl.u32 %v5937_v43, 16 }
 0x383   : > { %v6220_v42 = vshll.u32 %v5937_v43, 16  ;;  %v6226_v41 = vshll.u32 %v5938_v21, 16  ;;  %v6230_v18 = vshrl.u32 %v5938_v21, 16  ;;  %v6241_v8 = vshrl.u32 %v5940_v62, 16 }
 0x384   : > { %v6244_v40 = vshll.u32 %v5940_v62, 16  ;;  %v6157_v53 = vsel %vm10141_vm6, %v6152_v3, %v10883_v46  ;;  %v6176_v60 = vrot.slane %v6175_v23, 4  ;;  %v6250_v29 = vshll.u32 %v5941_v1, 16  ;;  %v5949_v23 = vld [vmem:[#allocation2 + $0x15c] sm:$0xf] }
 0x385   : > { %v6254_v61 = vshrl.u32 %v5941_v1, 16  ;;  %v6167_v10 = vsel %vm10141_vm6, %v6162_v34, %v6166_v24  ;;  %v6186_v38 = vrot.slane %v6185_v30, 4  ;;  %v6190_v16 = vrot.slane %v6188_v54, 5  ;;  %v5950_v54 = vld [vmem:[#allocation2 + $0x160] sm:$0xf] }
 0x386   : > { %v6214_v59 = vrot.slane %v6212_v37, 5  ;;  %v6200_v33 = vrot.slane %v6199_v13, 4  ;;  %v6210_v36 = vrot.slane %v6209_v31, 4  ;;  %v6219_v35 = vrot.slane %v6217_v19, 4  ;;  %v5945_v19 = vld [vmem:[#allocation2 + $0x13c] sm:$0x1] }
 0x387   : > { %7922 = vmatmul.mubr.bf16.gmra.mrb[8].mxu0 %v7087_v22  ;;  %v6222_v0 = vrot.slane %v6220_v42, 5  ;;  %v10909_v17 = vrot.slane %v6226_v41, 5  ;;  %v6232_v47 = vrot.slane %v6230_v18, 4  ;;  %v6243_v12 = vrot.slane %v6241_v8, 4 }
 0x388   : > { %7925 = vmatprep.mubr.bf16.mxu0 %v7088_v55  ;;  %v6246_v45 = vrot.slane %v6244_v40, 5  ;;  %v7090_v46 = vcombine.low %v6157_v53, %v6167_v10  ;;  %v10911_v52 = vrot.slane %v6250_v29, 5  ;;  %v6256_v57 = vrot.slane %v6254_v61, 4  ;;  %v5948_v40 = vld [vmem:[#allocation2 + $0x150] sm:$0x1] }
 0x389   : > { %v6181_v20 = vsel %vm10141_vm6, %v6176_v60, %v10898_v7  ;;  %v6191_v50 = vsel %vm10141_vm6, %v6186_v38, %v6190_v16  ;;  %v6205_v32 = vsel %vm10141_vm6, %v6200_v33, %v10900_v9  ;;  %v6215_v58 = vsel %vm10141_vm6, %v6210_v36, %v6214_v59 }
 0x38a   : > { %v6223_v5 = vor.u32 %v6222_v0, %v6219_v35  ;;  %v6236_v14 = vshll.u32 %v5939_v11, 16  ;;  %v6233_v26 = vor.u32 %v6232_v47, %v10909_v17  ;;  %v6247_v63 = vor.u32 %v6246_v45, %v6243_v12 }
 0x38b   : > { %v6260_v6 = vshll.u32 %v5942_v4, 16  ;;  %v6265_v7 = vshrl.u32 %v5943_v48, 16  ;;  %v6257_v25 = vor.u32 %v6256_v57, %v10911_v52  ;;  %v6268_v39 = vshll.u32 %v5943_v48, 16  ;;  %v5951_v57 = vld [vmem:[#allocation2 + $0x164] sm:$0x1] }
 0x38c   : > { %v6274_v15 = vshll.u32 %v5944_v49, 16  ;;  %v6278_v51 = vshrl.u32 %v5944_v49, 16  ;;  %v6289_v27 = vshrl.u32 %v5946_v44, 16  ;;  %v6292_v22 = vshll.u32 %v5946_v44, 16 }
 0x38d   : > { %v6298_v9 = vshll.u32 %v5947_v2, 16  ;;  %v6302_v55 = vshrl.u32 %v5947_v2, 16  ;;  %v7091_v43 = vcombine.low %v6181_v20, %v6191_v50  ;;  %v6224_v3 = vrot.slane %v6223_v5, 4 }
 0x38e   : > { %v6238_v24 = vrot.slane %v6236_v14, 5  ;;  %v6234_v21 = vrot.slane %v6233_v26, 4  ;;  %v6248_v62 = vrot.slane %v6247_v63, 4  ;;  %v6262_v34 = vrot.slane %v6260_v6, 5 }
 0x38f   : > { %7926 = vmatmul.mubr.bf16.gmra.mrb[12].mxu0 %v7089_v56  ;;  %v7092_v56 = vcombine.low %v6205_v32, %v6215_v58  ;;  %v6267_v30 = vrot.slane %v6265_v7, 4  ;;  %v6258_v37 = vrot.slane %v6257_v25, 4  ;;  %v6270_v1 = vrot.slane %v6268_v39, 5 }
 0x390   : > { %7929 = vmatprep.mubr.bf16.mxu0 %v7090_v46  ;;  %v6276_v13 = vrot.slane %v6274_v15, 5  ;;  %v6280_v31 = vrot.slane %v6278_v51, 4  ;;  %v6291_v42 = vrot.slane %v6289_v27, 4  ;;  %v6294_v41 = vrot.slane %v6292_v22, 5 }
 0x391   : > { %v6300_v18 = vrot.slane %v6298_v9, 5  ;;  %v6304_v8 = vrot.slane %v6302_v55, 4  ;;  %v6313_v53 = vshrl.u32 %v5949_v23, 16  ;;  %v6316_v60 = vshll.u32 %v5949_v23, 16 }
 0x392   : > { %v6322_v29 = vshll.u32 %v5950_v54, 16  ;;  %v6326_v61 = vshrl.u32 %v5950_v54, 16  ;;  %v6229_v10 = vsel %vm10141_vm6, %v6224_v3, %v10909_v17  ;;  %v6239_v38 = vsel %vm10141_vm6, %v6234_v21, %v6238_v24 }
 0x393   : > { %v6253_v16 = vsel %vm10141_vm6, %v6248_v62, %v10911_v52  ;;  %v6271_v59 = vor.u32 %v6270_v1, %v6267_v30  ;;  %v6281_v33 = vor.u32 %v6280_v31, %v6276_v13  ;;  %v6284_v36 = vshll.u32 %v5945_v19, 16 }
 0x394   : > { %v6263_v35 = vsel %vm10141_vm6, %v6258_v37, %v6262_v34  ;;  %v6295_v0 = vor.u32 %v6294_v41, %v6291_v42  ;;  %v6305_v11 = vor.u32 %v6304_v8, %v6300_v18  ;;  %v6308_v47 = vshll.u32 %v5948_v40, 16 }
 0x395   : > { %v6315_v12 = vrot.slane %v6313_v53, 4  ;;  %v6318_v45 = vrot.slane %v6316_v60, 5  ;;  %v6324_v46 = vrot.slane %v6322_v29, 5  ;;  %v6328_v17 = vrot.slane %v6326_v61, 4 }
 0x396   : > { %v7093_v4 = vcombine.low %v6229_v10, %v6239_v38  ;;  %v7094_v48 = vcombine.low %v6253_v16, %v6263_v35  ;;  %v6272_v20 = vrot.slane %v6271_v59, 4  ;;  %v6282_v50 = vrot.slane %v6281_v33, 4  ;;  %v10982_v16 = vld [vmem:[%s11135_s5] ss:$0 sm:$0xff] }
 0x397   : > { %7930 = vmatmul.mubr.bf16.gmra.mrb[16].mxu0 %v7091_v43  ;;  %v6286_v49 = vrot.slane %v6284_v36, 5  ;;  %v6296_v52 = vrot.slane %v6295_v0, 4  ;;  %v6306_v32 = vrot.slane %v6305_v11, 4  ;;  %v6310_v58 = vrot.slane %v6308_v47, 5 }
 0x398   : > { %7933 = vmatprep.mubr.bf16.mxu0 %v7092_v56  ;;  %v6319_v5 = vor.u32 %v6318_v45, %v6315_v12  ;;  %v6329_v14 = vor.u32 %v6328_v17, %v6324_v46  ;;  %v6332_v44 = vshll.u32 %v5951_v57, 16  ;;  %v6277_v2 = vsel %vm10141_vm6, %v6272_v20, %v6276_v13 }
 0x399   : > { %v6287_v26 = vsel %vm10141_vm6, %v6282_v50, %v6286_v49  ;;  %v6301_v63 = vsel %vm10141_vm6, %v6296_v52, %v6300_v18  ;;  %v6311_v6 = vsel %vm10141_vm6, %v6306_v32, %v6310_v58 }
 0x39a   : > { %v6320_v7 = vrot.slane %v6319_v5, 4  ;;  %v6330_v25 = vrot.slane %v6329_v14, 4  ;;  %v6334_v39 = vrot.slane %v6332_v44, 5  ;;  %v7095_v15 = vcombine.low %v6277_v2, %v6287_v26 }
 0x39b   : > { %v7096_v51 = vcombine.low %v6301_v63, %v6311_v6 }
 0x39c   : > { %v6325_v27 = vsel %vm10141_vm6, %v6320_v7, %v6324_v46  ;;  %v6335_v22 = vsel %vm10141_vm6, %v6330_v25, %v6334_v39 }
 0x39d   : > { %v7097_v9 = vcombine.low %v6325_v27, %v6335_v22 }
 0x39f   : > { %7934 = vmatmul.mubr.bf16.gmra.mrb[20].mxu0 %v7093_v4 }
 0x3a0   : > { %7937 = vmatprep.mubr.bf16.mxu0 %v7094_v48 }
 0x3a7   : > { %7938 = vmatmul.mubr.bf16.gmra.mrb[24].mxu0 %v7095_v15 }
 0x3a8   : > { %7941 = vmatprep.mubr.bf16.mxu0 %v7096_v51 }
 0x3af   : > { %7942 = vmatmul.mubr.bf16.gmra.mrb[28].mxu0 %v7097_v9 }
 0x40c   : > { %v7675_v55 = vpop.f32.mrb[4].mxu1 }
 0x40d   : > { %v3560_v43 = vpop.f32.mrb[5].mxu1  ;;  %v7993_v36 = vadd.f32 %v7675_v55, %v10982_v16 }
 0x40e   : > { %v7676_v56 = vpop.f32.mrb[6].mxu1  ;;  %v7995_v0 = vadd.f32 %v10982_v16, %v3560_v43 }
 0x40f   : > { %v3563_v3 = vpop.f32.mrb[7].mxu1  ;;  %v7997_v12 = vadd.f32 %v7676_v56, %v10982_v16 }
 0x410   : > { %v7999_v17 = vadd.f32 %v10982_v16, %v3563_v3 }
 0x414   : > { %v7679_v24 = vpop.f32.mrb[8].mxu1 }
 0x415   : > { %v3576_v23 = vpop.f32.mrb[9].mxu1  ;;  %v8001_v49 = vadd.f32 %v7679_v24, %v10982_v16 }
 0x416   : > { %v7680_v21 = vpop.f32.mrb[10].mxu1  ;;  %v8003_v52 = vadd.f32 %v10982_v16, %v3576_v23 }
 0x417   : > { %v3579_v62 = vpop.f32.mrb[11].mxu1  ;;  %v8005_v58 = vadd.f32 %v7680_v21, %v10982_v16 }
 0x418   : > { %v8007_v44 = vadd.f32 %v10982_v16, %v3579_v62 }
 0x41c   : > { %v7683_v34 = vpop.f32.mrb[12].mxu1 }
 0x41d   : > { %v3592_v30 = vpop.f32.mrb[13].mxu1  ;;  %v8009_v25 = vadd.f32 %v7683_v34, %v10982_v16 }
 0x41e   : > { %v7684_v54 = vpop.f32.mrb[14].mxu1  ;;  %v8011_v39 = vadd.f32 %v10982_v16, %v3592_v30 }
 0x41f   : > { %v3595_v37 = vpop.f32.mrb[15].mxu1  ;;  %v8013_v51 = vadd.f32 %v7684_v54, %v10982_v16 }
 0x420   : > { %v8015_v9 = vadd.f32 %v10982_v16, %v3595_v37 }
 0x424   : > { %v10947_v1 = vpop.f32.mrb[16].mxu1 }
 0x425   : > { %v10949_v13 = vpop.f32.mrb[17].mxu1  ;;  %v8017_v23 = vadd.f32 %v10947_v1, %v10982_v16 }
 0x426   : > { %v10951_v28 = vpop.f32.mrb[18].mxu1  ;;  %v8019_v21 = vadd.f32 %v10982_v16, %v10949_v13 }
 0x427   : > { %v10953_v31 = vpop.f32.mrb[19].mxu1  ;;  %v8021_v34 = vadd.f32 %v10951_v28, %v10982_v16 }
 0x428   : > { %v8023_v37 = vadd.f32 %v10982_v16, %v10953_v31 }
 0x42d   : > { %v10955_v19 = vpop.f32.mrb[20].mxu1 }
 0x42e   : > { %v10957_v42 = vpop.f32.mrb[21].mxu1  ;;  %v8025_v13 = vadd.f32 %v10955_v19, %v10982_v16 }
 0x42f   : > { %v10959_v41 = vpop.f32.mrb[22].mxu1  ;;  %v8027_v28 = vadd.f32 %v10982_v16, %v10957_v42 }
 0x430   : > { %v10961_v18 = vpop.f32.mrb[23].mxu1 }
 0x435   : > { %v10963_v8 = vpop.f32.mrb[24].mxu1 }
 0x436   : > { %v10965_v40 = vpop.f32.mrb[25].mxu1  ;;  %v8033_v42 = vadd.f32 %v10963_v8, %v10982_v16 }
 0x437   : > { %v10967_v53 = vpop.f32.mrb[26].mxu1 }
 0x438   : > { %v10969_v60 = vpop.f32.mrb[27].mxu1 }
 0x43d   : > { %v10971_v29 = vpop.f32.mrb[28].mxu1 }
 0x43e   : > { %v10973_v61 = vpop.f32.mrb[29].mxu1 }
 0x43f   : > { %v10975_v10 = vpop.f32.mrb[30].mxu1 }
 0x440   : > { %v10977_v38 = vpop.f32.mrb[31].mxu1 }
 0x445   : > { %v10984_v59 = vpop.f32.mrb[32].mxu1 }
 0x446   : > { %v10986_v33 = vpop.f32.mrb[33].mxu1 }
 0x447   : > { %v10989_v35 = vpop.f32.mrb[34].mxu1 }
 0x448   : > { %v10992_v47 = vpop.f32.mrb[35].mxu1 }
 0x44a   : > { %v7915_v11 = vpop.f32.mrb[0].mxu0 }
 0x44b   : > { %v7994_v45 = vadd.f32 %v7993_v36, %v7915_v11  ;;  %v6499_v46 = vpop.f32.mrb[1].mxu0 }
 0x44c   : > { %v7996_v4 = vadd.f32 %v7995_v0, %v6499_v46  ;;  %v7916_v57 = vpop.f32.mrb[2].mxu0 }
 0x44d   : > { %6660 = vst [vmem:[%s10998_s11 + $0x10] sm:$0xff] %v7994_v45  ;;  %v7998_v48 = vadd.f32 %v7997_v12, %v7916_v57  ;;  %v6502_v20 = vpop.f32.mrb[3].mxu0  ;;  %v8029_v45 = vadd.f32 %v10959_v41, %v10982_v16  ;;  %v8035_v41 = vadd.f32 %v10982_v16, %v10965_v40  ;;  %v8041_v40 = vadd.f32 %v10971_v29, %v10982_v16 }
 0x44e   : > { %6658 = vst [vmem:[%s10998_s11] sm:$0xff] %v7996_v4  ;;  %v8000_v50 = vadd.f32 %v7999_v17, %v6502_v20  ;;  %v8031_v4 = vadd.f32 %v10982_v16, %v10961_v18 }
 0x44f   : > { %6661 = vst [vmem:[%s10998_s11 + $0x18] sm:$0xff] %v7998_v48 }
 0x450   : > { %6659 = vst [vmem:[%s10998_s11 + $0x8] sm:$0xff] %v8000_v50 }
 0x452   : > { %v7919_v32 = vpop.f32.mrb[4].mxu0 }
 0x453   : > { %v8002_v5 = vadd.f32 %v8001_v49, %v7919_v32  ;;  %v6515_v14 = vpop.f32.mrb[5].mxu0  ;;  %v8037_v49 = vadd.f32 %v10967_v53, %v10982_v16  ;;  %v8043_v53 = vadd.f32 %v10982_v16, %v10973_v61  ;;  %v8049_v61 = vadd.f32 %v10984_v59, %v10982_v16 }
 0x454   : > { %v8004_v2 = vadd.f32 %v8003_v52, %v6515_v14  ;;  %v7920_v26 = vpop.f32.mrb[6].mxu0 }
 0x455   : > { %6664 = vst [vmem:[%s10998_s11 + $0x30] sm:$0xff] %v8002_v5  ;;  %v8006_v63 = vadd.f32 %v8005_v58, %v7920_v26  ;;  %v6518_v6 = vpop.f32.mrb[7].mxu0  ;;  %v8039_v58 = vadd.f32 %v10982_v16, %v10969_v60  ;;  %v8045_v26 = vadd.f32 %v10975_v10, %v10982_v16  ;;  %v8051_v10 = vadd.f32 %v10982_v16, %v10986_v33 }
 0x456   : > { %6662 = vst [vmem:[%s10998_s11 + $0x20] sm:$0xff] %v8004_v2  ;;  %v8008_v7 = vadd.f32 %v8007_v44, %v6518_v6 }
 0x457   : > { %6665 = vst [vmem:[%s10998_s11 + $0x38] sm:$0xff] %v8006_v63 }
 0x458   : > { %6663 = vst [vmem:[%s10998_s11 + $0x28] sm:$0xff] %v8008_v7  ;;  %v8047_v7 = vadd.f32 %v10982_v16, %v10977_v38  ;;  %v8053_v38 = vadd.f32 %v10989_v35, %v10982_v16 }
 0x45a   : > { %v7923_v15 = vpop.f32.mrb[8].mxu0 }
 0x45b   : > { %v8010_v27 = vadd.f32 %v8009_v25, %v7923_v15  ;;  %v6531_v22 = vpop.f32.mrb[9].mxu0 }
 0x45c   : > { %v8012_v55 = vadd.f32 %v8011_v39, %v6531_v22  ;;  %v7924_v43 = vpop.f32.mrb[10].mxu0 }
 0x45d   : > { %6668 = vst [vmem:[%s10998_s11 + $0x50] sm:$0xff] %v8010_v27  ;;  %v8014_v56 = vadd.f32 %v8013_v51, %v7924_v43  ;;  %v6534_v3 = vpop.f32.mrb[11].mxu0 }
 0x45e   : > { %6666 = vst [vmem:[%s10998_s11 + $0x40] sm:$0xff] %v8012_v55  ;;  %v8016_v24 = vadd.f32 %v8015_v9, %v6534_v3  ;;  %v8055_v55 = vadd.f32 %v10982_v16, %v10992_v47 }
 0x45f   : > { %6669 = vst [vmem:[%s10998_s11 + $0x58] sm:$0xff] %v8014_v56 }
 0x460   : > { %6667 = vst [vmem:[%s10998_s11 + $0x48] sm:$0xff] %v8016_v24 }
 0x462   : > { %v7927_v62 = vpop.f32.mrb[12].mxu0 }
 0x463   : > { %v8018_v30 = vadd.f32 %v8017_v23, %v7927_v62  ;;  %v6547_v54 = vpop.f32.mrb[13].mxu0 }
 0x464   : > { %v8020_v36 = vadd.f32 %v8019_v21, %v6547_v54  ;;  %v7928_v0 = vpop.f32.mrb[14].mxu0 }
 0x465   : > { %6672 = vst [vmem:[%s10998_s11 + $0x70] sm:$0xff] %v8018_v30  ;;  %v8022_v11 = vadd.f32 %v8021_v34, %v7928_v0  ;;  %v6550_v12 = vpop.f32.mrb[15].mxu0 }
 0x466   : > { %6670 = vst [vmem:[%s10998_s11 + $0x60] sm:$0xff] %v8020_v36  ;;  %v8024_v1 = vadd.f32 %v8023_v37, %v6550_v12 }
 0x467   : > { %6673 = vst [vmem:[%s10998_s11 + $0x78] sm:$0xff] %v8022_v11 }
 0x468   : > { %6671 = vst [vmem:[%s10998_s11 + $0x68] sm:$0xff] %v8024_v1 }
 0x46a   : > { %v7931_v31 = vpop.f32.mrb[16].mxu0 }
 0x46b   : > { %v8026_v46 = vadd.f32 %v8025_v13, %v7931_v31  ;;  %v6563_v17 = vpop.f32.mrb[17].mxu0 }
 0x46c   : > { %v8028_v57 = vadd.f32 %v8027_v28, %v6563_v17  ;;  %v7932_v48 = vpop.f32.mrb[18].mxu0 }
 0x46d   : > { %6676 = vst [vmem:[%s10998_s11 + $0x90] sm:$0xff] %v8026_v46  ;;  %v8030_v20 = vadd.f32 %v8029_v45, %v7932_v48  ;;  %v6566_v50 = vpop.f32.mrb[19].mxu0 }
 0x46e   : > { %6674 = vst [vmem:[%s10998_s11 + $0x80] sm:$0xff] %v8028_v57  ;;  %v8032_v19 = vadd.f32 %v8031_v4, %v6566_v50 }
 0x46f   : > { %6677 = vst [vmem:[%s10998_s11 + $0x98] sm:$0xff] %v8030_v20 }
 0x470   : > { %6675 = vst [vmem:[%s10998_s11 + $0x88] sm:$0xff] %v8032_v19 }
 0x472   : > { %v7935_v18 = vpop.f32.mrb[20].mxu0 }
 0x473   : > { %v8034_v52 = vadd.f32 %v8033_v42, %v7935_v18  ;;  %v6579_v32 = vpop.f32.mrb[21].mxu0 }
 0x474   : > { %v8036_v5 = vadd.f32 %v8035_v41, %v6579_v32  ;;  %v7936_v14 = vpop.f32.mrb[22].mxu0 }
 0x475   : > { %6680 = vst [vmem:[%s10998_s11 + $0xb0] sm:$0xff] %v8034_v52  ;;  %v8038_v44 = vadd.f32 %v8037_v49, %v7936_v14  ;;  %v6582_v2 = vpop.f32.mrb[23].mxu0 }
 0x476   : > { %6678 = vst [vmem:[%s10998_s11 + $0xa0] sm:$0xff] %v8036_v5  ;;  %v8040_v8 = vadd.f32 %v8039_v58, %v6582_v2 }
 0x477   : > { %6681 = vst [vmem:[%s10998_s11 + $0xb8] sm:$0xff] %v8038_v44 }
 0x478   : > { %6679 = vst [vmem:[%s10998_s11 + $0xa8] sm:$0xff] %v8040_v8 }
 0x47a   : > { %v7939_v60 = vpop.f32.mrb[24].mxu0 }
 0x47b   : > { %v8042_v63 = vadd.f32 %v8041_v40, %v7939_v60  ;;  %v6595_v6 = vpop.f32.mrb[25].mxu0 }
 0x47c   : > { %v8044_v25 = vadd.f32 %v8043_v53, %v6595_v6  ;;  %v7940_v39 = vpop.f32.mrb[26].mxu0 }
 0x47d   : > { %6684 = vst [vmem:[%s10998_s11 + $0xd0] sm:$0xff] %v8042_v63  ;;  %v8046_v15 = vadd.f32 %v8045_v26, %v7940_v39  ;;  %v6598_v51 = vpop.f32.mrb[27].mxu0 }
 0x47e   : > { %6682 = vst [vmem:[%s10998_s11 + $0xc0] sm:$0xff] %v8044_v25  ;;  %v8048_v29 = vadd.f32 %v8047_v7, %v6598_v51 }
 0x47f   : > { %6685 = vst [vmem:[%s10998_s11 + $0xd8] sm:$0xff] %v8046_v15 }
 0x480   : > { %6683 = vst [vmem:[%s10998_s11 + $0xc8] sm:$0xff] %v8048_v29 }
 0x482   : > { %v7943_v27 = vpop.f32.mrb[28].mxu0 }
 0x483   : > { %v8050_v22 = vadd.f32 %v8049_v61, %v7943_v27  ;;  %v6611_v9 = vpop.f32.mrb[29].mxu0 }
 0x484   : > { %v8052_v59 = vadd.f32 %v8051_v10, %v6611_v9  ;;  %v7944_v43 = vpop.f32.mrb[30].mxu0 }
 0x485   : > { %6688 = vst [vmem:[%s10998_s11 + $0xf0] sm:$0xff] %v8050_v22  ;;  %v8054_v56 = vadd.f32 %v8053_v38, %v7944_v43  ;;  %v6614_v33 = vpop.f32.mrb[31].mxu0 }
 0x486   : > { %6686 = vst [vmem:[%s10998_s11 + $0xe0] sm:$0xff] %v8052_v59  ;;  %v8056_v35 = vadd.f32 %v8055_v55, %v6614_v33 }
 0x487   : > { %6689 = vst [vmem:[%s10998_s11 + $0xf8] sm:$0xff] %v8054_v56 }
 0x488   : > { %6687 = vst [vmem:[%s10998_s11 + $0xe8] sm:$0xff] %v8056_v35 }
 0x489   : > { %8737 = shalt.err (!%p8734_p7)
}
 0x48a   : > { %s8738_s19 = scalar_lea.hbm %s11082_s25, 4096  ;;  %s8742_s26 = scalar_lea.hbm %s11136_s6, 16384 }
 0x48b   : > { %p8739_p9 = scmp.ne.s32.totalorder %s11082_s25, %s8738_s19  ;;  %p8743_p5 = scmp.lt.u32.totalorder %s11082_s25, %s11136_s6 }
 0x48c   : > { %p8744_p10 = scmp.lt.u32.totalorder %s8742_s26, %s8738_s19  ;;  %p8746_p2 = scmp.lt.u32.totalorder %s8738_s19, %s11082_s25 }
 0x48d   : > { %p8740_p12 = pnand %p8739_p9, %p8963_p8 }
 0x48e   : > { %p8745_p1 = por %p8744_p10, %p8743_p5 }
 0x48f   : > { %p8741_p0 = pneg %p8740_p12 }
 0x490   : > { %p8747_p4 = por %p8746_p2, %p8745_p1 }
 0x492   : > { %p8748_p6 = pnand %p8747_p4, %p8741_p0 }
 0x494   : > { %8751 = shalt.err (!%p8748_p6)
}
 0x495   : > { %s8808_s10 = smov 128   ;;  %s8809_s7 = smov 8  }
 0x496   : > { %8291 = dma.vmem_to_hbm [thread:$0]  (%p8963_p8), %s11084_s15, 4096, %s11082_s25, %s6691_s16, %s8808_s10, %s8808_s10, %s8809_s7  }
 0x497 PF: > { %p8313_p11 = scmp.ge.s32.totalorder %s8794_s24, 2  ;;  %s6719_s18 = sand.u32 1, %s8782_s21  }
 0x498   : > { %p11378_p13 = scmp.ne.s32.totalorder %s11191_s28, 0  ;;  %s6720_s30 = scalar_lea.sflag [#allocation5], %s6719_s18 }
 0x49a   : > { %p8305_p3 = pnand %p8313_p11, %p11378_p13 }
 0x49c   : > { %8777 = dma.done.wait (!%p8305_p3), %s6720_s30, 4096  }
 0x49d   : > { %8779 = vsyncadd (!%p8305_p3), %s6720_s30, 4294963200  ;;  %p20_p7 = scmp.ge.s32.totalorder %s8950_s9, 6   ;;  %s11379_s21 = smov %s8786_s22 }
 0x49e   : > { %s11380_s22 = smov %s8790_s23  ;;  %s11381_s23 = smov %s8959_s13 }
 0x49f   : > { %s11382_s24 = smov %s8950_s9  ;;  %22 = sbr.rel (!%p20_p7) target bundleno = 6 (0x6), region = 107 }
 0x4a6   :  { %6725 = vsyncpa [#allocation4], 1 }
 0x4a7   :  { %6727 = vsyncpa [#allocation4 + $0x1], 1 }
 0x4a8   :  { %6728 = vsyncpa [#allocation7], 1 }
 0x4a9   :  { %6729 = vsyncpa [#allocation5], 1 }
 0x4aa   :  { %6731 = vsyncpa [#allocation5 + $0x1], 1 }

</bundles_post_ra>
